<compile_context>
chip_gen: v7x
topology: tpu7x:2x2x1
jax: 0.10.0
libtpu: 0.0.40
codegen_flags: <defaults>
</compile_context>

<pallas_src>
import functools

import jax
import jax.numpy as jnp
from jax.experimental import pallas as pl
from jax.experimental.pallas import tpu as pltpu

VMEM_SPEC = pl.BlockSpec(memory_space=pltpu.MemorySpace.VMEM)
BP = 8  # batch rows padded to one full sublane tile for the time-major RNN layout


# --------------------------------------------------------------------------- #
# Fused kernel: embedding -> CNN stack -> bi-LSTM -> bi-GRU -> head
# --------------------------------------------------------------------------- #
def _fused_kernel(B, S, H, V,
                  tok_ref, emb_ref,
                  w0_ref, b0_ref, w1_ref, b1_ref, p1_ref, p2_ref,
                  lstm_wih_ref, lstm_b_ref, lstm_whh_ref,
                  gru_win_ref, gru_bih_ref, gru_whh_ref, gru_bhh_ref,
                  fc1_w_ref, fc1_b_ref, fc2_w_ref, fc2_b_ref, fc3_w_ref, fc3_b_ref,
                  o_ref):
    f32, bf16 = jnp.float32, jnp.bfloat16
    G = 4 * H            # per-direction fused gate width (= 128 for H = 32)
    S1, S2 = S // 2, S // 4

    # ---------------- embedding: one-hot matmul on the MXU (replaces XLA gather) ----------
    tok = tok_ref[...]                                                    # (B*S, 1) int32
    vocab_iota = jax.lax.broadcasted_iota(jnp.int32, (B * S, V), 1)
    onehot = jnp.where(tok == vocab_iota, 1.0, 0.0).astype(bf16)          # (B*S, V)
    x = jnp.dot(onehot, emb_ref[...], preferred_element_type=f32)         # (B*S, E)

    # ---------------- CNN stack: 2 x [Conv1d(k=3, pad=1) + ReLU + MaxPool1d(2)] -----------
    def conv_relu(x, w_ref, b_ref, blk):
        # +-1 time shift within each length-`blk` batch block: sublane roll + boundary mask
        n = x.shape[0]
        pos = jax.lax.broadcasted_iota(jnp.int32, x.shape, 0) % blk
        xm1 = jnp.where(pos > 0, pltpu.roll(x, 1, axis=0), 0.0)            # x[t-1]
        xp1 = jnp.where(pos < blk - 1, pltpu.roll(x, n - 1, axis=0), 0.0)  # x[t+1]
        y = (jnp.dot(xm1.astype(bf16), w_ref[0], preferred_element_type=f32)
             + jnp.dot(x.astype(bf16), w_ref[1], preferred_element_type=f32)
             + jnp.dot(xp1.astype(bf16), w_ref[2], preferred_element_type=f32)
             + b_ref[...])
        return jnp.maximum(y, 0.0)

    def pool(y, sel_ref):
        # pairwise max on VPU, then ONE 0/1 selection matmul (also does the layout change)
        ymax = jnp.maximum(y, pltpu.roll(y, y.shape[0] - 1, axis=0))       # max(y[i], y[i+1])
        return jnp.dot(sel_ref[...], ymax.astype(bf16), preferred_element_type=f32)

    y = conv_relu(x, w0_ref, b0_ref, S)            # (B*S, C)   batch-major
    y = pool(y, p1_ref)                            # (B*S1, C)  batch-major
    y = conv_relu(y, w1_ref, b1_ref, S1)           # (B*S1, C)
    conv_out = pool(y, p2_ref)                     # (S2*BP, C) time-major, batch padded

    # ---------------- bi-LSTM (fwd/bwd fused into one block-diag recurrent matmul) --------
    lane = jax.lax.broadcasted_iota(jnp.int32, (BP, G), 1)
    state_mask = lane < H

    def chunk(v, k):            # (BP, G): bring lanes [k*H, (k+1)*H) down to lanes [0, H)
        return v if k == 0 else pltpu.roll(v, G - k * H, axis=1)

    # hoisted input projection, all timesteps, both directions (fwd gates | bwd gates)
    xg = (jnp.dot(conv_out.astype(bf16), lstm_wih_ref[...],
                  preferred_element_type=f32) + lstm_b_ref[...])          # (S2*BP, 2G)

    def lstm_half(sg, tg, c):                       # gate order [i | f | g | o]
        c = jnp.where(state_mask, chunk(sg, 1) * c + chunk(sg, 0) * chunk(tg, 2), 0.0)
        h = jnp.where(state_mask, chunk(sg, 3) * jnp.tanh(c), 0.0)
        return h, c

    zero = jnp.zeros((BP, G), f32)
    h_f = c_f = h_b = c_b = zero
    hf_t = [None] * S2          # fwd LSTM output at original time t
    hb_t = [None] * S2          # bwd LSTM output at original time t
    for s in range(S2):                                          # S2 = 4 -> fully unrolled
        rs = S2 - 1 - s
        gin = jnp.concatenate([xg[s * BP:(s + 1) * BP, 0:G],
                               xg[rs * BP:(rs + 1) * BP, G:2 * G]], axis=1)   # (BP, 2G)
        g = gin + jnp.dot(jnp.concatenate([h_f, h_b], axis=1).astype(bf16),
                          lstm_whh_ref[...], preferred_element_type=f32)      # one MXU push
        sg, tg = jax.nn.sigmoid(g), jnp.tanh(g)
        h_f, c_f = lstm_half(sg[:, 0:G], tg[:, 0:G], c_f)
        h_b, c_b = lstm_half(sg[:, G:2 * G], tg[:, G:2 * G], c_b)
        hf_t[s], hb_t[rs] = h_f, h_b

    # ---------------- bi-GRU (same fusion); input projection kept in vregs ----------------
    gi_t = [jnp.dot(jnp.concatenate([hf_t[t], hb_t[t]], axis=1).astype(bf16),
                    gru_win_ref[...], preferred_element_type=f32) + gru_bih_ref[...]
            for t in range(S2)]                                             # (BP, 2G) each

    def gru_half(gi, gh, h):                        # gate order [r | z | n | pad]
        sg = jax.nn.sigmoid(gi + gh)
        r, z = chunk(sg, 0), chunk(sg, 1)
        n = jnp.tanh(chunk(gi, 2) + r * chunk(gh, 2))
        return jnp.where(state_mask, (1.0 - z) * n + z * h, 0.0)

    h_gf = h_gb = h_gb_last = zero
    for s in range(S2):
        rs = S2 - 1 - s
        gh = (jnp.dot(jnp.concatenate([h_gf, h_gb], axis=1).astype(bf16),
                      gru_whh_ref[...], preferred_element_type=f32)
              + gru_bhh_ref[...])                                           # (BP, 2G)
        h_gf = gru_half(gi_t[s][:, 0:G], gh[:, 0:G], h_gf)
        h_gb = gru_half(gi_t[rs][:, G:2 * G], gh[:, G:2 * G], h_gb)
        if s == 0:
            h_gb_last = h_gb       # bwd output aligned with original time S2-1 (= x[:, -1, :])

    # ---------------- pooling_method == 'last_state' + MLP head + sigmoid (dropout = id) --
    last = jnp.concatenate([h_gf, h_gb_last], axis=1)                       # (BP, 2G)
    h = jnp.maximum(jnp.dot(last.astype(bf16), fc1_w_ref[...],
                            preferred_element_type=f32) + fc1_b_ref[...], 0.0)
    h = jnp.maximum(jnp.dot(h.astype(bf16), fc2_w_ref[...],
                            preferred_element_type=f32) + fc2_b_ref[...], 0.0)
    o_ref[...] = jax.nn.sigmoid(jnp.dot(h.astype(bf16), fc3_w_ref[...],
                                        preferred_element_type=f32) + fc3_b_ref[...])


# --------------------------------------------------------------------------- #
# Wrapper: only glue left is the token reshape and the final slice
# --------------------------------------------------------------------------- #
def forward(params, tokens, *, num_classes=4):
    B, S = tokens.shape
    S1, S2 = S // 2, S // 4
    V = params['embedding'].shape[0]
    H = params['lstm_wih'].shape[1] // 8            # 2G = 8H

    tok2d = tokens.reshape(B * S, 1).astype(jnp.int32)

    # static 0/1 pooling / layout matrices (precomputed outside the kernel, constant-folded)
    r1 = jnp.arange(B * S1)
    src1 = (r1 // S1) * S + 2 * (r1 % S1)
    P1 = jax.nn.one_hot(src1, B * S, dtype=jnp.bfloat16)                    # (B*S1, B*S)

    r2 = jnp.arange(S2 * BP)
    b_idx, t_idx = r2 % BP, r2 // BP
    src2 = b_idx * S1 + 2 * t_idx
    P2 = (jax.nn.one_hot(src2, B * S1, dtype=jnp.bfloat16)
          * (b_idx < B).astype(jnp.bfloat16)[:, None])                      # (S2*BP, B*S1)

    out = pl.pallas_call(
        functools.partial(_fused_kernel, B, S, H, V),
        out_shape=jax.ShapeDtypeStruct((BP, 128), jnp.float32),
        in_specs=[VMEM_SPEC] * 21,
        out_specs=VMEM_SPEC,
    )(tok2d, params['embedding'],
      params['conv0_w'], params['conv0_b'], params['conv1_w'], params['conv1_b'],
      P1, P2,
      params['lstm_wih'], params['lstm_b'], params['lstm_whh'],
      params['gru_win'], params['gru_bih'], params['gru_whh'], params['gru_bhh'],
      params['fc1_w'], params['fc1_b'], params['fc2_w'], params['fc2_b'],
      params['fc3_w'], params['fc3_b'])

    return out[:B, :num_classes]


# --------------------------------------------------------------------------- #
# Deterministic parameter init (fused / padded / bf16 layouts, self-consistent)
# --------------------------------------------------------------------------- #
def init_params(key, vocab=64, embed_dim=32, conv_out=128, rnn_hidden=32,
                fc_hidden=256, num_classes=4, k=3):
    H = rnn_hidden
    G = 4 * H
    W2 = 2 * G
    keys = iter(jax.random.split(key, 48))

    def u(shape, scale):
        return jax.random.uniform(next(keys), shape, jnp.float32, -scale, scale)

    def bf(x):
        return x.astype(jnp.bfloat16)

    def put(base, r0, c0, mat):
        return base.at[r0:r0 + mat.shape[0], c0:c0 + mat.shape[1]].set(mat)

    p = {}
    p['embedding'] = bf(u((vocab, embed_dim), 1.0))

    s0 = 1.0 / (embed_dim * k) ** 0.5
    s1 = 1.0 / (conv_out * k) ** 0.5
    p['conv0_w'] = bf(u((k, embed_dim, conv_out), s0))     # taps [t-1, t, t+1], (Cin, Cout)
    p['conv0_b'] = u((1, conv_out), s0)
    p['conv1_w'] = bf(u((k, conv_out, conv_out), s1))
    p['conv1_b'] = u((1, conv_out), s1)

    sh = 1.0 / H ** 0.5
    # --- bi-LSTM: gates [i|f|g|o] per direction, fwd cols [0,G), bwd cols [G,2G) ---
    p['lstm_wih'] = bf(jnp.concatenate([u((conv_out, G), sh), u((conv_out, G), sh)], axis=1))
    p['lstm_b'] = jnp.concatenate([u((1, G), sh) + u((1, G), sh),      # b_ih + b_hh (fwd)
                                   u((1, G), sh) + u((1, G), sh)], axis=1)   # (bwd)
    whh = jnp.zeros((W2, W2), jnp.float32)
    whh = put(whh, 0, 0, u((H, G), sh))            # fwd state rows -> fwd gates
    whh = put(whh, G, G, u((H, G), sh))            # bwd state rows -> bwd gates
    p['lstm_whh'] = bf(whh)                        # block-diagonal (2G, 2G)

    # --- bi-GRU: gates [r|z|n|pad] per direction; input = full bi-LSTM output ---
    gw = jnp.zeros((W2, W2), jnp.float32)
    gw = put(gw, 0, 0, u((H, 3 * H), sh))          # lstm fwd out -> gru fwd gates
    gw = put(gw, G, 0, u((H, 3 * H), sh))          # lstm bwd out -> gru fwd gates
    gw = put(gw, 0, G, u((H, 3 * H), sh))          # lstm fwd out -> gru bwd gates
    gw = put(gw, G, G, u((H, 3 * H), sh))          # lstm bwd out -> gru bwd gates
    p['gru_win'] = bf(gw)
    bih = jnp.zeros((1, W2), jnp.float32)
    bih = put(bih, 0, 0, u((1, 3 * H), sh))
    bih = put(bih, 0, G, u((1, 3 * H), sh))
    p['gru_bih'] = bih
    gwhh = jnp.zeros((W2, W2), jnp.float32)
    gwhh = put(gwhh, 0, 0, u((H, 3 * H), sh))
    gwhh = put(gwhh, G, G, u((H, 3 * H), sh))
    p['gru_whh'] = bf(gwhh)                        # block-diagonal (2G, 2G)
    bhh = jnp.zeros((1, W2), jnp.float32)
    bhh = put(bhh, 0, 0, u((1, 3 * H), sh))
    bhh = put(bhh, 0, G, u((1, 3 * H), sh))
    p['gru_bhh'] = bhh

    # --- MLP head: fc1(2H->fc_hidden) -> ReLU -> fc2 -> ReLU -> fc3(->num_classes) ---
    sf1 = 1.0 / (2 * H) ** 0.5
    sf2 = 1.0 / fc_hidden ** 0.5
    f1 = jnp.zeros((W2, fc_hidden), jnp.float32)
    f1 = put(f1, 0, 0, u((H, fc_hidden), sf1))     # from gru fwd last state
    f1 = put(f1, G, 0, u((H, fc_hidden), sf1))     # from gru bwd state at last time
    p['fc1_w'] = bf(f1)
    p['fc1_b'] = u((1, fc_hidden), sf1)
    p['fc2_w'] = bf(u((fc_hidden, fc_hidden), sf2))
    p['fc2_b'] = u((1, fc_hidden), sf2)
    f3 = jnp.zeros((fc_hidden, 128), jnp.float32)
    f3 = put(f3, 0, 0, u((fc_hidden, num_classes), sf2))
    p['fc3_w'] = bf(f3)                            # lane-dense padded head output
    b3 = jnp.zeros((1, 128), jnp.float32)
    p['fc3_b'] = put(b3, 0, 0, u((1, num_classes), sf2))
    return p


if __name__ == "__main__":
    key = jax.random.PRNGKey(0)
    pkey, tkey = jax.random.split(key)
    params = init_params(pkey)

    B, S = 2, 16
    tokens = jax.random.randint(tkey, (B, S), 0, 64, dtype=jnp.int32)

    out = jax.jit(forward)(params, tokens)
    out = jax.block_until_ready(out)

    assert out.shape == (B, 4), out.shape
    assert bool(jnp.all(jnp.isfinite(out)))
    assert bool(jnp.all((out >= 0.0) & (out <= 1.0)))   # sigmoid range
    print("KERNEL_OK")
</pallas_src>

<mosaic_0001>
module attributes {stable_mosaic.version = 11 : i64} {
  func.func @_fused_kernel(%arg0: memref<32x1xi32, #tpu.memory_space<vmem>>, %arg1: memref<64x32xbf16, #tpu.memory_space<vmem>>, %arg2: memref<3x32x128xbf16, #tpu.memory_space<vmem>>, %arg3: memref<1x128xf32, #tpu.memory_space<vmem>>, %arg4: memref<3x128x128xbf16, #tpu.memory_space<vmem>>, %arg5: memref<1x128xf32, #tpu.memory_space<vmem>>, %arg6: memref<16x32xbf16, #tpu.memory_space<vmem>>, %arg7: memref<32x16xbf16, #tpu.memory_space<vmem>>, %arg8: memref<128x256xbf16, #tpu.memory_space<vmem>>, %arg9: memref<1x256xf32, #tpu.memory_space<vmem>>, %arg10: memref<256x256xbf16, #tpu.memory_space<vmem>>, %arg11: memref<256x256xbf16, #tpu.memory_space<vmem>>, %arg12: memref<1x256xf32, #tpu.memory_space<vmem>>, %arg13: memref<256x256xbf16, #tpu.memory_space<vmem>>, %arg14: memref<1x256xf32, #tpu.memory_space<vmem>>, %arg15: memref<256x256xbf16, #tpu.memory_space<vmem>>, %arg16: memref<1x256xf32, #tpu.memory_space<vmem>>, %arg17: memref<256x256xbf16, #tpu.memory_space<vmem>>, %arg18: memref<1x256xf32, #tpu.memory_space<vmem>>, %arg19: memref<256x128xbf16, #tpu.memory_space<vmem>>, %arg20: memref<1x128xf32, #tpu.memory_space<vmem>>, %arg21: memref<8x128xf32, #tpu.memory_space<vmem>>) attributes {dimension_semantics = [], scalar_prefetch = 0 : i64, scratch_operands = 0 : i64, tpu.core_type = #tpu.core_type<tc>} {
    %c0 = arith.constant 0 : index
    %c0_0 = arith.constant 0 : index
    %0 = vector.load %arg0[%c0, %c0_0] : memref<32x1xi32, #tpu.memory_space<vmem>>, vector<32x1xi32>
    %1 = tpu.iota {dimensions = array<i32: 1>} : vector<32x64xi32>
    %2 = vector.broadcast %0 : vector<32x1xi32> to vector<32x64xi32>
    %3 = arith.cmpi eq, %2, %1 : vector<32x64xi32>
    %cst = arith.constant 1.000000e+00 : f32
    %cst_1 = arith.constant 0.000000e+00 : f32
    %4 = vector.broadcast %cst : f32 to vector<32x64xf32>
    %5 = vector.broadcast %cst_1 : f32 to vector<32x64xf32>
    %6 = arith.select %3, %4, %5 : vector<32x64xi1>, vector<32x64xf32>
    %7 = arith.truncf %6 : vector<32x64xf32> to vector<32x64xbf16>
    %c0_2 = arith.constant 0 : index
    %c0_3 = arith.constant 0 : index
    %8 = vector.load %arg1[%c0_2, %c0_3] : memref<64x32xbf16, #tpu.memory_space<vmem>>, vector<64x32xbf16>
    %cst_4 = arith.constant dense<0.000000e+00> : vector<32x32xf32>
    %9 = tpu.matmul %7, %8, %cst_4 {dimension_numbers = #tpu.dot_dimension_numbers<[1], [0], [0], [1], [0, 0, 1, 1], [], []>} : vector<32x64xbf16>, vector<64x32xbf16>, vector<32x32xf32> -> vector<32x32xf32>
    %10 = tpu.iota {dimensions = array<i32: 0>} : vector<32x32xi32>
    %c16_i32 = arith.constant 16 : i32
    %c0_i32 = arith.constant 0 : i32
    %11 = arith.cmpi eq, %c16_i32, %c0_i32 : i32
    %c1_i32 = arith.constant 1 : i32
    %12 = arith.select %11, %c1_i32, %c16_i32 : i32
    %13 = vector.broadcast %12 : i32 to vector<32x32xi32>
    %14 = arith.remsi %10, %13 : vector<32x32xi32>
    %c0_i32_5 = arith.constant 0 : i32
    %15 = vector.broadcast %c0_i32_5 : i32 to vector<32x32xi32>
    %16 = arith.cmpi ne, %14, %15 : vector<32x32xi32>
    %c0_i32_6 = arith.constant 0 : i32
    %17 = vector.broadcast %c0_i32_6 : i32 to vector<32x32xi32>
    %18 = arith.cmpi slt, %14, %17 : vector<32x32xi32>
    %c0_i32_7 = arith.constant 0 : i32
    %19 = arith.cmpi slt, %12, %c0_i32_7 : i32
    %20 = vector.broadcast %19 : i1 to vector<32x32xi1>
    %21 = vector.broadcast %20 : vector<32x32xi1> to vector<32x32xi1>
    %22 = arith.xori %18, %21 : vector<32x32xi1>
    %23 = arith.andi %22, %16 : vector<32x32xi1>
    %24 = vector.broadcast %12 : i32 to vector<32x32xi32>
    %25 = arith.addi %14, %24 : vector<32x32xi32>
    %26 = arith.select %23, %25, %14 : vector<32x32xi1>, vector<32x32xi32>
    %c0_i32_8 = arith.constant 0 : i32
    %27 = vector.broadcast %c0_i32_8 : i32 to vector<32x32xi32>
    %28 = arith.cmpi sgt, %26, %27 : vector<32x32xi32>
    %c1_i32_9 = arith.constant 1 : i32
    %29 = tpu.dynamic_rotate %9 by %c1_i32_9 dim 0 : vector<32x32xf32>, i32 -> vector<32x32xf32>
    %cst_10 = arith.constant 0.000000e+00 : f32
    %30 = vector.broadcast %cst_10 : f32 to vector<32x32xf32>
    %31 = arith.select %28, %29, %30 : vector<32x32xi1>, vector<32x32xf32>
    %c15_i32 = arith.constant 15 : i32
    %32 = vector.broadcast %c15_i32 : i32 to vector<32x32xi32>
    %33 = arith.cmpi slt, %26, %32 : vector<32x32xi32>
    %c31_i32 = arith.constant 31 : i32
    %34 = tpu.dynamic_rotate %9 by %c31_i32 dim 0 : vector<32x32xf32>, i32 -> vector<32x32xf32>
    %cst_11 = arith.constant 0.000000e+00 : f32
    %35 = vector.broadcast %cst_11 : f32 to vector<32x32xf32>
    %36 = arith.select %33, %34, %35 : vector<32x32xi1>, vector<32x32xf32>
    %37 = arith.truncf %31 : vector<32x32xf32> to vector<32x32xbf16>
    %c0_12 = arith.constant 0 : index
    %c0_13 = arith.constant 0 : index
    %c0_14 = arith.constant 0 : index
    %38 = vector.load %arg2[%c0_12, %c0_13, %c0_14] : memref<3x32x128xbf16, #tpu.memory_space<vmem>>, vector<1x32x128xbf16>
    %39 = vector.shape_cast %38 : vector<1x32x128xbf16> to vector<32x128xbf16>
    %cst_15 = arith.constant dense<0.000000e+00> : vector<32x128xf32>
    %40 = tpu.matmul %37, %39, %cst_15 {dimension_numbers = #tpu.dot_dimension_numbers<[1], [0], [0], [1], [0, 0, 1, 1], [], []>} : vector<32x32xbf16>, vector<32x128xbf16>, vector<32x128xf32> -> vector<32x128xf32>
    %41 = arith.truncf %9 : vector<32x32xf32> to vector<32x32xbf16>
    %c1 = arith.constant 1 : index
    %c0_16 = arith.constant 0 : index
    %c0_17 = arith.constant 0 : index
    %42 = vector.load %arg2[%c1, %c0_16, %c0_17] : memref<3x32x128xbf16, #tpu.memory_space<vmem>>, vector<1x32x128xbf16>
    %43 = vector.shape_cast %42 : vector<1x32x128xbf16> to vector<32x128xbf16>
    %cst_18 = arith.constant dense<0.000000e+00> : vector<32x128xf32>
    %44 = tpu.matmul %41, %43, %cst_18 {dimension_numbers = #tpu.dot_dimension_numbers<[1], [0], [0], [1], [0, 0, 1, 1], [], []>} : vector<32x32xbf16>, vector<32x128xbf16>, vector<32x128xf32> -> vector<32x128xf32>
    %45 = arith.addf %40, %44 : vector<32x128xf32>
    %46 = arith.truncf %36 : vector<32x32xf32> to vector<32x32xbf16>
    %c2 = arith.constant 2 : index
    %c0_19 = arith.constant 0 : index
    %c0_20 = arith.constant 0 : index
    %47 = vector.load %arg2[%c2, %c0_19, %c0_20] : memref<3x32x128xbf16, #tpu.memory_space<vmem>>, vector<1x32x128xbf16>
    %48 = vector.shape_cast %47 : vector<1x32x128xbf16> to vector<32x128xbf16>
    %cst_21 = arith.constant dense<0.000000e+00> : vector<32x128xf32>
    %49 = tpu.matmul %46, %48, %cst_21 {dimension_numbers = #tpu.dot_dimension_numbers<[1], [0], [0], [1], [0, 0, 1, 1], [], []>} : vector<32x32xbf16>, vector<32x128xbf16>, vector<32x128xf32> -> vector<32x128xf32>
    %50 = arith.addf %45, %49 : vector<32x128xf32>
    %c0_22 = arith.constant 0 : index
    %c0_23 = arith.constant 0 : index
    %51 = vector.load %arg3[%c0_22, %c0_23] : memref<1x128xf32, #tpu.memory_space<vmem>>, vector<1x128xf32>
    %52 = vector.broadcast %51 : vector<1x128xf32> to vector<32x128xf32>
    %53 = arith.addf %50, %52 : vector<32x128xf32>
    %cst_24 = arith.constant 0.000000e+00 : f32
    %54 = vector.broadcast %cst_24 : f32 to vector<32x128xf32>
    %55 = arith.maximumf %53, %54 : vector<32x128xf32>
    %c31_i32_25 = arith.constant 31 : i32
    %56 = tpu.dynamic_rotate %55 by %c31_i32_25 dim 0 : vector<32x128xf32>, i32 -> vector<32x128xf32>
    %57 = arith.maximumf %55, %56 : vector<32x128xf32>
    %c0_26 = arith.constant 0 : index
    %c0_27 = arith.constant 0 : index
    %58 = vector.load %arg6[%c0_26, %c0_27] : memref<16x32xbf16, #tpu.memory_space<vmem>>, vector<16x32xbf16>
    %59 = arith.truncf %57 : vector<32x128xf32> to vector<32x128xbf16>
    %cst_28 = arith.constant dense<0.000000e+00> : vector<16x128xf32>
    %60 = tpu.matmul %58, %59, %cst_28 {dimension_numbers = #tpu.dot_dimension_numbers<[1], [0], [0], [1], [0, 0, 1, 1], [], []>} : vector<16x32xbf16>, vector<32x128xbf16>, vector<16x128xf32> -> vector<16x128xf32>
    %61 = tpu.iota {dimensions = array<i32: 0>} : vector<16x128xi32>
    %c8_i32 = arith.constant 8 : i32
    %c0_i32_29 = arith.constant 0 : i32
    %62 = arith.cmpi eq, %c8_i32, %c0_i32_29 : i32
    %c1_i32_30 = arith.constant 1 : i32
    %63 = arith.select %62, %c1_i32_30, %c8_i32 : i32
    %64 = vector.broadcast %63 : i32 to vector<16x128xi32>
    %65 = arith.remsi %61, %64 : vector<16x128xi32>
    %c0_i32_31 = arith.constant 0 : i32
    %66 = vector.broadcast %c0_i32_31 : i32 to vector<16x128xi32>
    %67 = arith.cmpi ne, %65, %66 : vector<16x128xi32>
    %c0_i32_32 = arith.constant 0 : i32
    %68 = vector.broadcast %c0_i32_32 : i32 to vector<16x128xi32>
    %69 = arith.cmpi slt, %65, %68 : vector<16x128xi32>
    %c0_i32_33 = arith.constant 0 : i32
    %70 = arith.cmpi slt, %63, %c0_i32_33 : i32
    %71 = vector.broadcast %70 : i1 to vector<16x128xi1>
    %72 = vector.broadcast %71 : vector<16x128xi1> to vector<16x128xi1>
    %73 = arith.xori %69, %72 : vector<16x128xi1>
    %74 = arith.andi %73, %67 : vector<16x128xi1>
    %75 = vector.broadcast %63 : i32 to vector<16x128xi32>
    %76 = arith.addi %65, %75 : vector<16x128xi32>
    %77 = arith.select %74, %76, %65 : vector<16x128xi1>, vector<16x128xi32>
    %c0_i32_34 = arith.constant 0 : i32
    %78 = vector.broadcast %c0_i32_34 : i32 to vector<16x128xi32>
    %79 = arith.cmpi sgt, %77, %78 : vector<16x128xi32>
    %c1_i32_35 = arith.constant 1 : i32
    %80 = tpu.dynamic_rotate %60 by %c1_i32_35 dim 0 : vector<16x128xf32>, i32 -> vector<16x128xf32>
    %cst_36 = arith.constant 0.000000e+00 : f32
    %81 = vector.broadcast %cst_36 : f32 to vector<16x128xf32>
    %82 = arith.select %79, %80, %81 : vector<16x128xi1>, vector<16x128xf32>
    %c7_i32 = arith.constant 7 : i32
    %83 = vector.broadcast %c7_i32 : i32 to vector<16x128xi32>
    %84 = arith.cmpi slt, %77, %83 : vector<16x128xi32>
    %c15_i32_37 = arith.constant 15 : i32
    %85 = tpu.dynamic_rotate %60 by %c15_i32_37 dim 0 : vector<16x128xf32>, i32 -> vector<16x128xf32>
    %cst_38 = arith.constant 0.000000e+00 : f32
    %86 = vector.broadcast %cst_38 : f32 to vector<16x128xf32>
    %87 = arith.select %84, %85, %86 : vector<16x128xi1>, vector<16x128xf32>
    %88 = arith.truncf %82 : vector<16x128xf32> to vector<16x128xbf16>
    %c0_39 = arith.constant 0 : index
    %c0_40 = arith.constant 0 : index
    %c0_41 = arith.constant 0 : index
    %89 = vector.load %arg4[%c0_39, %c0_40, %c0_41] : memref<3x128x128xbf16, #tpu.memory_space<vmem>>, vector<1x128x128xbf16>
    %90 = vector.shape_cast %89 : vector<1x128x128xbf16> to vector<128x128xbf16>
    %cst_42 = arith.constant dense<0.000000e+00> : vector<16x128xf32>
    %91 = tpu.matmul %88, %90, %cst_42 {dimension_numbers = #tpu.dot_dimension_numbers<[1], [0], [0], [1], [0, 0, 1, 1], [], []>} : vector<16x128xbf16>, vector<128x128xbf16>, vector<16x128xf32> -> vector<16x128xf32>
    %92 = arith.truncf %60 : vector<16x128xf32> to vector<16x128xbf16>
    %c1_43 = arith.constant 1 : index
    %c0_44 = arith.constant 0 : index
    %c0_45 = arith.constant 0 : index
    %93 = vector.load %arg4[%c1_43, %c0_44, %c0_45] : memref<3x128x128xbf16, #tpu.memory_space<vmem>>, vector<1x128x128xbf16>
    %94 = vector.shape_cast %93 : vector<1x128x128xbf16> to vector<128x128xbf16>
    %cst_46 = arith.constant dense<0.000000e+00> : vector<16x128xf32>
    %95 = tpu.matmul %92, %94, %cst_46 {dimension_numbers = #tpu.dot_dimension_numbers<[1], [0], [0], [1], [0, 0, 1, 1], [], []>} : vector<16x128xbf16>, vector<128x128xbf16>, vector<16x128xf32> -> vector<16x128xf32>
    %96 = arith.addf %91, %95 : vector<16x128xf32>
    %97 = arith.truncf %87 : vector<16x128xf32> to vector<16x128xbf16>
    %c2_47 = arith.constant 2 : index
    %c0_48 = arith.constant 0 : index
    %c0_49 = arith.constant 0 : index
    %98 = vector.load %arg4[%c2_47, %c0_48, %c0_49] : memref<3x128x128xbf16, #tpu.memory_space<vmem>>, vector<1x128x128xbf16>
    %99 = vector.shape_cast %98 : vector<1x128x128xbf16> to vector<128x128xbf16>
    %cst_50 = arith.constant dense<0.000000e+00> : vector<16x128xf32>
    %100 = tpu.matmul %97, %99, %cst_50 {dimension_numbers = #tpu.dot_dimension_numbers<[1], [0], [0], [1], [0, 0, 1, 1], [], []>} : vector<16x128xbf16>, vector<128x128xbf16>, vector<16x128xf32> -> vector<16x128xf32>
    %101 = arith.addf %96, %100 : vector<16x128xf32>
    %c0_51 = arith.constant 0 : index
    %c0_52 = arith.constant 0 : index
    %102 = vector.load %arg5[%c0_51, %c0_52] : memref<1x128xf32, #tpu.memory_space<vmem>>, vector<1x128xf32>
    %103 = vector.broadcast %102 : vector<1x128xf32> to vector<16x128xf32>
    %104 = arith.addf %101, %103 : vector<16x128xf32>
    %cst_53 = arith.constant 0.000000e+00 : f32
    %105 = vector.broadcast %cst_53 : f32 to vector<16x128xf32>
    %106 = arith.maximumf %104, %105 : vector<16x128xf32>
    %c15_i32_54 = arith.constant 15 : i32
    %107 = tpu.dynamic_rotate %106 by %c15_i32_54 dim 0 : vector<16x128xf32>, i32 -> vector<16x128xf32>
    %108 = arith.maximumf %106, %107 : vector<16x128xf32>
    %c0_55 = arith.constant 0 : index
    %c0_56 = arith.constant 0 : index
    %109 = vector.load %arg7[%c0_55, %c0_56] : memref<32x16xbf16, #tpu.memory_space<vmem>>, vector<32x16xbf16>
    %110 = arith.truncf %108 : vector<16x128xf32> to vector<16x128xbf16>
    %cst_57 = arith.constant dense<0.000000e+00> : vector<32x128xf32>
    %111 = tpu.matmul %109, %110, %cst_57 {dimension_numbers = #tpu.dot_dimension_numbers<[1], [0], [0], [1], [0, 0, 1, 1], [], []>} : vector<32x16xbf16>, vector<16x128xbf16>, vector<32x128xf32> -> vector<32x128xf32>
    %112 = tpu.iota {dimensions = array<i32: 1>} : vector<8x128xi32>
    %c32_i32 = arith.constant 32 : i32
    %113 = vector.broadcast %c32_i32 : i32 to vector<8x128xi32>
    %114 = arith.cmpi slt, %112, %113 : vector<8x128xi32>
    %115 = arith.truncf %111 : vector<32x128xf32> to vector<32x128xbf16>
    %c0_58 = arith.constant 0 : index
    %c0_59 = arith.constant 0 : index
    %116 = vector.load %arg8[%c0_58, %c0_59] : memref<128x256xbf16, #tpu.memory_space<vmem>>, vector<128x256xbf16>
    %cst_60 = arith.constant dense<0.000000e+00> : vector<32x256xf32>
    %117 = tpu.matmul %115, %116, %cst_60 {dimension_numbers = #tpu.dot_dimension_numbers<[1], [0], [0], [1], [0, 0, 1, 1], [], []>} : vector<32x128xbf16>, vector<128x256xbf16>, vector<32x256xf32> -> vector<32x256xf32>
    %c0_61 = arith.constant 0 : index
    %c0_62 = arith.constant 0 : index
    %118 = vector.load %arg9[%c0_61, %c0_62] : memref<1x256xf32, #tpu.memory_space<vmem>>, vector<1x256xf32>
    %119 = vector.broadcast %118 : vector<1x256xf32> to vector<32x256xf32>
    %120 = arith.addf %117, %119 : vector<32x256xf32>
    %cst_63 = arith.constant 0.000000e+00 : f32
    %121 = vector.broadcast %cst_63 : f32 to vector<8x128xf32>
    %122 = vector.extract_strided_slice %120 {offsets = [0, 0], sizes = [8, 128], strides = [1, 1]} : vector<32x256xf32> to vector<8x128xf32>
    %123 = vector.extract_strided_slice %120 {offsets = [24, 128], sizes = [8, 128], strides = [1, 1]} : vector<32x256xf32> to vector<8x128xf32>
    %124 = tpu.concatenate %122, %123 in 1 : vector<8x128xf32>, vector<8x128xf32> -> vector<8x256xf32>
    %125 = tpu.concatenate %121, %121 in 1 : vector<8x128xf32>, vector<8x128xf32> -> vector<8x256xf32>
    %126 = arith.truncf %125 : vector<8x256xf32> to vector<8x256xbf16>
    %c0_64 = arith.constant 0 : index
    %c0_65 = arith.constant 0 : index
    %127 = vector.load %arg10[%c0_64, %c0_65] : memref<256x256xbf16, #tpu.memory_space<vmem>>, vector<256x256xbf16>
    %cst_66 = arith.constant dense<0.000000e+00> : vector<8x256xf32>
    %128 = tpu.matmul %126, %127, %cst_66 {dimension_numbers = #tpu.dot_dimension_numbers<[1], [0], [0], [1], [0, 0, 1, 1], [], []>} : vector<8x256xbf16>, vector<256x256xbf16>, vector<8x256xf32> -> vector<8x256xf32>
    %129 = arith.addf %124, %128 : vector<8x256xf32>
    %130 = arith.negf %129 : vector<8x256xf32>
    %131 = math.exp %130 : vector<8x256xf32>
    %cst_67 = arith.constant 1.000000e+00 : f32
    %132 = vector.broadcast %cst_67 : f32 to vector<8x256xf32>
    %133 = arith.addf %132, %131 : vector<8x256xf32>
    %134 = arith.divf %132, %133 : vector<8x256xf32>
    %135 = math.tanh %129 : vector<8x256xf32>
    %136 = vector.extract_strided_slice %134 {offsets = [0, 0], sizes = [8, 128], strides = [1, 1]} : vector<8x256xf32> to vector<8x128xf32>
    %137 = vector.extract_strided_slice %135 {offsets = [0, 0], sizes = [8, 128], strides = [1, 1]} : vector<8x256xf32> to vector<8x128xf32>
    %c96_i32 = arith.constant 96 : i32
    %138 = tpu.dynamic_rotate %136 by %c96_i32 dim 1 : vector<8x128xf32>, i32 -> vector<8x128xf32>
    %139 = arith.mulf %138, %121 : vector<8x128xf32>
    %c64_i32 = arith.constant 64 : i32
    %140 = tpu.dynamic_rotate %137 by %c64_i32 dim 1 : vector<8x128xf32>, i32 -> vector<8x128xf32>
    %141 = arith.mulf %136, %140 : vector<8x128xf32>
    %142 = arith.addf %139, %141 : vector<8x128xf32>
    %cst_68 = arith.constant 0.000000e+00 : f32
    %143 = vector.broadcast %cst_68 : f32 to vector<8x128xf32>
    %144 = arith.select %114, %142, %143 : vector<8x128xi1>, vector<8x128xf32>
    %c32_i32_69 = arith.constant 32 : i32
    %145 = tpu.dynamic_rotate %136 by %c32_i32_69 dim 1 : vector<8x128xf32>, i32 -> vector<8x128xf32>
    %146 = math.tanh %144 : vector<8x128xf32>
    %147 = arith.mulf %145, %146 : vector<8x128xf32>
    %cst_70 = arith.constant 0.000000e+00 : f32
    %148 = vector.broadcast %cst_70 : f32 to vector<8x128xf32>
    %149 = arith.select %114, %147, %148 : vector<8x128xi1>, vector<8x128xf32>
    %150 = vector.extract_strided_slice %134 {offsets = [0, 128], sizes = [8, 128], strides = [1, 1]} : vector<8x256xf32> to vector<8x128xf32>
    %151 = vector.extract_strided_slice %135 {offsets = [0, 128], sizes = [8, 128], strides = [1, 1]} : vector<8x256xf32> to vector<8x128xf32>
    %c96_i32_71 = arith.constant 96 : i32
    %152 = tpu.dynamic_rotate %150 by %c96_i32_71 dim 1 : vector<8x128xf32>, i32 -> vector<8x128xf32>
    %153 = arith.mulf %152, %121 : vector<8x128xf32>
    %c64_i32_72 = arith.constant 64 : i32
    %154 = tpu.dynamic_rotate %151 by %c64_i32_72 dim 1 : vector<8x128xf32>, i32 -> vector<8x128xf32>
    %155 = arith.mulf %150, %154 : vector<8x128xf32>
    %156 = arith.addf %153, %155 : vector<8x128xf32>
    %cst_73 = arith.constant 0.000000e+00 : f32
    %157 = vector.broadcast %cst_73 : f32 to vector<8x128xf32>
    %158 = arith.select %114, %156, %157 : vector<8x128xi1>, vector<8x128xf32>
    %c32_i32_74 = arith.constant 32 : i32
    %159 = tpu.dynamic_rotate %150 by %c32_i32_74 dim 1 : vector<8x128xf32>, i32 -> vector<8x128xf32>
    %160 = math.tanh %158 : vector<8x128xf32>
    %161 = arith.mulf %159, %160 : vector<8x128xf32>
    %cst_75 = arith.constant 0.000000e+00 : f32
    %162 = vector.broadcast %cst_75 : f32 to vector<8x128xf32>
    %163 = arith.select %114, %161, %162 : vector<8x128xi1>, vector<8x128xf32>
    %164 = vector.extract_strided_slice %120 {offsets = [8, 0], sizes = [8, 128], strides = [1, 1]} : vector<32x256xf32> to vector<8x128xf32>
    %165 = vector.extract_strided_slice %120 {offsets = [16, 128], sizes = [8, 128], strides = [1, 1]} : vector<32x256xf32> to vector<8x128xf32>
    %166 = tpu.concatenate %164, %165 in 1 : vector<8x128xf32>, vector<8x128xf32> -> vector<8x256xf32>
    %167 = tpu.concatenate %149, %163 in 1 : vector<8x128xf32>, vector<8x128xf32> -> vector<8x256xf32>
    %168 = arith.truncf %167 : vector<8x256xf32> to vector<8x256xbf16>
    %c0_76 = arith.constant 0 : index
    %c0_77 = arith.constant 0 : index
    %169 = vector.load %arg10[%c0_76, %c0_77] : memref<256x256xbf16, #tpu.memory_space<vmem>>, vector<256x256xbf16>
    %cst_78 = arith.constant dense<0.000000e+00> : vector<8x256xf32>
    %170 = tpu.matmul %168, %169, %cst_78 {dimension_numbers = #tpu.dot_dimension_numbers<[1], [0], [0], [1], [0, 0, 1, 1], [], []>} : vector<8x256xbf16>, vector<256x256xbf16>, vector<8x256xf32> -> vector<8x256xf32>
    %171 = arith.addf %166, %170 : vector<8x256xf32>
    %172 = arith.negf %171 : vector<8x256xf32>
    %173 = math.exp %172 : vector<8x256xf32>
    %cst_79 = arith.constant 1.000000e+00 : f32
    %174 = vector.broadcast %cst_79 : f32 to vector<8x256xf32>
    %175 = arith.addf %174, %173 : vector<8x256xf32>
    %176 = arith.divf %174, %175 : vector<8x256xf32>
    %177 = math.tanh %171 : vector<8x256xf32>
    %178 = vector.extract_strided_slice %176 {offsets = [0, 0], sizes = [8, 128], strides = [1, 1]} : vector<8x256xf32> to vector<8x128xf32>
    %179 = vector.extract_strided_slice %177 {offsets = [0, 0], sizes = [8, 128], strides = [1, 1]} : vector<8x256xf32> to vector<8x128xf32>
    %c96_i32_80 = arith.constant 96 : i32
    %180 = tpu.dynamic_rotate %178 by %c96_i32_80 dim 1 : vector<8x128xf32>, i32 -> vector<8x128xf32>
    %181 = arith.mulf %180, %144 : vector<8x128xf32>
    %c64_i32_81 = arith.constant 64 : i32
    %182 = tpu.dynamic_rotate %179 by %c64_i32_81 dim 1 : vector<8x128xf32>, i32 -> vector<8x128xf32>
    %183 = arith.mulf %178, %182 : vector<8x128xf32>
    %184 = arith.addf %181, %183 : vector<8x128xf32>
    %cst_82 = arith.constant 0.000000e+00 : f32
    %185 = vector.broadcast %cst_82 : f32 to vector<8x128xf32>
    %186 = arith.select %114, %184, %185 : vector<8x128xi1>, vector<8x128xf32>
    %c32_i32_83 = arith.constant 32 : i32
    %187 = tpu.dynamic_rotate %178 by %c32_i32_83 dim 1 : vector<8x128xf32>, i32 -> vector<8x128xf32>
    %188 = math.tanh %186 : vector<8x128xf32>
    %189 = arith.mulf %187, %188 : vector<8x128xf32>
    %cst_84 = arith.constant 0.000000e+00 : f32
    %190 = vector.broadcast %cst_84 : f32 to vector<8x128xf32>
    %191 = arith.select %114, %189, %190 : vector<8x128xi1>, vector<8x128xf32>
    %192 = vector.extract_strided_slice %176 {offsets = [0, 128], sizes = [8, 128], strides = [1, 1]} : vector<8x256xf32> to vector<8x128xf32>
    %193 = vector.extract_strided_slice %177 {offsets = [0, 128], sizes = [8, 128], strides = [1, 1]} : vector<8x256xf32> to vector<8x128xf32>
    %c96_i32_85 = arith.constant 96 : i32
    %194 = tpu.dynamic_rotate %192 by %c96_i32_85 dim 1 : vector<8x128xf32>, i32 -> vector<8x128xf32>
    %195 = arith.mulf %194, %158 : vector<8x128xf32>
    %c64_i32_86 = arith.constant 64 : i32
    %196 = tpu.dynamic_rotate %193 by %c64_i32_86 dim 1 : vector<8x128xf32>, i32 -> vector<8x128xf32>
    %197 = arith.mulf %192, %196 : vector<8x128xf32>
    %198 = arith.addf %195, %197 : vector<8x128xf32>
    %cst_87 = arith.constant 0.000000e+00 : f32
    %199 = vector.broadcast %cst_87 : f32 to vector<8x128xf32>
    %200 = arith.select %114, %198, %199 : vector<8x128xi1>, vector<8x128xf32>
    %c32_i32_88 = arith.constant 32 : i32
    %201 = tpu.dynamic_rotate %192 by %c32_i32_88 dim 1 : vector<8x128xf32>, i32 -> vector<8x128xf32>
    %202 = math.tanh %200 : vector<8x128xf32>
    %203 = arith.mulf %201, %202 : vector<8x128xf32>
    %cst_89 = arith.constant 0.000000e+00 : f32
    %204 = vector.broadcast %cst_89 : f32 to vector<8x128xf32>
    %205 = arith.select %114, %203, %204 : vector<8x128xi1>, vector<8x128xf32>
    %206 = vector.extract_strided_slice %120 {offsets = [16, 0], sizes = [8, 128], strides = [1, 1]} : vector<32x256xf32> to vector<8x128xf32>
    %207 = vector.extract_strided_slice %120 {offsets = [8, 128], sizes = [8, 128], strides = [1, 1]} : vector<32x256xf32> to vector<8x128xf32>
    %208 = tpu.concatenate %206, %207 in 1 : vector<8x128xf32>, vector<8x128xf32> -> vector<8x256xf32>
    %209 = tpu.concatenate %191, %205 in 1 : vector<8x128xf32>, vector<8x128xf32> -> vector<8x256xf32>
    %210 = arith.truncf %209 : vector<8x256xf32> to vector<8x256xbf16>
    %c0_90 = arith.constant 0 : index
    %c0_91 = arith.constant 0 : index
    %211 = vector.load %arg10[%c0_90, %c0_91] : memref<256x256xbf16, #tpu.memory_space<vmem>>, vector<256x256xbf16>
    %cst_92 = arith.constant dense<0.000000e+00> : vector<8x256xf32>
    %212 = tpu.matmul %210, %211, %cst_92 {dimension_numbers = #tpu.dot_dimension_numbers<[1], [0], [0], [1], [0, 0, 1, 1], [], []>} : vector<8x256xbf16>, vector<256x256xbf16>, vector<8x256xf32> -> vector<8x256xf32>
    %213 = arith.addf %208, %212 : vector<8x256xf32>
    %214 = arith.negf %213 : vector<8x256xf32>
    %215 = math.exp %214 : vector<8x256xf32>
    %cst_93 = arith.constant 1.000000e+00 : f32
    %216 = vector.broadcast %cst_93 : f32 to vector<8x256xf32>
    %217 = arith.addf %216, %215 : vector<8x256xf32>
    %218 = arith.divf %216, %217 : vector<8x256xf32>
    %219 = math.tanh %213 : vector<8x256xf32>
    %220 = vector.extract_strided_slice %218 {offsets = [0, 0], sizes = [8, 128], strides = [1, 1]} : vector<8x256xf32> to vector<8x128xf32>
    %221 = vector.extract_strided_slice %219 {offsets = [0, 0], sizes = [8, 128], strides = [1, 1]} : vector<8x256xf32> to vector<8x128xf32>
    %c96_i32_94 = arith.constant 96 : i32
    %222 = tpu.dynamic_rotate %220 by %c96_i32_94 dim 1 : vector<8x128xf32>, i32 -> vector<8x128xf32>
    %223 = arith.mulf %222, %186 : vector<8x128xf32>
    %c64_i32_95 = arith.constant 64 : i32
    %224 = tpu.dynamic_rotate %221 by %c64_i32_95 dim 1 : vector<8x128xf32>, i32 -> vector<8x128xf32>
    %225 = arith.mulf %220, %224 : vector<8x128xf32>
    %226 = arith.addf %223, %225 : vector<8x128xf32>
    %cst_96 = arith.constant 0.000000e+00 : f32
    %227 = vector.broadcast %cst_96 : f32 to vector<8x128xf32>
    %228 = arith.select %114, %226, %227 : vector<8x128xi1>, vector<8x128xf32>
    %c32_i32_97 = arith.constant 32 : i32
    %229 = tpu.dynamic_rotate %220 by %c32_i32_97 dim 1 : vector<8x128xf32>, i32 -> vector<8x128xf32>
    %230 = math.tanh %228 : vector<8x128xf32>
    %231 = arith.mulf %229, %230 : vector<8x128xf32>
    %cst_98 = arith.constant 0.000000e+00 : f32
    %232 = vector.broadcast %cst_98 : f32 to vector<8x128xf32>
    %233 = arith.select %114, %231, %232 : vector<8x128xi1>, vector<8x128xf32>
    %234 = vector.extract_strided_slice %218 {offsets = [0, 128], sizes = [8, 128], strides = [1, 1]} : vector<8x256xf32> to vector<8x128xf32>
    %235 = vector.extract_strided_slice %219 {offsets = [0, 128], sizes = [8, 128], strides = [1, 1]} : vector<8x256xf32> to vector<8x128xf32>
    %c96_i32_99 = arith.constant 96 : i32
    %236 = tpu.dynamic_rotate %234 by %c96_i32_99 dim 1 : vector<8x128xf32>, i32 -> vector<8x128xf32>
    %237 = arith.mulf %236, %200 : vector<8x128xf32>
    %c64_i32_100 = arith.constant 64 : i32
    %238 = tpu.dynamic_rotate %235 by %c64_i32_100 dim 1 : vector<8x128xf32>, i32 -> vector<8x128xf32>
    %239 = arith.mulf %234, %238 : vector<8x128xf32>
    %240 = arith.addf %237, %239 : vector<8x128xf32>
    %cst_101 = arith.constant 0.000000e+00 : f32
    %241 = vector.broadcast %cst_101 : f32 to vector<8x128xf32>
    %242 = arith.select %114, %240, %241 : vector<8x128xi1>, vector<8x128xf32>
    %c32_i32_102 = arith.constant 32 : i32
    %243 = tpu.dynamic_rotate %234 by %c32_i32_102 dim 1 : vector<8x128xf32>, i32 -> vector<8x128xf32>
    %244 = math.tanh %242 : vector<8x128xf32>
    %245 = arith.mulf %243, %244 : vector<8x128xf32>
    %cst_103 = arith.constant 0.000000e+00 : f32
    %246 = vector.broadcast %cst_103 : f32 to vector<8x128xf32>
    %247 = arith.select %114, %245, %246 : vector<8x128xi1>, vector<8x128xf32>
    %248 = vector.extract_strided_slice %120 {offsets = [24, 0], sizes = [8, 128], strides = [1, 1]} : vector<32x256xf32> to vector<8x128xf32>
    %249 = vector.extract_strided_slice %120 {offsets = [0, 128], sizes = [8, 128], strides = [1, 1]} : vector<32x256xf32> to vector<8x128xf32>
    %250 = tpu.concatenate %248, %249 in 1 : vector<8x128xf32>, vector<8x128xf32> -> vector<8x256xf32>
    %251 = tpu.concatenate %233, %247 in 1 : vector<8x128xf32>, vector<8x128xf32> -> vector<8x256xf32>
    %252 = arith.truncf %251 : vector<8x256xf32> to vector<8x256xbf16>
    %c0_104 = arith.constant 0 : index
    %c0_105 = arith.constant 0 : index
    %253 = vector.load %arg10[%c0_104, %c0_105] : memref<256x256xbf16, #tpu.memory_space<vmem>>, vector<256x256xbf16>
    %cst_106 = arith.constant dense<0.000000e+00> : vector<8x256xf32>
    %254 = tpu.matmul %252, %253, %cst_106 {dimension_numbers = #tpu.dot_dimension_numbers<[1], [0], [0], [1], [0, 0, 1, 1], [], []>} : vector<8x256xbf16>, vector<256x256xbf16>, vector<8x256xf32> -> vector<8x256xf32>
    %255 = arith.addf %250, %254 : vector<8x256xf32>
    %256 = arith.negf %255 : vector<8x256xf32>
    %257 = math.exp %256 : vector<8x256xf32>
    %cst_107 = arith.constant 1.000000e+00 : f32
    %258 = vector.broadcast %cst_107 : f32 to vector<8x256xf32>
    %259 = arith.addf %258, %257 : vector<8x256xf32>
    %260 = arith.divf %258, %259 : vector<8x256xf32>
    %261 = math.tanh %255 : vector<8x256xf32>
    %262 = vector.extract_strided_slice %260 {offsets = [0, 0], sizes = [8, 128], strides = [1, 1]} : vector<8x256xf32> to vector<8x128xf32>
    %263 = vector.extract_strided_slice %261 {offsets = [0, 0], sizes = [8, 128], strides = [1, 1]} : vector<8x256xf32> to vector<8x128xf32>
    %c96_i32_108 = arith.constant 96 : i32
    %264 = tpu.dynamic_rotate %262 by %c96_i32_108 dim 1 : vector<8x128xf32>, i32 -> vector<8x128xf32>
    %265 = arith.mulf %264, %228 : vector<8x128xf32>
    %c64_i32_109 = arith.constant 64 : i32
    %266 = tpu.dynamic_rotate %263 by %c64_i32_109 dim 1 : vector<8x128xf32>, i32 -> vector<8x128xf32>
    %267 = arith.mulf %262, %266 : vector<8x128xf32>
    %268 = arith.addf %265, %267 : vector<8x128xf32>
    %cst_110 = arith.constant 0.000000e+00 : f32
    %269 = vector.broadcast %cst_110 : f32 to vector<8x128xf32>
    %270 = arith.select %114, %268, %269 : vector<8x128xi1>, vector<8x128xf32>
    %c32_i32_111 = arith.constant 32 : i32
    %271 = tpu.dynamic_rotate %262 by %c32_i32_111 dim 1 : vector<8x128xf32>, i32 -> vector<8x128xf32>
    %272 = math.tanh %270 : vector<8x128xf32>
    %273 = arith.mulf %271, %272 : vector<8x128xf32>
    %cst_112 = arith.constant 0.000000e+00 : f32
    %274 = vector.broadcast %cst_112 : f32 to vector<8x128xf32>
    %275 = arith.select %114, %273, %274 : vector<8x128xi1>, vector<8x128xf32>
    %276 = vector.extract_strided_slice %260 {offsets = [0, 128], sizes = [8, 128], strides = [1, 1]} : vector<8x256xf32> to vector<8x128xf32>
    %277 = vector.extract_strided_slice %261 {offsets = [0, 128], sizes = [8, 128], strides = [1, 1]} : vector<8x256xf32> to vector<8x128xf32>
    %c96_i32_113 = arith.constant 96 : i32
    %278 = tpu.dynamic_rotate %276 by %c96_i32_113 dim 1 : vector<8x128xf32>, i32 -> vector<8x128xf32>
    %279 = arith.mulf %278, %242 : vector<8x128xf32>
    %c64_i32_114 = arith.constant 64 : i32
    %280 = tpu.dynamic_rotate %277 by %c64_i32_114 dim 1 : vector<8x128xf32>, i32 -> vector<8x128xf32>
    %281 = arith.mulf %276, %280 : vector<8x128xf32>
    %282 = arith.addf %279, %281 : vector<8x128xf32>
    %cst_115 = arith.constant 0.000000e+00 : f32
    %283 = vector.broadcast %cst_115 : f32 to vector<8x128xf32>
    %284 = arith.select %114, %282, %283 : vector<8x128xi1>, vector<8x128xf32>
    %c32_i32_116 = arith.constant 32 : i32
    %285 = tpu.dynamic_rotate %276 by %c32_i32_116 dim 1 : vector<8x128xf32>, i32 -> vector<8x128xf32>
    %286 = math.tanh %284 : vector<8x128xf32>
    %287 = arith.mulf %285, %286 : vector<8x128xf32>
    %cst_117 = arith.constant 0.000000e+00 : f32
    %288 = vector.broadcast %cst_117 : f32 to vector<8x128xf32>
    %289 = arith.select %114, %287, %288 : vector<8x128xi1>, vector<8x128xf32>
    %290 = tpu.concatenate %149, %289 in 1 : vector<8x128xf32>, vector<8x128xf32> -> vector<8x256xf32>
    %291 = arith.truncf %290 : vector<8x256xf32> to vector<8x256xbf16>
    %c0_118 = arith.constant 0 : index
    %c0_119 = arith.constant 0 : index
    %292 = vector.load %arg11[%c0_118, %c0_119] : memref<256x256xbf16, #tpu.memory_space<vmem>>, vector<256x256xbf16>
    %cst_120 = arith.constant dense<0.000000e+00> : vector<8x256xf32>
    %293 = tpu.matmul %291, %292, %cst_120 {dimension_numbers = #tpu.dot_dimension_numbers<[1], [0], [0], [1], [0, 0, 1, 1], [], []>} : vector<8x256xbf16>, vector<256x256xbf16>, vector<8x256xf32> -> vector<8x256xf32>
    %c0_121 = arith.constant 0 : index
    %c0_122 = arith.constant 0 : index
    %294 = vector.load %arg12[%c0_121, %c0_122] : memref<1x256xf32, #tpu.memory_space<vmem>>, vector<1x256xf32>
    %295 = vector.broadcast %294 : vector<1x256xf32> to vector<8x256xf32>
    %296 = arith.addf %293, %295 : vector<8x256xf32>
    %297 = tpu.concatenate %191, %247 in 1 : vector<8x128xf32>, vector<8x128xf32> -> vector<8x256xf32>
    %298 = arith.truncf %297 : vector<8x256xf32> to vector<8x256xbf16>
    %c0_123 = arith.constant 0 : index
    %c0_124 = arith.constant 0 : index
    %299 = vector.load %arg11[%c0_123, %c0_124] : memref<256x256xbf16, #tpu.memory_space<vmem>>, vector<256x256xbf16>
    %cst_125 = arith.constant dense<0.000000e+00> : vector<8x256xf32>
    %300 = tpu.matmul %298, %299, %cst_125 {dimension_numbers = #tpu.dot_dimension_numbers<[1], [0], [0], [1], [0, 0, 1, 1], [], []>} : vector<8x256xbf16>, vector<256x256xbf16>, vector<8x256xf32> -> vector<8x256xf32>
    %c0_126 = arith.constant 0 : index
    %c0_127 = arith.constant 0 : index
    %301 = vector.load %arg12[%c0_126, %c0_127] : memref<1x256xf32, #tpu.memory_space<vmem>>, vector<1x256xf32>
    %302 = vector.broadcast %301 : vector<1x256xf32> to vector<8x256xf32>
    %303 = arith.addf %300, %302 : vector<8x256xf32>
    %304 = tpu.concatenate %233, %205 in 1 : vector<8x128xf32>, vector<8x128xf32> -> vector<8x256xf32>
    %305 = arith.truncf %304 : vector<8x256xf32> to vector<8x256xbf16>
    %c0_128 = arith.constant 0 : index
    %c0_129 = arith.constant 0 : index
    %306 = vector.load %arg11[%c0_128, %c0_129] : memref<256x256xbf16, #tpu.memory_space<vmem>>, vector<256x256xbf16>
    %cst_130 = arith.constant dense<0.000000e+00> : vector<8x256xf32>
    %307 = tpu.matmul %305, %306, %cst_130 {dimension_numbers = #tpu.dot_dimension_numbers<[1], [0], [0], [1], [0, 0, 1, 1], [], []>} : vector<8x256xbf16>, vector<256x256xbf16>, vector<8x256xf32> -> vector<8x256xf32>
    %c0_131 = arith.constant 0 : index
    %c0_132 = arith.constant 0 : index
    %308 = vector.load %arg12[%c0_131, %c0_132] : memref<1x256xf32, #tpu.memory_space<vmem>>, vector<1x256xf32>
    %309 = vector.broadcast %308 : vector<1x256xf32> to vector<8x256xf32>
    %310 = arith.addf %307, %309 : vector<8x256xf32>
    %311 = tpu.concatenate %275, %163 in 1 : vector<8x128xf32>, vector<8x128xf32> -> vector<8x256xf32>
    %312 = arith.truncf %311 : vector<8x256xf32> to vector<8x256xbf16>
    %c0_133 = arith.constant 0 : index
    %c0_134 = arith.constant 0 : index
    %313 = vector.load %arg11[%c0_133, %c0_134] : memref<256x256xbf16, #tpu.memory_space<vmem>>, vector<256x256xbf16>
    %cst_135 = arith.constant dense<0.000000e+00> : vector<8x256xf32>
    %314 = tpu.matmul %312, %313, %cst_135 {dimension_numbers = #tpu.dot_dimension_numbers<[1], [0], [0], [1], [0, 0, 1, 1], [], []>} : vector<8x256xbf16>, vector<256x256xbf16>, vector<8x256xf32> -> vector<8x256xf32>
    %c0_136 = arith.constant 0 : index
    %c0_137 = arith.constant 0 : index
    %315 = vector.load %arg12[%c0_136, %c0_137] : memref<1x256xf32, #tpu.memory_space<vmem>>, vector<1x256xf32>
    %316 = vector.broadcast %315 : vector<1x256xf32> to vector<8x256xf32>
    %317 = arith.addf %314, %316 : vector<8x256xf32>
    %318 = tpu.concatenate %121, %121 in 1 : vector<8x128xf32>, vector<8x128xf32> -> vector<8x256xf32>
    %319 = arith.truncf %318 : vector<8x256xf32> to vector<8x256xbf16>
    %c0_138 = arith.constant 0 : index
    %c0_139 = arith.constant 0 : index
    %320 = vector.load %arg13[%c0_138, %c0_139] : memref<256x256xbf16, #tpu.memory_space<vmem>>, vector<256x256xbf16>
    %cst_140 = arith.constant dense<0.000000e+00> : vector<8x256xf32>
    %321 = tpu.matmul %319, %320, %cst_140 {dimension_numbers = #tpu.dot_dimension_numbers<[1], [0], [0], [1], [0, 0, 1, 1], [], []>} : vector<8x256xbf16>, vector<256x256xbf16>, vector<8x256xf32> -> vector<8x256xf32>
    %c0_141 = arith.constant 0 : index
    %c0_142 = arith.constant 0 : index
    %322 = vector.load %arg14[%c0_141, %c0_142] : memref<1x256xf32, #tpu.memory_space<vmem>>, vector<1x256xf32>
    %323 = vector.broadcast %322 : vector<1x256xf32> to vector<8x256xf32>
    %324 = arith.addf %321, %323 : vector<8x256xf32>
    %325 = vector.extract_strided_slice %296 {offsets = [0, 0], sizes = [8, 128], strides = [1, 1]} : vector<8x256xf32> to vector<8x128xf32>
    %326 = vector.extract_strided_slice %324 {offsets = [0, 0], sizes = [8, 128], strides = [1, 1]} : vector<8x256xf32> to vector<8x128xf32>
    %327 = arith.addf %325, %326 : vector<8x128xf32>
    %328 = arith.negf %327 : vector<8x128xf32>
    %329 = math.exp %328 : vector<8x128xf32>
    %cst_143 = arith.constant 1.000000e+00 : f32
    %330 = vector.broadcast %cst_143 : f32 to vector<8x128xf32>
    %331 = arith.addf %330, %329 : vector<8x128xf32>
    %332 = arith.divf %330, %331 : vector<8x128xf32>
    %c96_i32_144 = arith.constant 96 : i32
    %333 = tpu.dynamic_rotate %332 by %c96_i32_144 dim 1 : vector<8x128xf32>, i32 -> vector<8x128xf32>
    %c64_i32_145 = arith.constant 64 : i32
    %334 = tpu.dynamic_rotate %325 by %c64_i32_145 dim 1 : vector<8x128xf32>, i32 -> vector<8x128xf32>
    %c64_i32_146 = arith.constant 64 : i32
    %335 = tpu.dynamic_rotate %326 by %c64_i32_146 dim 1 : vector<8x128xf32>, i32 -> vector<8x128xf32>
    %336 = arith.mulf %332, %335 : vector<8x128xf32>
    %337 = arith.addf %334, %336 : vector<8x128xf32>
    %338 = math.tanh %337 : vector<8x128xf32>
    %cst_147 = arith.constant 1.000000e+00 : f32
    %339 = vector.broadcast %cst_147 : f32 to vector<8x128xf32>
    %340 = arith.subf %339, %333 : vector<8x128xf32>
    %341 = arith.mulf %340, %338 : vector<8x128xf32>
    %342 = arith.mulf %333, %121 : vector<8x128xf32>
    %343 = arith.addf %341, %342 : vector<8x128xf32>
    %cst_148 = arith.constant 0.000000e+00 : f32
    %344 = vector.broadcast %cst_148 : f32 to vector<8x128xf32>
    %345 = arith.select %114, %343, %344 : vector<8x128xi1>, vector<8x128xf32>
    %346 = vector.extract_strided_slice %317 {offsets = [0, 128], sizes = [8, 128], strides = [1, 1]} : vector<8x256xf32> to vector<8x128xf32>
    %347 = vector.extract_strided_slice %324 {offsets = [0, 128], sizes = [8, 128], strides = [1, 1]} : vector<8x256xf32> to vector<8x128xf32>
    %348 = arith.addf %346, %347 : vector<8x128xf32>
    %349 = arith.negf %348 : vector<8x128xf32>
    %350 = math.exp %349 : vector<8x128xf32>
    %cst_149 = arith.constant 1.000000e+00 : f32
    %351 = vector.broadcast %cst_149 : f32 to vector<8x128xf32>
    %352 = arith.addf %351, %350 : vector<8x128xf32>
    %353 = arith.divf %351, %352 : vector<8x128xf32>
    %c96_i32_150 = arith.constant 96 : i32
    %354 = tpu.dynamic_rotate %353 by %c96_i32_150 dim 1 : vector<8x128xf32>, i32 -> vector<8x128xf32>
    %c64_i32_151 = arith.constant 64 : i32
    %355 = tpu.dynamic_rotate %346 by %c64_i32_151 dim 1 : vector<8x128xf32>, i32 -> vector<8x128xf32>
    %c64_i32_152 = arith.constant 64 : i32
    %356 = tpu.dynamic_rotate %347 by %c64_i32_152 dim 1 : vector<8x128xf32>, i32 -> vector<8x128xf32>
    %357 = arith.mulf %353, %356 : vector<8x128xf32>
    %358 = arith.addf %355, %357 : vector<8x128xf32>
    %359 = math.tanh %358 : vector<8x128xf32>
    %cst_153 = arith.constant 1.000000e+00 : f32
    %360 = vector.broadcast %cst_153 : f32 to vector<8x128xf32>
    %361 = arith.subf %360, %354 : vector<8x128xf32>
    %362 = arith.mulf %361, %359 : vector<8x128xf32>
    %363 = arith.mulf %354, %121 : vector<8x128xf32>
    %364 = arith.addf %362, %363 : vector<8x128xf32>
    %cst_154 = arith.constant 0.000000e+00 : f32
    %365 = vector.broadcast %cst_154 : f32 to vector<8x128xf32>
    %366 = arith.select %114, %364, %365 : vector<8x128xi1>, vector<8x128xf32>
    %367 = tpu.concatenate %345, %366 in 1 : vector<8x128xf32>, vector<8x128xf32> -> vector<8x256xf32>
    %368 = arith.truncf %367 : vector<8x256xf32> to vector<8x256xbf16>
    %c0_155 = arith.constant 0 : index
    %c0_156 = arith.constant 0 : index
    %369 = vector.load %arg13[%c0_155, %c0_156] : memref<256x256xbf16, #tpu.memory_space<vmem>>, vector<256x256xbf16>
    %cst_157 = arith.constant dense<0.000000e+00> : vector<8x256xf32>
    %370 = tpu.matmul %368, %369, %cst_157 {dimension_numbers = #tpu.dot_dimension_numbers<[1], [0], [0], [1], [0, 0, 1, 1], [], []>} : vector<8x256xbf16>, vector<256x256xbf16>, vector<8x256xf32> -> vector<8x256xf32>
    %c0_158 = arith.constant 0 : index
    %c0_159 = arith.constant 0 : index
    %371 = vector.load %arg14[%c0_158, %c0_159] : memref<1x256xf32, #tpu.memory_space<vmem>>, vector<1x256xf32>
    %372 = vector.broadcast %371 : vector<1x256xf32> to vector<8x256xf32>
    %373 = arith.addf %370, %372 : vector<8x256xf32>
    %374 = vector.extract_strided_slice %303 {offsets = [0, 0], sizes = [8, 128], strides = [1, 1]} : vector<8x256xf32> to vector<8x128xf32>
    %375 = vector.extract_strided_slice %373 {offsets = [0, 0], sizes = [8, 128], strides = [1, 1]} : vector<8x256xf32> to vector<8x128xf32>
    %376 = arith.addf %374, %375 : vector<8x128xf32>
    %377 = arith.negf %376 : vector<8x128xf32>
    %378 = math.exp %377 : vector<8x128xf32>
    %cst_160 = arith.constant 1.000000e+00 : f32
    %379 = vector.broadcast %cst_160 : f32 to vector<8x128xf32>
    %380 = arith.addf %379, %378 : vector<8x128xf32>
    %381 = arith.divf %379, %380 : vector<8x128xf32>
    %c96_i32_161 = arith.constant 96 : i32
    %382 = tpu.dynamic_rotate %381 by %c96_i32_161 dim 1 : vector<8x128xf32>, i32 -> vector<8x128xf32>
    %c64_i32_162 = arith.constant 64 : i32
    %383 = tpu.dynamic_rotate %374 by %c64_i32_162 dim 1 : vector<8x128xf32>, i32 -> vector<8x128xf32>
    %c64_i32_163 = arith.constant 64 : i32
    %384 = tpu.dynamic_rotate %375 by %c64_i32_163 dim 1 : vector<8x128xf32>, i32 -> vector<8x128xf32>
    %385 = arith.mulf %381, %384 : vector<8x128xf32>
    %386 = arith.addf %383, %385 : vector<8x128xf32>
    %387 = math.tanh %386 : vector<8x128xf32>
    %cst_164 = arith.constant 1.000000e+00 : f32
    %388 = vector.broadcast %cst_164 : f32 to vector<8x128xf32>
    %389 = arith.subf %388, %382 : vector<8x128xf32>
    %390 = arith.mulf %389, %387 : vector<8x128xf32>
    %391 = arith.mulf %382, %345 : vector<8x128xf32>
    %392 = arith.addf %390, %391 : vector<8x128xf32>
    %cst_165 = arith.constant 0.000000e+00 : f32
    %393 = vector.broadcast %cst_165 : f32 to vector<8x128xf32>
    %394 = arith.select %114, %392, %393 : vector<8x128xi1>, vector<8x128xf32>
    %395 = vector.extract_strided_slice %310 {offsets = [0, 128], sizes = [8, 128], strides = [1, 1]} : vector<8x256xf32> to vector<8x128xf32>
    %396 = vector.extract_strided_slice %373 {offsets = [0, 128], sizes = [8, 128], strides = [1, 1]} : vector<8x256xf32> to vector<8x128xf32>
    %397 = arith.addf %395, %396 : vector<8x128xf32>
    %398 = arith.negf %397 : vector<8x128xf32>
    %399 = math.exp %398 : vector<8x128xf32>
    %cst_166 = arith.constant 1.000000e+00 : f32
    %400 = vector.broadcast %cst_166 : f32 to vector<8x128xf32>
    %401 = arith.addf %400, %399 : vector<8x128xf32>
    %402 = arith.divf %400, %401 : vector<8x128xf32>
    %c96_i32_167 = arith.constant 96 : i32
    %403 = tpu.dynamic_rotate %402 by %c96_i32_167 dim 1 : vector<8x128xf32>, i32 -> vector<8x128xf32>
    %c64_i32_168 = arith.constant 64 : i32
    %404 = tpu.dynamic_rotate %395 by %c64_i32_168 dim 1 : vector<8x128xf32>, i32 -> vector<8x128xf32>
    %c64_i32_169 = arith.constant 64 : i32
    %405 = tpu.dynamic_rotate %396 by %c64_i32_169 dim 1 : vector<8x128xf32>, i32 -> vector<8x128xf32>
    %406 = arith.mulf %402, %405 : vector<8x128xf32>
    %407 = arith.addf %404, %406 : vector<8x128xf32>
    %408 = math.tanh %407 : vector<8x128xf32>
    %cst_170 = arith.constant 1.000000e+00 : f32
    %409 = vector.broadcast %cst_170 : f32 to vector<8x128xf32>
    %410 = arith.subf %409, %403 : vector<8x128xf32>
    %411 = arith.mulf %410, %408 : vector<8x128xf32>
    %412 = arith.mulf %403, %366 : vector<8x128xf32>
    %413 = arith.addf %411, %412 : vector<8x128xf32>
    %cst_171 = arith.constant 0.000000e+00 : f32
    %414 = vector.broadcast %cst_171 : f32 to vector<8x128xf32>
    %415 = arith.select %114, %413, %414 : vector<8x128xi1>, vector<8x128xf32>
    %416 = tpu.concatenate %394, %415 in 1 : vector<8x128xf32>, vector<8x128xf32> -> vector<8x256xf32>
    %417 = arith.truncf %416 : vector<8x256xf32> to vector<8x256xbf16>
    %c0_172 = arith.constant 0 : index
    %c0_173 = arith.constant 0 : index
    %418 = vector.load %arg13[%c0_172, %c0_173] : memref<256x256xbf16, #tpu.memory_space<vmem>>, vector<256x256xbf16>
    %cst_174 = arith.constant dense<0.000000e+00> : vector<8x256xf32>
    %419 = tpu.matmul %417, %418, %cst_174 {dimension_numbers = #tpu.dot_dimension_numbers<[1], [0], [0], [1], [0, 0, 1, 1], [], []>} : vector<8x256xbf16>, vector<256x256xbf16>, vector<8x256xf32> -> vector<8x256xf32>
    %c0_175 = arith.constant 0 : index
    %c0_176 = arith.constant 0 : index
    %420 = vector.load %arg14[%c0_175, %c0_176] : memref<1x256xf32, #tpu.memory_space<vmem>>, vector<1x256xf32>
    %421 = vector.broadcast %420 : vector<1x256xf32> to vector<8x256xf32>
    %422 = arith.addf %419, %421 : vector<8x256xf32>
    %423 = vector.extract_strided_slice %310 {offsets = [0, 0], sizes = [8, 128], strides = [1, 1]} : vector<8x256xf32> to vector<8x128xf32>
    %424 = vector.extract_strided_slice %422 {offsets = [0, 0], sizes = [8, 128], strides = [1, 1]} : vector<8x256xf32> to vector<8x128xf32>
    %425 = arith.addf %423, %424 : vector<8x128xf32>
    %426 = arith.negf %425 : vector<8x128xf32>
    %427 = math.exp %426 : vector<8x128xf32>
    %cst_177 = arith.constant 1.000000e+00 : f32
    %428 = vector.broadcast %cst_177 : f32 to vector<8x128xf32>
    %429 = arith.addf %428, %427 : vector<8x128xf32>
    %430 = arith.divf %428, %429 : vector<8x128xf32>
    %c96_i32_178 = arith.constant 96 : i32
    %431 = tpu.dynamic_rotate %430 by %c96_i32_178 dim 1 : vector<8x128xf32>, i32 -> vector<8x128xf32>
    %c64_i32_179 = arith.constant 64 : i32
    %432 = tpu.dynamic_rotate %423 by %c64_i32_179 dim 1 : vector<8x128xf32>, i32 -> vector<8x128xf32>
    %c64_i32_180 = arith.constant 64 : i32
    %433 = tpu.dynamic_rotate %424 by %c64_i32_180 dim 1 : vector<8x128xf32>, i32 -> vector<8x128xf32>
    %434 = arith.mulf %430, %433 : vector<8x128xf32>
    %435 = arith.addf %432, %434 : vector<8x128xf32>
    %436 = math.tanh %435 : vector<8x128xf32>
    %cst_181 = arith.constant 1.000000e+00 : f32
    %437 = vector.broadcast %cst_181 : f32 to vector<8x128xf32>
    %438 = arith.subf %437, %431 : vector<8x128xf32>
    %439 = arith.mulf %438, %436 : vector<8x128xf32>
    %440 = arith.mulf %431, %394 : vector<8x128xf32>
    %441 = arith.addf %439, %440 : vector<8x128xf32>
    %cst_182 = arith.constant 0.000000e+00 : f32
    %442 = vector.broadcast %cst_182 : f32 to vector<8x128xf32>
    %443 = arith.select %114, %441, %442 : vector<8x128xi1>, vector<8x128xf32>
    %444 = vector.extract_strided_slice %303 {offsets = [0, 128], sizes = [8, 128], strides = [1, 1]} : vector<8x256xf32> to vector<8x128xf32>
    %445 = vector.extract_strided_slice %422 {offsets = [0, 128], sizes = [8, 128], strides = [1, 1]} : vector<8x256xf32> to vector<8x128xf32>
    %446 = arith.addf %444, %445 : vector<8x128xf32>
    %447 = arith.negf %446 : vector<8x128xf32>
    %448 = math.exp %447 : vector<8x128xf32>
    %cst_183 = arith.constant 1.000000e+00 : f32
    %449 = vector.broadcast %cst_183 : f32 to vector<8x128xf32>
    %450 = arith.addf %449, %448 : vector<8x128xf32>
    %451 = arith.divf %449, %450 : vector<8x128xf32>
    %c96_i32_184 = arith.constant 96 : i32
    %452 = tpu.dynamic_rotate %451 by %c96_i32_184 dim 1 : vector<8x128xf32>, i32 -> vector<8x128xf32>
    %c64_i32_185 = arith.constant 64 : i32
    %453 = tpu.dynamic_rotate %444 by %c64_i32_185 dim 1 : vector<8x128xf32>, i32 -> vector<8x128xf32>
    %c64_i32_186 = arith.constant 64 : i32
    %454 = tpu.dynamic_rotate %445 by %c64_i32_186 dim 1 : vector<8x128xf32>, i32 -> vector<8x128xf32>
    %455 = arith.mulf %451, %454 : vector<8x128xf32>
    %456 = arith.addf %453, %455 : vector<8x128xf32>
    %457 = math.tanh %456 : vector<8x128xf32>
    %cst_187 = arith.constant 1.000000e+00 : f32
    %458 = vector.broadcast %cst_187 : f32 to vector<8x128xf32>
    %459 = arith.subf %458, %452 : vector<8x128xf32>
    %460 = arith.mulf %459, %457 : vector<8x128xf32>
    %461 = arith.mulf %452, %415 : vector<8x128xf32>
    %462 = arith.addf %460, %461 : vector<8x128xf32>
    %cst_188 = arith.constant 0.000000e+00 : f32
    %463 = vector.broadcast %cst_188 : f32 to vector<8x128xf32>
    %464 = arith.select %114, %462, %463 : vector<8x128xi1>, vector<8x128xf32>
    %465 = tpu.concatenate %443, %464 in 1 : vector<8x128xf32>, vector<8x128xf32> -> vector<8x256xf32>
    %466 = arith.truncf %465 : vector<8x256xf32> to vector<8x256xbf16>
    %c0_189 = arith.constant 0 : index
    %c0_190 = arith.constant 0 : index
    %467 = vector.load %arg13[%c0_189, %c0_190] : memref<256x256xbf16, #tpu.memory_space<vmem>>, vector<256x256xbf16>
    %cst_191 = arith.constant dense<0.000000e+00> : vector<8x256xf32>
    %468 = tpu.matmul %466, %467, %cst_191 {dimension_numbers = #tpu.dot_dimension_numbers<[1], [0], [0], [1], [0, 0, 1, 1], [], []>} : vector<8x256xbf16>, vector<256x256xbf16>, vector<8x256xf32> -> vector<8x256xf32>
    %c0_192 = arith.constant 0 : index
    %c0_193 = arith.constant 0 : index
    %469 = vector.load %arg14[%c0_192, %c0_193] : memref<1x256xf32, #tpu.memory_space<vmem>>, vector<1x256xf32>
    %470 = vector.broadcast %469 : vector<1x256xf32> to vector<8x256xf32>
    %471 = arith.addf %468, %470 : vector<8x256xf32>
    %472 = vector.extract_strided_slice %317 {offsets = [0, 0], sizes = [8, 128], strides = [1, 1]} : vector<8x256xf32> to vector<8x128xf32>
    %473 = vector.extract_strided_slice %471 {offsets = [0, 0], sizes = [8, 128], strides = [1, 1]} : vector<8x256xf32> to vector<8x128xf32>
    %474 = arith.addf %472, %473 : vector<8x128xf32>
    %475 = arith.negf %474 : vector<8x128xf32>
    %476 = math.exp %475 : vector<8x128xf32>
    %cst_194 = arith.constant 1.000000e+00 : f32
    %477 = vector.broadcast %cst_194 : f32 to vector<8x128xf32>
    %478 = arith.addf %477, %476 : vector<8x128xf32>
    %479 = arith.divf %477, %478 : vector<8x128xf32>
    %c96_i32_195 = arith.constant 96 : i32
    %480 = tpu.dynamic_rotate %479 by %c96_i32_195 dim 1 : vector<8x128xf32>, i32 -> vector<8x128xf32>
    %c64_i32_196 = arith.constant 64 : i32
    %481 = tpu.dynamic_rotate %472 by %c64_i32_196 dim 1 : vector<8x128xf32>, i32 -> vector<8x128xf32>
    %c64_i32_197 = arith.constant 64 : i32
    %482 = tpu.dynamic_rotate %473 by %c64_i32_197 dim 1 : vector<8x128xf32>, i32 -> vector<8x128xf32>
    %483 = arith.mulf %479, %482 : vector<8x128xf32>
    %484 = arith.addf %481, %483 : vector<8x128xf32>
    %485 = math.tanh %484 : vector<8x128xf32>
    %cst_198 = arith.constant 1.000000e+00 : f32
    %486 = vector.broadcast %cst_198 : f32 to vector<8x128xf32>
    %487 = arith.subf %486, %480 : vector<8x128xf32>
    %488 = arith.mulf %487, %485 : vector<8x128xf32>
    %489 = arith.mulf %480, %443 : vector<8x128xf32>
    %490 = arith.addf %488, %489 : vector<8x128xf32>
    %cst_199 = arith.constant 0.000000e+00 : f32
    %491 = vector.broadcast %cst_199 : f32 to vector<8x128xf32>
    %492 = arith.select %114, %490, %491 : vector<8x128xi1>, vector<8x128xf32>
    %493 = tpu.concatenate %492, %366 in 1 : vector<8x128xf32>, vector<8x128xf32> -> vector<8x256xf32>
    %494 = arith.truncf %493 : vector<8x256xf32> to vector<8x256xbf16>
    %c0_200 = arith.constant 0 : index
    %c0_201 = arith.constant 0 : index
    %495 = vector.load %arg15[%c0_200, %c0_201] : memref<256x256xbf16, #tpu.memory_space<vmem>>, vector<256x256xbf16>
    %cst_202 = arith.constant dense<0.000000e+00> : vector<8x256xf32>
    %496 = tpu.matmul %494, %495, %cst_202 {dimension_numbers = #tpu.dot_dimension_numbers<[1], [0], [0], [1], [0, 0, 1, 1], [], []>} : vector<8x256xbf16>, vector<256x256xbf16>, vector<8x256xf32> -> vector<8x256xf32>
    %c0_203 = arith.constant 0 : index
    %c0_204 = arith.constant 0 : index
    %497 = vector.load %arg16[%c0_203, %c0_204] : memref<1x256xf32, #tpu.memory_space<vmem>>, vector<1x256xf32>
    %498 = vector.broadcast %497 : vector<1x256xf32> to vector<8x256xf32>
    %499 = arith.addf %496, %498 : vector<8x256xf32>
    %cst_205 = arith.constant 0.000000e+00 : f32
    %500 = vector.broadcast %cst_205 : f32 to vector<8x256xf32>
    %501 = arith.maximumf %499, %500 : vector<8x256xf32>
    %502 = arith.truncf %501 : vector<8x256xf32> to vector<8x256xbf16>
    %c0_206 = arith.constant 0 : index
    %c0_207 = arith.constant 0 : index
    %503 = vector.load %arg17[%c0_206, %c0_207] : memref<256x256xbf16, #tpu.memory_space<vmem>>, vector<256x256xbf16>
    %cst_208 = arith.constant dense<0.000000e+00> : vector<8x256xf32>
    %504 = tpu.matmul %502, %503, %cst_208 {dimension_numbers = #tpu.dot_dimension_numbers<[1], [0], [0], [1], [0, 0, 1, 1], [], []>} : vector<8x256xbf16>, vector<256x256xbf16>, vector<8x256xf32> -> vector<8x256xf32>
    %c0_209 = arith.constant 0 : index
    %c0_210 = arith.constant 0 : index
    %505 = vector.load %arg18[%c0_209, %c0_210] : memref<1x256xf32, #tpu.memory_space<vmem>>, vector<1x256xf32>
    %506 = vector.broadcast %505 : vector<1x256xf32> to vector<8x256xf32>
    %507 = arith.addf %504, %506 : vector<8x256xf32>
    %cst_211 = arith.constant 0.000000e+00 : f32
    %508 = vector.broadcast %cst_211 : f32 to vector<8x256xf32>
    %509 = arith.maximumf %507, %508 : vector<8x256xf32>
    %510 = arith.truncf %509 : vector<8x256xf32> to vector<8x256xbf16>
    %c0_212 = arith.constant 0 : index
    %c0_213 = arith.constant 0 : index
    %511 = vector.load %arg19[%c0_212, %c0_213] : memref<256x128xbf16, #tpu.memory_space<vmem>>, vector<256x128xbf16>
    %cst_214 = arith.constant dense<0.000000e+00> : vector<8x128xf32>
    %512 = tpu.matmul %510, %511, %cst_214 {dimension_numbers = #tpu.dot_dimension_numbers<[1], [0], [0], [1], [0, 0, 1, 1], [], []>} : vector<8x256xbf16>, vector<256x128xbf16>, vector<8x128xf32> -> vector<8x128xf32>
    %c0_215 = arith.constant 0 : index
    %c0_216 = arith.constant 0 : index
    %513 = vector.load %arg20[%c0_215, %c0_216] : memref<1x128xf32, #tpu.memory_space<vmem>>, vector<1x128xf32>
    %514 = vector.broadcast %513 : vector<1x128xf32> to vector<8x128xf32>
    %515 = arith.addf %512, %514 : vector<8x128xf32>
    %516 = arith.negf %515 : vector<8x128xf32>
    %517 = math.exp %516 : vector<8x128xf32>
    %cst_217 = arith.constant 1.000000e+00 : f32
    %518 = vector.broadcast %cst_217 : f32 to vector<8x128xf32>
    %519 = arith.addf %518, %517 : vector<8x128xf32>
    %520 = arith.divf %518, %519 : vector<8x128xf32>
    %c0_218 = arith.constant 0 : index
    %c0_219 = arith.constant 0 : index
    %521 = vector.load %arg21[%c0_218, %c0_219] : memref<8x128xf32, #tpu.memory_space<vmem>>, vector<8x128xf32>
    tpu.vector_store %arg21[%c0_218, %c0_219], %520 {strides = array<i32>} : memref<8x128xf32, #tpu.memory_space<vmem>>, vector<8x128xf32>,
    return
  }
}

</mosaic_0001>

<bundles_post_ra>
// kernel: forward.1
= control target key start
LH: loop header
LB: loop body
LE: loop exit
PB: predicated region body
PF: predicated region fallthrough
CT: control target
= control target key end

     0   :  { %s6083_s0 = inlined_call_operand.vmem [shape: s32[32,1], index: 0, kind: input, shape index: {}]   ;;  %s6084_s1 = inlined_call_operand.vmem [shape: bf16[64,32], index: 1, kind: input, shape index: {}]   ;;  %s6085_s2 = inlined_call_operand.vmem [shape: bf16[3,32,128], index: 2, kind: input, shape index: {}]   ;;  %s6086_s3 = inlined_call_operand.hbm [shape: f32[1,128], index: 3, kind: input, shape index: {}]   ;;  %s6087_s4 = inlined_call_operand.hbm [shape: bf16[3,128,128], index: 4, kind: input, shape index: {}]   ;;  %s6088_s5 = inlined_call_operand.hbm [shape: f32[1,128], index: 5, kind: input, shape index: {}]   ;;  %s6089_s6 = inlined_call_operand.vmem [shape: bf16[16,32], index: 6, kind: input, shape index: {}]   ;;  %s6090_s7 = inlined_call_operand.vmem [shape: bf16[32,16], index: 7, kind: input, shape index: {}]   ;;  %s6091_s8 = inlined_call_operand.vmem [shape: bf16[128,256], index: 8, kind: input, shape index: {}]   ;;  %s6092_s9 = inlined_call_operand.vmem [shape: f32[1,256], index: 9, kind: input, shape index: {}]   ;;  %s6093_s10 = inlined_call_operand.hbm [shape: bf16[256,256], index: 10, kind: input, shape index: {}]   ;;  %s6094_s11 = inlined_call_operand.hbm [shape: bf16[256,256], index: 11, kind: input, shape index: {}]   ;;  %s6095_s12 = inlined_call_operand.vmem [shape: f32[1,256], index: 12, kind: input, shape index: {}]   ;;  %s6096_s13 = inlined_call_operand.hbm [shape: bf16[256,256], index: 13, kind: input, shape index: {}]   ;;  %s6097_s14 = inlined_call_operand.vmem [shape: f32[1,256], index: 14, kind: input, shape index: {}]   ;;  %s6098_s15 = inlined_call_operand.hbm [shape: bf16[256,256], index: 15, kind: input, shape index: {}]   ;;  %s6099_s16 = inlined_call_operand.vmem [shape: f32[1,256], index: 16, kind: input, shape index: {}]   ;;  %s6100_s17 = inlined_call_operand.hbm [shape: bf16[256,256], index: 17, kind: input, shape index: {}]   ;;  %s6101_s18 = inlined_call_operand.hbm [shape: f32[1,256], index: 18, kind: input, shape index: {}]   ;;  %s6102_s19 = inlined_call_operand.hbm [shape: bf16[256,128], index: 19, kind: input, shape index: {}]   ;;  %s6103_s20 = inlined_call_operand.hbm [shape: f32[1,128], index: 20, kind: input, shape index: {}]   ;;  %s6104_s21 = inlined_call_operand.vmem [shape: f32[8,128], index: 21, kind: output, shape index: {}]  }
   0x1   :  { %6118 = sst [smem:[#allocation27_spill]] %s6083_s0 }
   0x2   :  { %6119 = sst [smem:[#allocation28_spill]] %s6084_s1 }
   0x3   :  { %6120 = sst [smem:[#allocation29_spill]] %s6085_s2 }
   0x4   :  { %6121 = sst [smem:[#allocation30_spill]] %s6086_s3 }
   0x5   :  { %6122 = sst [smem:[#allocation31_spill]] %s6087_s4 }
   0x6   :  { %6123 = sst [smem:[#allocation32_spill]] %s6088_s5 }
   0x7   :  { %6124 = sst [smem:[#allocation33_spill]] %s6104_s21 }
   0x8   :  { %26 = vsyncpa [#allocation3], 0 }
   0x9   :  { %27 = vsyncpa [#allocation5], 0 }
   0xa   :  { %28 = vsyncpa [#allocation8], 0 }
   0xb   :  { %29 = vsyncpa [#allocation11], 0 }
   0xc   :  { %30 = vsyncpa [#allocation14], 0 }
   0xd   :  { %31 = vsyncpa [#allocation17], 0  ;;  %s4678_s2 = smov [#allocation4]   ;;  %s6125_s3 = sld [smem:[#allocation31_spill]] }
   0xe   :  { %s53_s25 = sshll.u32 %s4678_s2, 4  ;;  %s54_s25 = int_to_ptr.vmem [resolvable:$true] %s53_s25 }
  0x13   :  { %s4424_s28 = scalar_lea.hbm %s6125_s3, 3072 }
  0x14   :  { %p4425_p0 = scmp.ne.s32.totalorder %s6125_s3, %s4424_s28  ;;  %p4428_p1 = scmp.lt.u32.totalorder %s4424_s28, %s6125_s3 }
  0x16   :  { %p4430_p2 = pnand %p4428_p1, %p4425_p0 }
  0x18   :  { %4433 = shalt.err (!%p4430_p2)
}
  0x19   :  { %s4434_s5 = scalar_lea.vmem %s54_s25, 3072  ;;  %p4439_p4 = scmp.lt.s32.totalorder %s54_s25, %s54_s25 }
  0x1a   :  { %p4435_p3 = scmp.ne.s32.totalorder %s54_s25, %s4434_s5  ;;  %p4440_p5 = scmp.lt.s32.totalorder %s4434_s5, %s4434_s5 }
  0x1c   :  { %p4441_p6 = por %p4440_p5, %p4439_p4 }
  0x1e   :  { %p4442_p7 = pnand %p4441_p6, %p4435_p3 }
  0x20   :  { %4445 = shalt.err (!%p4442_p7)
}
  0x21   :  { %s6111_s22 = smov 64   ;;  %s6113_s23 = smov 4  }
  0x22   :  { %59 = dma.hbm_to_vmem [thread:$0]  %s6125_s3, 3072, %s54_s25, [#allocation5], %s6111_s22, %s6111_s22, %s6113_s23  }
  0x23   :  { %s4681_s2 = smov [#allocation7]   ;;  %s4446_s29 = scalar_lea.hbm %s6093_s10, 4096 }
  0x24   :  { %s83_s26 = sshll.u32 %s4681_s2, 4  ;;  %p4447_p8 = scmp.ne.s32.totalorder %s6093_s10, %s4446_s29  ;;  %s84_s26 = int_to_ptr.vmem [resolvable:$true] %s83_s26 }
  0x25   :  { %p4450_p9 = scmp.lt.u32.totalorder %s4446_s29, %s6093_s10 }
  0x27   :  { %p4452_p10 = pnand %p4450_p9, %p4447_p8 }
  0x29   :  { %4455 = shalt.err (!%p4452_p10)
}
  0x2a   :  { %s4456_s21 = scalar_lea.vmem %s84_s26, 4096  ;;  %p4461_p12 = scmp.lt.s32.totalorder %s84_s26, %s84_s26 }
  0x2b   :  { %p4457_p11 = scmp.ne.s32.totalorder %s84_s26, %s4456_s21  ;;  %p4462_p13 = scmp.lt.s32.totalorder %s4456_s21, %s4456_s21 }
  0x2d   :  { %p4463_p0 = por %p4462_p13, %p4461_p12 }
  0x2f   :  { %p4464_p1 = pnand %p4463_p0, %p4457_p11 }
  0x31   :  { %4467 = shalt.err (!%p4464_p1)
}
  0x32   :  { %s4682_s25 = smov 128   ;;  %s4683_s3 = smov 8  }
  0x33   :  { %89 = dma.hbm_to_vmem [thread:$0]  %s6093_s10, 4096, %s84_s26, [#allocation8], %s4682_s25, %s4682_s25, %s4683_s3  }
  0x34   :  { %s4684_s2 = smov [#allocation10]   ;;  %s4685_s28 = smov [#allocation13]  }
  0x35   :  { %s109_s27 = sshll.u32 %s4684_s2, 4  ;;  %s137_s29 = sshll.u32 %s4685_s28, 4  ;;  %s110_s27 = int_to_ptr.vmem [resolvable:$true] %s109_s27  ;;  %s4839_s29 = int_to_ptr.vmem [resolvable:$true] %s137_s29 }
  0x36   :  { %s4468_s4 = scalar_lea.hbm %s6096_s13, 4096 }
  0x37   :  { %p4469_p2 = scmp.ne.s32.totalorder %s6096_s13, %s4468_s4  ;;  %p4472_p3 = scmp.lt.u32.totalorder %s4468_s4, %s6096_s13 }
  0x39   :  { %p4474_p4 = pnand %p4472_p3, %p4469_p2 }
  0x3b   :  { %4477 = shalt.err (!%p4474_p4)
}
  0x3c   :  { %s4478_s10 = scalar_lea.vmem %s110_s27, 4096  ;;  %p4483_p6 = scmp.lt.s32.totalorder %s110_s27, %s110_s27 }
  0x3d   :  { %p4479_p5 = scmp.ne.s32.totalorder %s110_s27, %s4478_s10  ;;  %p4484_p7 = scmp.lt.s32.totalorder %s4478_s10, %s4478_s10 }
  0x3f   :  { %p4485_p8 = por %p4484_p7, %p4483_p6 }
  0x41   :  { %p4486_p9 = pnand %p4485_p8, %p4479_p5 }
  0x43   :  { %4489 = shalt.err (!%p4486_p9)
}
  0x44   :  { %115 = dma.hbm_to_vmem [thread:$0]  %s6096_s13, 4096, %s110_s27, [#allocation11], %s4682_s25, %s4682_s25, %s4683_s3  }
  0x45   :  { %s4490_s22 = scalar_lea.hbm %s6100_s17, 4096 }
  0x46   :  { %p4491_p10 = scmp.ne.s32.totalorder %s6100_s17, %s4490_s22  ;;  %p4494_p11 = scmp.lt.u32.totalorder %s4490_s22, %s6100_s17 }
  0x48   :  { %p4496_p12 = pnand %p4494_p11, %p4491_p10 }
  0x4a   :  { %4499 = shalt.err (!%p4496_p12)
}
  0x4b   :  { %s4500_s4 = scalar_lea.vmem %s4839_s29, 4096  ;;  %p4505_p0 = scmp.lt.s32.totalorder %s4839_s29, %s4839_s29 }
  0x4c   :  { %p4501_p13 = scmp.ne.s32.totalorder %s4839_s29, %s4500_s4  ;;  %p4506_p1 = scmp.lt.s32.totalorder %s4500_s4, %s4500_s4 }
  0x4e   :  { %p4507_p2 = por %p4506_p1, %p4505_p0 }
  0x50   :  { %p4508_p3 = pnand %p4507_p2, %p4501_p13 }
  0x52   :  { %4511 = shalt.err (!%p4508_p3)
}
  0x53   :  { %143 = dma.hbm_to_vmem [thread:$0]  %s6100_s17, 4096, %s4839_s29, [#allocation14], %s4682_s25, %s4682_s25, %s4683_s3  }
  0x54   :  { %s4686_s30 = smov [#allocation16]   ;;  %s4687_s10 = smov [#allocation2]  }
  0x55   :  { %s159_s5 = sshll.u32 %s4686_s30, 4  ;;  %s44_s26 = sshll.u32 %s4687_s10, 4  ;;  %s160_s5 = int_to_ptr.vmem [resolvable:$true] %s159_s5  ;;  %s45_s26 = int_to_ptr.vmem [resolvable:$true] %s44_s26 }
  0x56   :  { %s4512_s2 = scalar_lea.hbm %s6102_s19, 2048 }
  0x57   :  { %p4513_p4 = scmp.ne.s32.totalorder %s6102_s19, %s4512_s2  ;;  %p4516_p5 = scmp.lt.u32.totalorder %s4512_s2, %s6102_s19 }
  0x59   :  { %p4518_p6 = pnand %p4516_p5, %p4513_p4 }
  0x5b   :  { %4521 = shalt.err (!%p4518_p6)
}
  0x5c   :  { %s4522_s17 = scalar_lea.vmem %s160_s5, 2048  ;;  %p4527_p8 = scmp.lt.s32.totalorder %s160_s5, %s160_s5 }
  0x5d   :  { %p4523_p7 = scmp.ne.s32.totalorder %s160_s5, %s4522_s17  ;;  %p4528_p9 = scmp.lt.s32.totalorder %s4522_s17, %s4522_s17 }
  0x5f   :  { %p4529_p10 = por %p4528_p9, %p4527_p8 }
  0x61   :  { %p4530_p11 = pnand %p4529_p10, %p4523_p7 }
  0x63   :  { %4533 = shalt.err (!%p4530_p11)
}
  0x64   :  { %s6126_s29 = smov 4   ;;  %s6127_s0 = smov 64  }
  0x65   :  { %165 = dma.hbm_to_vmem [thread:$0]  %s6102_s19, 2048, %s160_s5, [#allocation17], %s6127_s0, %s6127_s0, %s6126_s29  }
  0x66   :  { %s6128_s10 = sld [smem:[#allocation30_spill]] }
  0x6c   :  { %s4534_s1 = scalar_lea.hbm %s6128_s10, 16 }
  0x6d   :  { %p4535_p12 = scmp.ne.s32.totalorder %s6128_s10, %s4534_s1  ;;  %p4538_p13 = scmp.lt.u32.totalorder %s4534_s1, %s6128_s10 }
  0x6f   :  { %p4540_p0 = pnand %p4538_p13, %p4535_p12 }
  0x71   :  { %4543 = shalt.err (!%p4540_p0)
}
  0x72   :  { %s4544_s28 = scalar_lea.vmem %s45_s26, 16  ;;  %s4548_s21 = scalar_lea.vmem %s45_s26, 32 }
  0x73   :  { %p4545_p1 = scmp.ne.s32.totalorder %s45_s26, %s4544_s28  ;;  %p4549_p2 = scmp.lt.s32.totalorder %s45_s26, %s45_s26 }
  0x74   :  { %p4550_p3 = scmp.lt.s32.totalorder %s4548_s21, %s4544_s28 }
  0x76   :  { %p4551_p4 = por %p4550_p3, %p4549_p2 }
  0x78   :  { %p4552_p5 = pnand %p4551_p4, %p4545_p1 }
  0x7a   :  { %4555 = shalt.err (!%p4552_p5)
}
  0x7b   :  { %47 = dma.hbm_to_vmem [thread:$0]  %s6128_s10, 16, %s45_s26, [#allocation3]  }
  0x7c   :  { %s4688_s17 = smov [#allocation6]   ;;  %s4689_s4 = smov [#allocation9]  }
  0x7d   :  { %s66_s29 = sshll.u32 %s4688_s17, 4  ;;  %s95_s13 = sshll.u32 %s4689_s4, 4  ;;  %s67_s29 = int_to_ptr.vmem [resolvable:$true] %s66_s29  ;;  %s4903_s13 = int_to_ptr.vmem [resolvable:$true] %s95_s13 }
  0x7e   :  { %s6129_s1 = sld [smem:[#allocation32_spill]] }
  0x84   :  { %s4556_s24 = scalar_lea.hbm %s6129_s1, 16 }
  0x85   :  { %p4557_p6 = scmp.ne.s32.totalorder %s6129_s1, %s4556_s24  ;;  %p4560_p7 = scmp.lt.u32.totalorder %s4556_s24, %s6129_s1 }
  0x87   :  { %p4562_p8 = pnand %p4560_p7, %p4557_p6 }
  0x89   :  { %4565 = shalt.err (!%p4562_p8)
}
  0x8a   :  { %s4566_s26 = scalar_lea.vmem %s67_s29, 16  ;;  %s4570_s10 = scalar_lea.vmem %s67_s29, 32 }
  0x8b   :  { %p4567_p9 = scmp.ne.s32.totalorder %s67_s29, %s4566_s26  ;;  %p4571_p10 = scmp.lt.s32.totalorder %s67_s29, %s67_s29 }
  0x8c   :  { %p4572_p11 = scmp.lt.s32.totalorder %s4570_s10, %s4566_s26 }
  0x8e   :  { %p4573_p12 = por %p4572_p11, %p4571_p10 }
  0x90   :  { %p4574_p13 = pnand %p4573_p12, %p4567_p9 }
  0x92   :  { %4577 = shalt.err (!%p4574_p13)
}
  0x93   :  { %69 = dma.hbm_to_vmem [thread:$0]  %s6129_s1, 16, %s67_s29, [#allocation5]  }
  0x94   :  { %s4578_s4 = scalar_lea.hbm %s6094_s11, 4096 }
  0x95   :  { %p4579_p0 = scmp.ne.s32.totalorder %s6094_s11, %s4578_s4  ;;  %p4582_p1 = scmp.lt.u32.totalorder %s4578_s4, %s6094_s11 }
  0x97   :  { %p4584_p2 = pnand %p4582_p1, %p4579_p0 }
  0x99   :  { %4587 = shalt.err (!%p4584_p2)
}
  0x9a   :  { %s4588_s22 = scalar_lea.vmem %s4903_s13, 4096  ;;  %p4593_p4 = scmp.lt.s32.totalorder %s4903_s13, %s4903_s13 }
  0x9b   :  { %p4589_p3 = scmp.ne.s32.totalorder %s4903_s13, %s4588_s22  ;;  %p4594_p5 = scmp.lt.s32.totalorder %s4588_s22, %s4588_s22 }
  0x9d   :  { %p4595_p6 = por %p4594_p5, %p4593_p4 }
  0x9f   :  { %p4596_p7 = pnand %p4595_p6, %p4589_p3 }
  0xa1   :  { %4599 = shalt.err (!%p4596_p7)
}
  0xa2   :  { %101 = dma.hbm_to_vmem [thread:$0]  %s6094_s11, 4096, %s4903_s13, [#allocation8], %s4682_s25, %s4682_s25, %s4683_s3  }
  0xa3   :  { %s4690_s23 = smov [#allocation12]   ;;  %s4691_s26 = smov [#allocation15]  }
  0xa4   :  { %s123_s28 = sshll.u32 %s4690_s23, 4  ;;  %s150_s10 = sshll.u32 %s4691_s26, 4  ;;  %s124_s28 = int_to_ptr.vmem [resolvable:$true] %s123_s28  ;;  %s151_s10 = int_to_ptr.vmem [resolvable:$true] %s150_s10 }
  0xa5   :  { %s4600_s5 = scalar_lea.hbm %s6098_s15, 4096 }
  0xa6   :  { %p4601_p8 = scmp.ne.s32.totalorder %s6098_s15, %s4600_s5  ;;  %p4604_p9 = scmp.lt.u32.totalorder %s4600_s5, %s6098_s15 }
  0xa8   :  { %p4606_p10 = pnand %p4604_p9, %p4601_p8 }
  0xaa   :  { %4609 = shalt.err (!%p4606_p10)
}
  0xab   :  { %s4610_s11 = scalar_lea.vmem %s124_s28, 4096  ;;  %p4615_p12 = scmp.lt.s32.totalorder %s124_s28, %s124_s28 }
  0xac   :  { %p4611_p11 = scmp.ne.s32.totalorder %s124_s28, %s4610_s11  ;;  %p4616_p13 = scmp.lt.s32.totalorder %s4610_s11, %s4610_s11 }
  0xae   :  { %p4617_p0 = por %p4616_p13, %p4615_p12 }
  0xb0   :  { %p4618_p1 = pnand %p4617_p0, %p4611_p11 }
  0xb2   :  { %4621 = shalt.err (!%p4618_p1)
}
  0xb3   :  { %129 = dma.hbm_to_vmem [thread:$0]  %s6098_s15, 4096, %s124_s28, [#allocation11], %s4682_s25, %s4682_s25, %s4683_s3  }
  0xb4   :  { %s4622_s29 = scalar_lea.hbm %s6101_s18, 32 }
  0xb5   :  { %p4623_p2 = scmp.ne.s32.totalorder %s6101_s18, %s4622_s29  ;;  %p4626_p3 = scmp.lt.u32.totalorder %s4622_s29, %s6101_s18 }
  0xb7   :  { %p4628_p4 = pnand %p4626_p3, %p4623_p2 }
  0xb9   :  { %4631 = shalt.err (!%p4628_p4)
}
  0xba   :  { %s4632_s19 = scalar_lea.vmem %s151_s10, 32  ;;  %p4637_p6 = scmp.lt.s32.totalorder %s151_s10, %s151_s10 }
  0xbb   :  { %p4633_p5 = scmp.ne.s32.totalorder %s151_s10, %s4632_s19  ;;  %p4638_p7 = scmp.lt.s32.totalorder %s4632_s19, %s4632_s19 }
  0xbd   :  { %p4639_p8 = por %p4638_p7, %p4637_p6 }
  0xbf   :  { %p4640_p9 = pnand %p4639_p8, %p4633_p5 }
  0xc1   :  { %4643 = shalt.err (!%p4640_p9)
}
  0xc2   :  { %153 = dma.hbm_to_vmem [thread:$0]  %s6101_s18, 32, %s151_s10, [#allocation14]  }
  0xc3   :  { %s4692_s3 = smov [#allocation18]   ;;  %s4644_s4 = scalar_lea.hbm %s6103_s20, 16 }
  0xc4   :  { %s172_s28 = sshll.u32 %s4692_s3, 4  ;;  %p4645_p10 = scmp.ne.s32.totalorder %s6103_s20, %s4644_s4  ;;  %s173_s28 = int_to_ptr.vmem [resolvable:$true] %s172_s28 }
  0xc5   :  { %p4648_p11 = scmp.lt.u32.totalorder %s4644_s4, %s6103_s20 }
  0xc7   :  { %p4650_p12 = pnand %p4648_p11, %p4645_p10 }
  0xc9   :  { %4653 = shalt.err (!%p4650_p12)
}
  0xca   :  { %s4654_s24 = scalar_lea.vmem %s173_s28, 16  ;;  %s4658_s18 = scalar_lea.vmem %s173_s28, 32 }
  0xcb   :  { %p4655_p13 = scmp.ne.s32.totalorder %s173_s28, %s4654_s24  ;;  %p4659_p0 = scmp.lt.s32.totalorder %s173_s28, %s173_s28 }
  0xcc   :  { %p4660_p1 = scmp.lt.s32.totalorder %s4658_s18, %s4654_s24 }
  0xce   :  { %p4661_p2 = por %p4660_p1, %p4659_p0 }
  0xd0   :  { %p4662_p3 = pnand %p4661_p2, %p4655_p13 }
  0xd2   :  { %4665 = shalt.err (!%p4662_p3)
}
  0xd3   :  { %175 = dma.hbm_to_vmem [thread:$0]  %s6103_s20, 16, %s173_s28, [#allocation17]  }
  0xd4   :  { %4666 = dma.done.wait [#allocation3], 16  }
  0xd5   :  { %4667 = vsyncadd [#allocation3], 4294967280 }
  0xd6   :  { %4668 = dma.done.wait [#allocation5], 3088  }
  0xd7   :  { %4669 = vsyncadd [#allocation5], 4294964208 }
  0xd8   :  { %4670 = dma.done.wait [#allocation8], 8192  }
  0xd9   :  { %4671 = vsyncadd [#allocation8], 4294959104 }
  0xda   :  { %4672 = dma.done.wait [#allocation11], 8192  }
  0xdb   :  { %4673 = vsyncadd [#allocation11], 4294959104 }
  0xdc   :  { %4674 = dma.done.wait [#allocation14], 4128  }
  0xdd   :  { %4675 = vsyncadd [#allocation14], 4294963168 }
  0xde   :  { %4676 = dma.done.wait [#allocation17], 2064  }
  0xdf   :  { %4677 = vsyncadd [#allocation17], 4294965232  ;;  %v4693_v0 = vmov 0   ;;  %v4694_v1 = vmov 0.0   ;;  %s6130_s29 = sld [smem:[#allocation27_spill]]  ;;  %s6131_s28 = sld [smem:[#allocation28_spill]]  ;;  %v214_v11 = vlaneseq }
  0xe0   :  { %3996 = vset.pattern.permute.xlu1 %v4693_v0  ;;  %3995 = vset.pattern.permute.xlu0 %v4693_v0  ;;  %s6132_s18 = sld [smem:[#allocation29_spill]]  ;;  %vm270_vm4 = vcmask 523264   ;;  %vm438_vm9 = vcmask 261120   ;;  %vm4695_vm12 = vmmov 0   ;;  %v4017_v50 = vld [vmem:[#allocation4 + $0x68] sm:$0xff]  }
  0xe1   :  { %3892 = vmatprep.subr.bf16.mxu0 %v4694_v1  ;;  %v5006_v12 = vand.u32 127, %v214_v11  ;;  %v5022_v25 = vshrl.u32 %v214_v11, 7  ;;  %3896 = vmatprep.mubr.msk.bf16.mxu0 %vm4695_vm12, %v4694_v1  ;;  %v4016_v11 = vld [vmem:[#allocation4 + $0x18] sm:$0xff]  }
  0xe3   :  { %v330_v26 = vadd.s32 24, %v5022_v25  ;;  %v329_v27 = vadd.s32 16, %v5022_v25  ;;  %v5027_v28 = vadd.s32 8, %v5022_v25  ;;  %v335_v31 = vand.u32 15, %v5022_v25 }
  0xe4   :  { %vm387_vm5 = vcmp.lt.s32.totalorder %v5022_v25, 1  ;;  %vm404_vm7 = vcmp.lt.s32.totalorder %v5022_v25, 7 }
  0xe5   :  { %v212_v2 = vld [vmem:[%s6130_s29 + $0x10] sm:$0xff]  ;;  %v210_v3 = vld [vmem:[%s6130_s29] sm:$0xff]  ;;  %v213_v4 = vld [vmem:[%s6130_s29 + $0x18] sm:$0xff]  ;;  %v356_v29 = vand.u32 15, %v330_v26  ;;  %v349_v30 = vand.u32 15, %v329_v27  ;;  %v342_v33 = vand.u32 15, %v5027_v28 }
  0xe6   :  { %223 = vperm.xlu1 %3996, %v212_v2   ;;  %217 = vperm.xlu0 %3995, %v210_v3   ;;  %v211_v5 = vld [vmem:[%s6130_s29 + $0x8] sm:$0xff]  ;;  %v3997_v6 = vld [vmem:[%s6131_s28] sm:$0xff]   ;;  %v3999_v8 = vld [vmem:[%s6131_s28 + $0x10] sm:$0xff]   ;;  %vm5041_vm10 = vcmp.gt.s32.totalorder %v335_v31, 0  ;;  %s6151_s29 = sld [smem:[#allocation33_spill]] }
  0xe7   :  { %v3998_v7 = vld [vmem:[%s6131_s28 + $0x8] sm:$0xff]   ;;  %3856 = vmatprep.subr.bf16.mxu1 %v3997_v6  ;;  %v4000_v9 = vld [vmem:[%s6131_s28 + $0x18] sm:$0xff]   ;;  %v4001_v10 = vld [vmem:[%s6132_s18 + $0x10] sm:$0xff]   ;;  %vm5032_vm6 = vcmp.lt.s32.totalorder %v356_v29, 15  ;;  %vm5037_vm8 = vcmp.gt.s32.totalorder %v349_v30, 0  ;;  %vm5045_vm11 = vcmp.lt.s32.totalorder %v342_v33, 15 }
  0xe8   :  { %3857 = vmatpush3.bf16.msra.mxu1 %v3997_v6  ;;  %v4002_v23 = vld [vmem:[%s6132_s18 + $0x18] sm:$0xff]   ;;  %v4003_v24 = vld [vmem:[%s6132_s18] sm:$0xff]   ;;  %v4004_v55 = vld [vmem:[%s6132_s18 + $0x8] sm:$0xff]  }
  0xe9   :  { %3858 = vmatprep.subr.bf16.mxu1 %v3998_v7  ;;  %v4005_v6 = vld [vmem:[%s6132_s18 + $0x20] sm:$0xff]  }
  0xea   :  { %226 = vperm.xlu1 %3996, %v213_v4   ;;  %220 = vperm.xlu0 %3995, %v211_v5  }
  0xec   :  { %3859 = vmatpush3.bf16.msra.mxu1 %v3998_v7  ;;  %v4006_v7 = vld [vmem:[%s6132_s18 + $0x28] sm:$0xff]  }
  0xed   :  { %3860 = vmatprep.subr.bf16.mxu1 %v3999_v8 }
  0xf0   :  { %3861 = vmatpush3.bf16.msra.mxu1 %v3999_v8  ;;  %v4010_v8 = vld [vmem:[#allocation4] sm:$0xff]  }
  0xf1   :  { %3862 = vmatprep.subr.bf16.mxu1 %v4000_v9 }
  0xf4   :  { %3863 = vmatpush3.bf16.msra.mxu1 %v4000_v9  ;;  %v4012_v9 = vld [vmem:[#allocation4 + $0x8] sm:$0xff]  }
  0xf5   :  { %3868 = vmatprep.subr.bf16.mxu1 %v4001_v10 }
 0x165   :  { %v224_v13 = vpop.permute.xlu1 %223  ;;  %v218_v14 = vpop.permute.xlu0 %217 }
 0x166   :  { %vm230_vm0 = vcmp.eq.s32.totalorder %v224_v13, %v5006_v12  ;;  %vm228_vm1 = vcmp.eq.s32.totalorder %v218_v14, %v5006_v12  ;;  %v4018_v13 = vld [vmem:[#allocation4 + $0x20] sm:$0xff]   ;;  %v4020_v14 = vld [vmem:[#allocation4 + $0x28] sm:$0xff]  }
 0x167   :  { %v234_v17 = vsel %vm230_vm0, 1.0, %v4694_v1  ;;  %v232_v18 = vsel %vm228_vm1, 1.0, %v4694_v1 }
 0x169   :  { %v227_v15 = vpop.permute.xlu1 %226  ;;  %v221_v16 = vpop.permute.xlu0 %220 }
 0x16a   :  { %vm231_vm2 = vcmp.eq.s32.totalorder %v227_v15, %v5006_v12  ;;  %vm229_vm3 = vcmp.eq.s32.totalorder %v221_v16, %v5006_v12  ;;  %v3470_v15 = vld [vmem:[#allocation2] ss:$0 sm:$0xff] }
 0x16b   :  { %v235_v19 = vsel %vm231_vm2, 1.0, %v4694_v1  ;;  %v233_v20 = vsel %vm229_vm3, 1.0, %v4694_v1  ;;  %vm1113_vm3 = vcmask 130048  }
 0x16c   :  { %v237_v21 = vpack.c.bf16 %v235_v19, %v234_v17  ;;  %v236_v22 = vpack.c.bf16 %v233_v20, %v232_v18 }
 0x16e   :  { %3864 = vmatprep.mubr.msk.bf16.mxu1 %vm270_vm4, %v236_v22 }
 0x16f   :  { %3865 = vmatmul.mubr.msk.bf16.vlgmr.msra.gmra.mrb[0].mxu1 %vm270_vm4, %v237_v21  ;;  %vm1169_vm4 = vcmp.lt.s32.totalorder %v5006_v12, 32  ;;  %v4301_v12 = vld [vmem:[#allocation16 + $0x8] sm:$0xff]  }
 0x170   :  { %3869 = vmatpush3.bf16.msra.mxu1 %v4001_v10  ;;  %v4014_v10 = vld [vmem:[#allocation4 + $0x10] sm:$0xff]  }
 0x171   :  { %3870 = vmatprep.subr.bf16.mxu1 %v4002_v23 }
 0x174   :  { %3871 = vmatpush3.bf16.msra.mxu1 %v4002_v23 }
 0x175   :  { %3876 = vmatprep.subr.bf16.mxu1 %v4003_v24 }
 0x242   :  { %v3866_v32 = vpop.f32.mrb[0].mxu1 }
 0x243   :  { %v311_v34 = vpop.f32.mrb[1].mxu1  ;;  %v385_v37 = vrot.slane %v3866_v32, 7  ;;  %v402_v42 = vrot.slane %v3866_v32, 1 }
 0x244   :  { %v383_v38 = vrot.slane %v311_v34, 7  ;;  %v400_v39 = vrot.slane %v311_v34, 1  ;;  %v3867_v40 = vpop.f32.mrb[2].mxu1 }
 0x245   :  { %v386_v43 = vrot.slane %v3867_v40, 7  ;;  %v403_v44 = vrot.slane %v3867_v40, 1  ;;  %v420_v45 = vpack.c.bf16 %v3867_v40, %v3866_v32  ;;  %v314_v46 = vpop.f32.mrb[3].mxu1 }
 0x246   :  { %v384_v47 = vrot.slane %v314_v46, 7  ;;  %v401_v48 = vrot.slane %v314_v46, 1  ;;  %v419_v49 = vpack.c.bf16 %v314_v46, %v311_v34  ;;  %v4009_v46 = vld [vmem:[#allocation4 + $0x48] sm:$0xff]  }
 0x247   :  { %v388_v51 = vsel %vm387_vm5, %v385_v37, %v386_v43  ;;  %v391_v52 = vsel %vm387_vm5, %v386_v43, %v383_v38  ;;  %v405_v53 = vsel %vm404_vm7, %v402_v42, %v403_v44  ;;  %v408_v54 = vsel %vm404_vm7, %v403_v44, %v400_v39  ;;  %v4007_v44 = vld [vmem:[%s6089_s6] sm:$0xff]  }
 0x248   :  { %v412_v56 = vsel %vm5032_vm6, %v408_v54, 0.0  ;;  %v389_v57 = vsel %vm387_vm5, %v384_v47, %v385_v37  ;;  %v390_v58 = vsel %vm387_vm5, %v383_v38, %v384_v47  ;;  %v406_v59 = vsel %vm404_vm7, %v401_v48, %v402_v42  ;;  %3872 = vmatprep.mubr.msk.bf16.mxu1 %vm438_vm9, %v419_v49  ;;  %v4011_v47 = vld [vmem:[#allocation4 + $0x50] sm:$0xff]   ;;  %v4015_v49 = vld [vmem:[#allocation4 + $0x60] sm:$0xff]   ;;  %v4023_v54 = vld [vmem:[#allocation4 + $0x38] sm:$0xff]  }
 0x249   :  { %v562_v60 = vpack.c.bf16 %v412_v56, %v405_v53  ;;  %v394_v61 = vsel %vm5037_vm8, %v389_v57, 0.0  ;;  %v407_v62 = vsel %vm404_vm7, %v400_v39, %v401_v48  ;;  %3873 = vmatmul.mubr.msk.bf16.vlgmr.msra.gmra.mrb[4].mxu1 %vm438_vm9, %v420_v45  ;;  %v392_v63 = vsel %vm5041_vm10, %v391_v52, 0.0  ;;  %v4008_v45 = vld [vmem:[#allocation4 + $0x40] sm:$0xff]   ;;  %v4013_v48 = vld [vmem:[#allocation4 + $0x58] sm:$0xff]   ;;  %v4022_v53 = vld [vmem:[#allocation4 + $0x30] sm:$0xff]  }
 0x24a   :  { %v414_v2 = vpack.c.bf16 %v388_v51, %v394_v61  ;;  %v413_v3 = vpack.c.bf16 %v390_v58, %v392_v63  ;;  %3877 = vmatpush3.bf16.msra.mxu1 %v4003_v24  ;;  %v410_v4 = vsel %vm5045_vm11, %v406_v59, 0.0  ;;  %v4019_v51 = vld [vmem:[#allocation4 + $0x70] sm:$0xff]   ;;  %v4021_v52 = vld [vmem:[#allocation4 + $0x78] sm:$0xff]   ;;  %v730_v56 = vand.u32 7, %v5027_v28  ;;  %v4024_v61 = vld [vmem:[#allocation4 + $0x80] sm:$0xff]  }
 0x24b   :  { %3878 = vmatprep.subr.bf16.mxu1 %v4004_v55  ;;  %v561_v5 = vpack.c.bf16 %v410_v4, %v407_v62 }
 0x24c   :  { %3880 = vmatprep.mubr.msk.bf16.mxu1 %vm438_vm9, %v413_v3  ;;  %vm5130_vm14 = vcmp.gt.s32.totalorder %v730_v56, 0  ;;  %vm752_vm1 = vcmp.lt.s32.totalorder %v730_v56, 7 }
 0x24e   :  { %3879 = vmatpush3.bf16.msra.mxu1 %v4004_v55  ;;  %v723_v55 = vand.u32 7, %v5022_v25 }
 0x24f   :  { %3884 = vmatprep.subr.bf16.mxu1 %v4005_v6 }
 0x250   :  { %vm5126_vm13 = vcmp.gt.s32.totalorder %v723_v55, 0  ;;  %vm751_vm0 = vcmp.lt.s32.totalorder %v723_v55, 7 }
 0x251   :  { %vm3489_vm15 = vmpackc.low %vm5130_vm14, %vm5126_vm13 }
 0x252   :  { %vm3500_vm2 = vmpackc.low %vm752_vm1, %vm751_vm0 }
 0x255   :  { %3881 = vmatmul.mubr.msk.bf16.vlgmr.msra.gmra.mrb[4].mxu1 %vm438_vm9, %v414_v2 }
 0x256   :  { %3888 = vmatprep.mubr.msk.bf16.mxu1 %vm438_vm9, %v561_v5  ;;  %3885 = vmatpush3.bf16.msra.mxu1 %v4005_v6 }
 0x257   :  { %3886 = vmatprep.subr.bf16.mxu1 %v4006_v7 }
 0x25a   :  { %3887 = vmatpush3.bf16.msra.mxu1 %v4006_v7 }
 0x25b   :  { %3920 = vmatprep.subr.bf16.mxu1 %v4694_v1 }
 0x261   :  { %3889 = vmatmul.mubr.msk.bf16.vlgmr.msra.gmra.mrb[4].mxu1 %vm438_vm9, %v562_v60 }
 0x262   :  { %3936 = vmatprep.mubr.msk.bf16.mxu1 %vm4695_vm12, %v4694_v1  ;;  %3921 = vmatpush3.bf16.msra.mxu1 %v4010_v8 }
 0x263   :  { %3922 = vmatprep.subr.bf16.mxu1 %v4694_v1 }
 0x266   :  { %3923 = vmatpush3.bf16.msra.mxu1 %v4012_v9 }
 0x267   :  { %3924 = vmatprep.subr.bf16.mxu1 %v4694_v1 }
 0x26a   :  { %3925 = vmatpush3.bf16.msra.mxu1 %v4014_v10 }
 0x26b   :  { %3926 = vmatprep.subr.bf16.mxu1 %v4694_v1 }
 0x26e   :  { %3927 = vmatpush3.bf16.msra.mxu1 %v4016_v11 }
 0x26f   :  { %3928 = vmatprep.subr.bf16.mxu1 %v4694_v1 }
 0x272   :  { %3929 = vmatpush3.bf16.msra.mxu1 %v4018_v13  ;;  %v4025_v13 = vld [vmem:[#allocation4 + $0x88] sm:$0xff]  }
 0x273   :  { %3930 = vmatprep.subr.bf16.mxu1 %v4694_v1 }
 0x276   :  { %3931 = vmatpush3.bf16.msra.mxu1 %v4020_v14  ;;  %v4026_v14 = vld [vmem:[#allocation4 + $0x90] sm:$0xff]  }
 0x277   :  { %3932 = vmatprep.subr.bf16.mxu1 %v4694_v1 }
 0x27a   :  { %3933 = vmatpush3.bf16.msra.mxu1 %v4022_v53 }
 0x27b   :  { %3934 = vmatprep.subr.bf16.mxu1 %v4694_v1 }
 0x27e   :  { %3935 = vmatpush3.bf16.msra.mxu1 %v4023_v54 }
 0x334   :  { %v3890_v16 = vpop.f32.mrb[4].mxu1 }
 0x335   :  { %v648_v17 = vadd.f32 %v3890_v16, %v3470_v15  ;;  %v620_v18 = vpop.f32.mrb[5].mxu1  ;;  %v4028_v16 = vld [vmem:[#allocation4 + $0xa0] sm:$0xff]  }
 0x336   :  { %v646_v19 = vadd.f32 %v3470_v15, %v620_v18  ;;  %v3891_v20 = vpop.f32.mrb[6].mxu1  ;;  %v4030_v18 = vld [vmem:[#allocation4 + $0xb0] sm:$0xff]  }
 0x337   :  { %v652_v21 = vmax.f32 %v648_v17, 0.0  ;;  %v649_v22 = vadd.f32 %v3891_v20, %v3470_v15  ;;  %v623_v23 = vpop.f32.mrb[7].mxu1  ;;  %v4029_v17 = vld [vmem:[#allocation4 + $0xa8] sm:$0xff]   ;;  %v4032_v20 = vld [vmem:[%s6090_s7] sm:$0xff]  }
 0x338   :  { %v650_v24 = vmax.f32 %v646_v19, 0.0  ;;  %v647_v26 = vadd.f32 %v3470_v15, %v623_v23  ;;  %v4027_v15 = vld [vmem:[#allocation4 + $0x98] sm:$0xff]  }
 0x339   :  { %v653_v27 = vmax.f32 %v649_v22, 0.0  ;;  %v656_v31 = vrot.slane %v652_v21, 1  ;;  %v4031_v19 = vld [vmem:[#allocation4 + $0xb8] sm:$0xff]   ;;  %v5161_v22 = vld [vmem:[#allocation7] ss:$8 sps:$4 sm:$0xff]  }
 0x33a   :  { %v654_v29 = vrot.slane %v650_v24, 1  ;;  %v651_v30 = vmax.f32 %v647_v26, 0.0  ;;  %v5163_v23 = vld [vmem:[#allocation7 + $0x14] ss:$8 sps:$4 sm:$0xff]   ;;  %v5173_v26 = vld [vmem:[#allocation7 + $0x20] ss:$8 sps:$4 sm:$0xff]  }
 0x33b   :  { %v657_v32 = vrot.slane %v653_v27, 1 }
 0x33c   :  { %v655_v33 = vrot.slane %v651_v30, 1 }
 0x33d   :  { %v661_v34 = vsel %vm404_vm7, %v657_v32, %v654_v29  ;;  %v658_v35 = vsel %vm404_vm7, %v656_v31, %v657_v32  ;;  %v5188_v32 = vld [vmem:[#allocation7 + $0x54] ss:$8 sps:$4 sm:$0xff]  }
 0x33e   :  { %v665_v36 = vmax.f32 %v653_v27, %v661_v34  ;;  %v659_v37 = vsel %vm404_vm7, %v655_v33, %v656_v31  ;;  %v660_v38 = vsel %vm404_vm7, %v654_v29, %v655_v33  ;;  %v664_v39 = vmax.f32 %v652_v21, %v658_v35  ;;  %v5159_v21 = vld [vmem:[#allocation7 + $0x4] ss:$8 sps:$4 sm:$0xff]   ;;  %v5176_v27 = vld [vmem:[#allocation7 + $0x34] ss:$8 sps:$4 sm:$0xff]   ;;  %v5179_v29 = vld [vmem:[#allocation7 + $0x30] ss:$8 sps:$4 sm:$0xff]  }
 0x33f   :  { %v663_v40 = vmax.f32 %v651_v30, %v659_v37  ;;  %v662_v41 = vmax.f32 %v650_v24, %v660_v38  ;;  %v5170_v24 = vld [vmem:[#allocation7 + $0x24] ss:$8 sps:$4 sm:$0xff]   ;;  %v5185_v31 = vld [vmem:[#allocation7 + $0x40] ss:$8 sps:$4 sm:$0xff]   ;;  %v5191_v33 = vld [vmem:[#allocation7 + $0x50] ss:$8 sps:$4 sm:$0xff]  }
 0x340   :  { %v669_v42 = vpack.c.bf16 %v665_v36, %v664_v39  ;;  %v5182_v30 = vld [vmem:[#allocation7 + $0x44] ss:$8 sps:$4 sm:$0xff]   ;;  %v5197_v35 = vld [vmem:[#allocation7 + $0x60] ss:$8 sps:$4 sm:$0xff]   ;;  %v5200_v36 = vld [vmem:[#allocation7 + $0x74] ss:$8 sps:$4 sm:$0xff]  }
 0x341   :  { %v668_v43 = vpack.c.bf16 %v663_v40, %v662_v41  ;;  %v5194_v34 = vld [vmem:[#allocation7 + $0x64] ss:$8 sps:$4 sm:$0xff]   ;;  %v5203_v37 = vld [vmem:[#allocation7 + $0x70] ss:$8 sps:$4 sm:$0xff]   ;;  %v5209_v39 = vld [vmem:[#allocation7 + $0x80] ss:$8 sps:$4 sm:$0xff]  }
 0x342   :  { %v5206_v38 = vld [vmem:[#allocation7 + $0x84] ss:$8 sps:$4 sm:$0xff]   ;;  %v5212_v40 = vld [vmem:[#allocation7 + $0x94] ss:$8 sps:$4 sm:$0xff]   ;;  %v5215_v41 = vld [vmem:[#allocation7 + $0x90] ss:$8 sps:$4 sm:$0xff]  }
 0x343   :  { %3893 = vmatpush3.bf16.msra.mxu0 %v668_v43  ;;  %v5221_v43 = vld [vmem:[#allocation7 + $0xa0] ss:$8 sps:$4 sm:$0xff]  }
 0x344   :  { %3894 = vmatprep.subr.bf16.mxu0 %v4694_v1 }
 0x347   :  { %3895 = vmatpush3.bf16.msra.mxu0 %v669_v42  ;;  %v5218_v42 = vld [vmem:[#allocation7 + $0xa4] ss:$8 sps:$4 sm:$0xff]  }
 0x348   :  { %3900 = vmatprep.subr.bf16.mxu0 %v4694_v1 }
 0x34a   :  { %3897 = vmatmul.mubr.msk.bf16.vlgmr.msra.gmra.mrb[0].mxu0 %vm438_vm9, %v4007_v44  ;;  %v5224_v44 = vld [vmem:[#allocation7 + $0xb4] ss:$8 sps:$4 sm:$0xff]  }
 0x34b   :  { %3901 = vmatpush3.bf16.msra.mxu0 %v4008_v45  ;;  %3916 = vmatprep.mubr.msk.bf16.mxu0 %vm4695_vm12, %v4694_v1  ;;  %v5227_v45 = vld [vmem:[#allocation7 + $0xb0] ss:$8 sps:$4 sm:$0xff]  }
 0x34c   :  { %3902 = vmatprep.subr.bf16.mxu0 %v4694_v1 }
 0x34f   :  { %3903 = vmatpush3.bf16.msra.mxu0 %v4009_v46  ;;  %v5230_v46 = vld [vmem:[#allocation7 + $0xc4] ss:$8 sps:$4 sm:$0xff]  }
 0x350   :  { %3904 = vmatprep.subr.bf16.mxu0 %v4694_v1 }
 0x353   :  { %3905 = vmatpush3.bf16.msra.mxu0 %v4011_v47  ;;  %v5233_v47 = vld [vmem:[#allocation7 + $0xc0] ss:$8 sps:$4 sm:$0xff]  }
 0x354   :  { %3906 = vmatprep.subr.bf16.mxu0 %v4694_v1 }
 0x357   :  { %3907 = vmatpush3.bf16.msra.mxu0 %v4013_v48  ;;  %v5236_v48 = vld [vmem:[#allocation7 + $0xd4] ss:$8 sps:$4 sm:$0xff]  }
 0x358   :  { %3908 = vmatprep.subr.bf16.mxu0 %v4694_v1 }
 0x35b   :  { %3909 = vmatpush3.bf16.msra.mxu0 %v4015_v49  ;;  %v5239_v49 = vld [vmem:[#allocation7 + $0xd0] ss:$8 sps:$4 sm:$0xff]  }
 0x35c   :  { %3910 = vmatprep.subr.bf16.mxu0 %v4694_v1 }
 0x35f   :  { %3911 = vmatpush3.bf16.msra.mxu0 %v4017_v50 }
 0x360   :  { %3912 = vmatprep.subr.bf16.mxu0 %v4694_v1 }
 0x363   :  { %3913 = vmatpush3.bf16.msra.mxu0 %v4019_v51 }
 0x364   :  { %3914 = vmatprep.subr.bf16.mxu0 %v4694_v1 }
 0x367   :  { %3915 = vmatpush3.bf16.msra.mxu0 %v4021_v52 }
 0x368   :  { %3940 = vmatprep.subr.bf16.mxu0 %v4694_v1 }
 0x41d   :  { %v712_v57 = vpop.f32.mrb[0].mxu0 }
 0x41e   :  { %v3898_v58 = vpop.f32.mrb[1].mxu0  ;;  %v745_v59 = vrot.slane %v712_v57, 7  ;;  %v753_v2 = vrot.slane %v712_v57, 1 }
 0x41f   :  { %v715_v60 = vpop.f32.mrb[2].mxu0 }
 0x420   :  { %v746_v3 = vrot.slane %v715_v60, 7  ;;  %v754_v4 = vrot.slane %v715_v60, 1  ;;  %v776_v5 = vpack.c.bf16 %v715_v60, %v712_v57  ;;  %v3899_v6 = vpop.f32.mrb[3].mxu0 }
 0x422   :  { %v747_v28 = vsel %vm387_vm5, %v745_v59, %v746_v3  ;;  %v748_v7 = vsel %vm387_vm5, %v746_v3, %v745_v59  ;;  %v755_v8 = vsel %vm404_vm7, %v753_v2, %v754_v4  ;;  %v756_v9 = vsel %vm404_vm7, %v754_v4, %v753_v2  ;;  %3917 = vmatmul.mubr.bf16.vlgmr.msra.gmra.mrb[4].mxu0 %v776_v5  ;;  %vm5423_vm5 = vmpackc.low %vm1169_vm4, %vm1169_vm4 }
 0x423   :  { %v3490_v10 = vpack.c.bf16 %v747_v28, %v748_v7  ;;  %v3501_v11 = vpack.c.bf16 %v756_v9, %v755_v8  ;;  %3941 = vmatpush3.bf16.msra.mxu0 %v4024_v61  ;;  %3956 = vmatprep.mubr.msk.bf16.mxu0 %vm4695_vm12, %v4694_v1  ;;  %v3503_v61 = vld [vmem:[#allocation6] ss:$0 sm:$0xff] }
 0x424   :  { %3942 = vmatprep.subr.bf16.mxu0 %v4694_v1 }
 0x425   :  { %3937 = vmatmul.mubr.msk.bf16.vlgmr.msra.gmra.mrb[8].mxu1 %vm3489_vm15, %v3490_v10 }
 0x426   :  { %3962 = vmatprep.mubr.msk.bf16.mxu1 %vm1113_vm3, %v4032_v20  ;;  %v4061_v20 = vld [vmem:[%s6091_s8 + $0x10] ss:$8 sps:$4 sm:$0xff]  }
 0x427   :  { %3943 = vmatpush3.bf16.msra.mxu0 %v4025_v13 }
 0x428   :  { %3944 = vmatprep.subr.bf16.mxu0 %v4694_v1 }
 0x42b   :  { %3945 = vmatpush3.bf16.msra.mxu0 %v4026_v14 }
 0x42c   :  { %3946 = vmatprep.subr.bf16.mxu0 %v4694_v1 }
 0x42f   :  { %3947 = vmatpush3.bf16.msra.mxu0 %v4027_v15 }
 0x430   :  { %3948 = vmatprep.subr.bf16.mxu0 %v4694_v1 }
 0x433   :  { %3949 = vmatpush3.bf16.msra.mxu0 %v4028_v16  ;;  %v4057_v16 = vld [vmem:[%s6091_s8 + $0x4] ss:$8 sps:$4 sm:$0xff]  }
 0x434   :  { %3950 = vmatprep.subr.bf16.mxu0 %v4694_v1 }
 0x437   :  { %3951 = vmatpush3.bf16.msra.mxu0 %v4029_v17  ;;  %v4033_v17 = vld [vmem:[%s6090_s7 + $0x8] sm:$0xff]   ;;  %s4698_s7 = smov 96  }
 0x438   :  { %3952 = vmatprep.subr.bf16.mxu0 %v4694_v1 }
 0x43b   :  { %3953 = vmatpush3.bf16.msra.mxu0 %v4030_v18  ;;  %v4055_v18 = vld [vmem:[%s6091_s8] ss:$8 sps:$4 sm:$0xff]  }
 0x43c   :  { %3954 = vmatprep.subr.bf16.mxu0 %v4694_v1  ;;  %v5167_v1 = vld [vmem:[#allocation7 + $0x10] ss:$8 sps:$4 sm:$0xff]  }
 0x43f   :  { %3955 = vmatpush3.bf16.msra.mxu0 %v4031_v19  ;;  %v4063_v19 = vld [vmem:[%s6091_s8 + $0x14] ss:$8 sps:$4 sm:$0xff]  }
 0x440   :  { %1526 = vmatprep.subr.bf16.mxu0 %v5159_v21 }
 0x442   :  { %3957 = vmatmul.mubr.msk.bf16.vlgmr.msra.gmra.mrb[8].mxu0 %vm3500_vm2, %v3501_v11 }
 0x443   :  { %1527 = vmatpush1.bf16.msra.mxu0 %v5161_v22 }
 0x444   :  { %1528 = vmatprep.subr.bf16.mxu0 %v5163_v23 }
 0x447   :  { %1529 = vmatpush1.bf16.msra.mxu0 %v5167_v1 }
 0x448   :  { %1530 = vmatprep.subr.bf16.mxu0 %v5170_v24 }
 0x44b   :  { %1531 = vmatpush1.bf16.msra.mxu0 %v5173_v26 }
 0x44c   :  { %1532 = vmatprep.subr.bf16.mxu0 %v5176_v27 }
 0x44f   :  { %1533 = vmatpush1.bf16.msra.mxu0 %v5179_v29 }
 0x450   :  { %1534 = vmatprep.subr.bf16.mxu0 %v5182_v30 }
 0x453   :  { %1535 = vmatpush1.bf16.msra.mxu0 %v5185_v31 }
 0x454   :  { %1536 = vmatprep.subr.bf16.mxu0 %v5188_v32 }
 0x457   :  { %1537 = vmatpush1.bf16.msra.mxu0 %v5191_v33 }
 0x458   :  { %1538 = vmatprep.subr.bf16.mxu0 %v5194_v34 }
 0x45b   :  { %1539 = vmatpush1.bf16.msra.mxu0 %v5197_v35 }
 0x45c   :  { %1540 = vmatprep.subr.bf16.mxu0 %v5200_v36 }
 0x45f   :  { %1541 = vmatpush1.bf16.msra.mxu0 %v5203_v37 }
 0x460   :  { %1542 = vmatprep.subr.bf16.mxu0 %v5206_v38 }
 0x463   :  { %1543 = vmatpush1.bf16.msra.mxu0 %v5209_v39 }
 0x464   :  { %1544 = vmatprep.subr.bf16.mxu0 %v5212_v40 }
 0x467   :  { %1545 = vmatpush1.bf16.msra.mxu0 %v5215_v41 }
 0x468   :  { %1546 = vmatprep.subr.bf16.mxu0 %v5218_v42 }
 0x46b   :  { %1547 = vmatpush1.bf16.msra.mxu0 %v5221_v43 }
 0x46c   :  { %1548 = vmatprep.subr.bf16.mxu0 %v5224_v44 }
 0x46f   :  { %1549 = vmatpush1.bf16.msra.mxu0 %v5227_v45 }
 0x470   :  { %1550 = vmatprep.subr.bf16.mxu0 %v5230_v46 }
 0x473   :  { %1551 = vmatpush1.bf16.msra.mxu0 %v5233_v47 }
 0x474   :  { %1552 = vmatprep.subr.bf16.mxu0 %v5236_v48 }
 0x477   :  { %1553 = vmatpush1.bf16.msra.mxu0 %v5239_v49 }
 0x4f5   :  { %v876_v50 = vpop.f32.mrb[4].mxu0 }
 0x4f6   :  { %v3918_v51 = vpop.f32.mrb[5].mxu0 }
 0x4f7   :  { %v879_v52 = vpop.f32.mrb[6].mxu0  ;;  %v4067_v51 = vld [vmem:[%s6091_s8 + $0x20] ss:$8 sps:$4 sm:$0xff]  }
 0x4f8   :  { %v3919_v53 = vpop.f32.mrb[7].mxu0  ;;  %v965_v54 = vpop.f32.mrb[8].mxu1 }
 0x4f9   :  { %v966_v55 = vadd.f32 %v965_v54, %v876_v50  ;;  %v3938_v56 = vpop.f32.mrb[9].mxu1  ;;  %v4069_v50 = vld [vmem:[%s6091_s8 + $0x24] ss:$8 sps:$4 sm:$0xff]   ;;  %v4073_v53 = vld [vmem:[%s6091_s8 + $0x30] ss:$8 sps:$4 sm:$0xff]  }
 0x4fa   :  { %v968_v57 = vpop.f32.mrb[10].mxu1  ;;  %v4081_v54 = vld [vmem:[%s6091_s8 + $0x44] ss:$8 sps:$4 sm:$0xff]   ;;  %v4087_v56 = vld [vmem:[%s6091_s8 + $0x54] ss:$8 sps:$4 sm:$0xff]  }
 0x4fb   :  { %v969_v58 = vadd.f32 %v968_v57, %v879_v52  ;;  %v3939_v59 = vpop.f32.mrb[11].mxu1  ;;  %v4075_v52 = vld [vmem:[%s6091_s8 + $0x34] ss:$8 sps:$4 sm:$0xff]   ;;  %v4085_v57 = vld [vmem:[%s6091_s8 + $0x50] ss:$8 sps:$4 sm:$0xff]  }
 0x4fc   :  { %v4091_v59 = vld [vmem:[%s6091_s8 + $0x60] ss:$8 sps:$4 sm:$0xff]  }
 0x515   :  { %v1072_v60 = vpop.f32.mrb[8].mxu0 }
 0x516   :  { %v1079_v62 = vadd.f32 %v1072_v60, %v966_v55  ;;  %v3958_v63 = vpop.f32.mrb[9].mxu0  ;;  %v4079_v55 = vld [vmem:[%s6091_s8 + $0x40] ss:$8 sps:$4 sm:$0xff]  }
 0x517   :  { %v1075_v2 = vpop.f32.mrb[10].mxu0  ;;  %v5294_v60 = vld [vmem:[#allocation7 + $0xe4] ss:$8 sps:$4 sm:$0xff]  }
 0x518   :  { %v1088_v3 = vadd.f32 %v3503_v61, %v1079_v62  ;;  %v1080_v4 = vadd.f32 %v1075_v2, %v969_v58  ;;  %v3959_v5 = vpop.f32.mrb[11].mxu0  ;;  %v4093_v58 = vld [vmem:[%s6091_s8 + $0x64] ss:$8 sps:$4 sm:$0xff]   ;;  %v4099_v62 = vld [vmem:[%s6091_s8 + $0x74] ss:$8 sps:$4 sm:$0xff]   ;;  %1554 = vmatprep.subr.bf16.mxu0 %v5294_v60 }
 0x519   :  { %v4097_v63 = vld [vmem:[%s6091_s8 + $0x70] ss:$8 sps:$4 sm:$0xff]  }
 0x51a   :  { %v1090_v6 = vmax.f32 %v1088_v3, 0.0  ;;  %v1089_v28 = vadd.f32 %v3503_v61, %v1080_v4  ;;  %v5296_v61 = vld [vmem:[#allocation7 + $0xe0] ss:$8 sps:$4 sm:$0xff]   ;;  %v5306_v2 = vld [vmem:[#allocation7 + $0xf4] ss:$8 sps:$4 sm:$0xff]   ;;  %v4696_v4 = vmov 0.0|0.0  }
 0x51b   :  { %1555 = vmatpush1.bf16.msra.mxu0 %v5296_v61  ;;  %v5308_v3 = vld [vmem:[#allocation7 + $0xf0] ss:$8 sps:$4 sm:$0xff]   ;;  %1558 = vmatprep.mubr.bf16.mxu0 %v4696_v4 }
 0x51c   :  { %v1091_v7 = vmax.f32 %v1089_v28, 0.0  ;;  %v1092_v8 = vrot.slane %v1090_v6, 1  ;;  %1556 = vmatprep.subr.bf16.mxu0 %v5306_v2 }
 0x51e   :  { %v1093_v9 = vrot.slane %v1091_v7, 1 }
 0x51f   :  { %1557 = vmatpush1.bf16.msra.mxu0 %v5308_v3 }
 0x520   :  { %v1095_v10 = vsel %vm404_vm7, %v1093_v9, %v1092_v8  ;;  %v1094_v11 = vsel %vm404_vm7, %v1092_v8, %v1093_v9  ;;  %1696 = vmatprep.subr.bf16.mxu0 %v5159_v21 }
 0x521   :  { %v1097_v13 = vmax.f32 %v1091_v7, %v1095_v10  ;;  %v1096_v14 = vmax.f32 %v1090_v6, %v1094_v11 }
 0x522   :  { %1559 = vmatmul.mubr.bf16.vlgmr.msra.gmra.mrb[12].mxu0 %v4696_v4 }
 0x523   :  { %v1102_v15 = vpack.c.bf16 %v1097_v13, %v1096_v14  ;;  %1697 = vmatpush1.bf16.msra.mxu0 %v5161_v22  ;;  %v5381_v14 = vsub.s32 0, %v5022_v25 }
 0x524   :  { %1698 = vmatprep.subr.bf16.mxu0 %v5163_v23 }
 0x525   :  { %3960 = vmatprep.subr.bf16.mxu1 %v1102_v15  ;;  %6145 = vst [vmem:[#allocation25_spill] sm:$0xff] %v5381_v14 }
 0x526   :  { %3961 = vmatpush3.bf16.msra.mxu1 %v1102_v15  ;;  %v1188_v15 = vld [vmem:[%s6092_s9] sm:$0x3]  ;;  %s4697_s9 = smov 32  }
 0x527   :  { %1280 = vmatprep.subr.bf16.mxu1 %v4057_v16  ;;  %1699 = vmatpush1.bf16.msra.mxu0 %v5167_v1  ;;  %v5387_v16 = vsub.s32 1, %v5022_v25 }
 0x528   :  { %1700 = vmatprep.subr.bf16.mxu0 %v5170_v24 }
 0x529   :  { %3963 = vmatmul.mubr.msk.bf16.vlgmr.msra.gmra.mrb[12].mxu1 %vm1113_vm3, %v4033_v17  ;;  %6146 = vst [vmem:[#allocation26_spill] sm:$0xff] %v5387_v16  ;;  %v1193_v17 = vrot.slane %v1188_v15, %v5381_v14 }
 0x52a   :  { %1281 = vmatpush1.bf16.msra.mxu1 %v4055_v18  ;;  %1312 = vmatprep.mubr.bf16.mxu1 %v4693_v0  ;;  %v1197_v18 = vrot.slane %v1188_v15, %v5387_v16 }
 0x52b   :  { %1282 = vmatprep.subr.bf16.mxu1 %v4063_v19  ;;  %1701 = vmatpush1.bf16.msra.mxu0 %v5173_v26 }
 0x52c   :  { %1702 = vmatprep.subr.bf16.mxu0 %v5176_v27 }
 0x52e   :  { %1283 = vmatpush1.bf16.msra.mxu1 %v4061_v20 }
 0x52f   :  { %1284 = vmatprep.subr.bf16.mxu1 %v4069_v50  ;;  %1703 = vmatpush1.bf16.msra.mxu0 %v5179_v29 }
 0x530   :  { %1704 = vmatprep.subr.bf16.mxu0 %v5182_v30 }
 0x532   :  { %1285 = vmatpush1.bf16.msra.mxu1 %v4067_v51 }
 0x533   :  { %1286 = vmatprep.subr.bf16.mxu1 %v4075_v52  ;;  %1705 = vmatpush1.bf16.msra.mxu0 %v5185_v31 }
 0x534   :  { %1706 = vmatprep.subr.bf16.mxu0 %v5188_v32 }
 0x536   :  { %1287 = vmatpush1.bf16.msra.mxu1 %v4073_v53 }
 0x537   :  { %1288 = vmatprep.subr.bf16.mxu1 %v4081_v54  ;;  %1707 = vmatpush1.bf16.msra.mxu0 %v5191_v33 }
 0x538   :  { %1708 = vmatprep.subr.bf16.mxu0 %v5194_v34 }
 0x53a   :  { %1289 = vmatpush1.bf16.msra.mxu1 %v4079_v55 }
 0x53b   :  { %1290 = vmatprep.subr.bf16.mxu1 %v4087_v56  ;;  %1709 = vmatpush1.bf16.msra.mxu0 %v5197_v35 }
 0x53c   :  { %1710 = vmatprep.subr.bf16.mxu0 %v5200_v36 }
 0x53e   :  { %1291 = vmatpush1.bf16.msra.mxu1 %v4085_v57 }
 0x53f   :  { %1292 = vmatprep.subr.bf16.mxu1 %v4093_v58  ;;  %1711 = vmatpush1.bf16.msra.mxu0 %v5203_v37 }
 0x540   :  { %1712 = vmatprep.subr.bf16.mxu0 %v5206_v38 }
 0x542   :  { %1293 = vmatpush1.bf16.msra.mxu1 %v4091_v59 }
 0x543   :  { %1294 = vmatprep.subr.bf16.mxu1 %v4099_v62  ;;  %1713 = vmatpush1.bf16.msra.mxu0 %v5209_v39 }
 0x544   :  { %1714 = vmatprep.subr.bf16.mxu0 %v5212_v40 }
 0x546   :  { %1295 = vmatpush1.bf16.msra.mxu1 %v4097_v63 }
 0x547   :  { %1611 = vmatprep.subr.bf16.mxu1 %v5159_v21  ;;  %1715 = vmatpush1.bf16.msra.mxu0 %v5215_v41 }
 0x548   :  { %1716 = vmatprep.subr.bf16.mxu0 %v5218_v42 }
 0x54b   :  { %1717 = vmatpush1.bf16.msra.mxu0 %v5221_v43 }
 0x54c   :  { %1718 = vmatprep.subr.bf16.mxu0 %v5224_v44 }
 0x54f   :  { %1719 = vmatpush1.bf16.msra.mxu0 %v5227_v45 }
 0x550   :  { %1720 = vmatprep.subr.bf16.mxu0 %v5230_v46 }
 0x553   :  { %1721 = vmatpush1.bf16.msra.mxu0 %v5233_v47 }
 0x554   :  { %1722 = vmatprep.subr.bf16.mxu0 %v5236_v48 }
 0x557   :  { %1723 = vmatpush1.bf16.msra.mxu0 %v5239_v49 }
 0x558   :  { %1724 = vmatprep.subr.bf16.mxu0 %v5294_v60 }
 0x55b   :  { %1725 = vmatpush1.bf16.msra.mxu0 %v5296_v61 }
 0x55c   :  { %1726 = vmatprep.subr.bf16.mxu0 %v5306_v2 }
 0x55f   :  { %1727 = vmatpush1.bf16.msra.mxu0 %v5308_v3 }
 0x5fc   :  { %v3964_v5 = vpop.f32.mrb[12].mxu1 }
 0x5fd   :  { %v1154_v6 = vpop.f32.mrb[13].mxu1 }
 0x5fe   :  { %v3965_v28 = vpop.f32.mrb[14].mxu1 }
 0x5ff   :  { %v1171_v7 = vpack.c.bf16 %v3965_v28, %v3964_v5  ;;  %v1157_v8 = vpop.f32.mrb[15].mxu1 }
 0x600   :  { %v1170_v9 = vpack.c.bf16 %v1157_v8, %v1154_v6 }
 0x602   :  { %1313 = vmatmul.mubr.bf16.vlgmr.msra.gmra.mrb[16].mxu1 %v1170_v9 }
 0x603   :  { %1322 = vmatprep.mubr.bf16.mxu1 %v4693_v0  ;;  %1612 = vmatpush1.bf16.msra.mxu1 %v5161_v22  ;;  %v1560_v0 = vpop.f32.mrb[12].mxu0 }
 0x604   :  { %1613 = vmatprep.subr.bf16.mxu1 %v5163_v23  ;;  %v1562_v10 = vpop.f32.mrb[13].mxu0 }
 0x605   :  { %v1564_v11 = vpop.f32.mrb[14].mxu0 }
 0x606   :  { %v1565_v13 = vpop.f32.mrb[15].mxu0 }
 0x607   :  { %1614 = vmatpush1.bf16.msra.mxu1 %v5167_v1 }
 0x608   :  { %1615 = vmatprep.subr.bf16.mxu1 %v5170_v24 }
 0x60a   :  { %1323 = vmatmul.mubr.bf16.gmra.mrb[20].mxu1 %v1171_v7 }
 0x60b   :  { %1616 = vmatpush1.bf16.msra.mxu1 %v5173_v26 }
 0x60c   :  { %1617 = vmatprep.subr.bf16.mxu1 %v5176_v27 }
 0x60f   :  { %1618 = vmatpush1.bf16.msra.mxu1 %v5179_v29 }
 0x610   :  { %1619 = vmatprep.subr.bf16.mxu1 %v5182_v30 }
 0x613   :  { %1620 = vmatpush1.bf16.msra.mxu1 %v5185_v31 }
 0x614   :  { %1621 = vmatprep.subr.bf16.mxu1 %v5188_v32 }
 0x617   :  { %1622 = vmatpush1.bf16.msra.mxu1 %v5191_v33 }
 0x618   :  { %1623 = vmatprep.subr.bf16.mxu1 %v5194_v34 }
 0x61b   :  { %1624 = vmatpush1.bf16.msra.mxu1 %v5197_v35 }
 0x61c   :  { %1625 = vmatprep.subr.bf16.mxu1 %v5200_v36 }
 0x61f   :  { %1626 = vmatpush1.bf16.msra.mxu1 %v5203_v37 }
 0x620   :  { %1627 = vmatprep.subr.bf16.mxu1 %v5206_v38 }
 0x623   :  { %1628 = vmatpush1.bf16.msra.mxu1 %v5209_v39 }
 0x624   :  { %1629 = vmatprep.subr.bf16.mxu1 %v5212_v40 }
 0x627   :  { %1630 = vmatpush1.bf16.msra.mxu1 %v5215_v41 }
 0x628   :  { %1631 = vmatprep.subr.bf16.mxu1 %v5218_v42 }
 0x62b   :  { %1632 = vmatpush1.bf16.msra.mxu1 %v5221_v43 }
 0x62c   :  { %1633 = vmatprep.subr.bf16.mxu1 %v5224_v44 }
 0x62f   :  { %1634 = vmatpush1.bf16.msra.mxu1 %v5227_v45 }
 0x630   :  { %1635 = vmatprep.subr.bf16.mxu1 %v5230_v46 }
 0x633   :  { %1636 = vmatpush1.bf16.msra.mxu1 %v5233_v47 }
 0x634   :  { %1637 = vmatprep.subr.bf16.mxu1 %v5236_v48 }
 0x637   :  { %1638 = vmatpush1.bf16.msra.mxu1 %v5239_v49 }
 0x638   :  { %1639 = vmatprep.subr.bf16.mxu1 %v5294_v60 }
 0x63b   :  { %1640 = vmatpush1.bf16.msra.mxu1 %v5296_v61 }
 0x63c   :  { %1641 = vmatprep.subr.bf16.mxu1 %v5306_v2 }
 0x63f   :  { %1642 = vmatpush1.bf16.msra.mxu1 %v5308_v3 }
 0x640   :  { %1781 = vmatprep.subr.bf16.mxu1 %v5159_v21 }
 0x6d5   :  { %v1314_v19 = vpop.f32.mrb[16].mxu1 }
 0x6d6   :  { %v1315_v21 = vadd.f32 %v1314_v19, %v1193_v17  ;;  %v1316_v20 = vpop.f32.mrb[17].mxu1 }
 0x6d7   :  { %v5391_v50 = vadd.f32 %v1316_v20, %v1197_v18  ;;  %v1318_v51 = vpop.f32.mrb[18].mxu1 }
 0x6d8   :  { %v5393_v52 = vadd.f32 %v1318_v51, %v1193_v17  ;;  %v1320_v53 = vpop.f32.mrb[19].mxu1  ;;  %v1567_v54 = vadd.f32 %v1560_v0, %v1315_v21 }
 0x6d9   :  { %v5395_v55 = vadd.f32 %v1320_v53, %v1197_v18 }
 0x6da   :  { %v3556_v56 = vmul.f32 -1.442695, %v1567_v54 }
 0x6dc   :  { %4314 = vpow2.f32 %v3556_v56 }
 0x6dd   :  { %v1324_v25 = vpop.f32.mrb[20].mxu1 }
 0x6de   :  { %v5397_v57 = vadd.f32 %v1324_v25, %v1193_v17  ;;  %v1326_v58 = vpop.f32.mrb[21].mxu1 }
 0x6df   :  { %v5399_v59 = vadd.f32 %v1326_v58, %v1197_v18  ;;  %v1328_v62 = vpop.f32.mrb[22].mxu1 }
 0x6e0   :  { %v5401_v63 = vadd.f32 %v1328_v62, %v1193_v17  ;;  %v1330_v5 = vpop.f32.mrb[23].mxu1 }
 0x6e1   :  { %v1331_v6 = vadd.f32 %v1330_v5, %v1197_v18 }
 0x6e3   :  { %v1568_v28 = vadd.f32 %v1562_v10, %v1331_v6 }
 0x6e5   :  { %v3557_v7 = vmul.f32 -1.442695, %v1568_v28  ;;  %4316 = vtanh.f32 %v1568_v28 }
 0x6e6   :  { %v4315_v8 = vpop.eup %4314 }
 0x6e7   :  { %4318 = vpow2.f32 %v3557_v7  ;;  %v1575_v9 = vadd.f32 1.0, %v4315_v8  ;;  %v4304_v8 = vld [vmem:[#allocation16 + $0x58] sm:$0xff]  }
 0x6e8   :  { %4320 = vtanh.f32 %v1567_v54 }
 0x6e9   :  { %4322 = vrcp.f32 %v1575_v9 }
 0x6ef   :  { %v4317_v0 = vpop.eup %4316 }
 0x6f0   :  { %1599 = vrot.lane.b32.xlu1 %v4317_v0, %s6127_s0 }
 0x6f1   :  { %v4319_v11 = vpop.eup %4318 }
 0x6f2   :  { %v1576_v13 = vadd.f32 1.0, %v4319_v11  ;;  %v4321_v15 = vpop.eup %4320 }
 0x6f3   :  { %v4323_v17 = vpop.eup %4322 }
 0x6f4   :  { %4324 = vrcp.f32 %v1576_v13  ;;  %1586 = vrot.lane.b32.xlu1 %v4321_v15, %s6127_s0 }
 0x6f8   :  { %1591 = vrot.lane.b32.xlu1 %v4323_v17, %s4697_s9 }
 0x6fe   :  { %v4325_v10 = vpop.eup %4324 }
 0x6ff   :  { %1596 = vrot.lane.b32.xlu0 %v4325_v10, %s4698_s7 }
 0x703   :  { %1583 = vrot.lane.b32.xlu0 %v4323_v17, %s4698_s7 }
 0x707   :  { %1604 = vrot.lane.b32.xlu0 %v4325_v10, %s4697_s9 }
 0x762   :  { %v1600_v18 = vpop.permute.xlu1 %1599 }
 0x763   :  { %v1601_v21 = vmul.f32 %v4325_v10, %v1600_v18 }
 0x766   :  { %v1587_v51 = vpop.permute.xlu1 %1586 }
 0x767   :  { %v1588_v56 = vmul.f32 %v4323_v17, %v1587_v51 }
 0x76a   :  { %v1592_v11 = vpop.permute.xlu1 %1591 }
 0x771   :  { %v1597_v19 = vpop.permute.xlu0 %1596 }
 0x772   :  { %v1598_v20 = vmul.f32 0.0, %v1597_v19 }
 0x774   :  { %v1602_v53 = vadd.f32 %v1601_v21, %v1598_v20 }
 0x775   :  { %v1584_v54 = vpop.permute.xlu0 %1583 }
 0x776   :  { %v5412_v25 = vsel %vm1169_vm4, %v1602_v53, 0.0  ;;  %v1585_v58 = vmul.f32 0.0, %v1584_v54 }
 0x777   :  { %4326 = vtanh.f32 %v5412_v25 }
 0x778   :  { %v1589_v62 = vadd.f32 %v1588_v56, %v1585_v58 }
 0x779   :  { %v1605_v28 = vpop.permute.xlu0 %1604 }
 0x77a   :  { %v5417_v5 = vsel %vm1169_vm4, %v1589_v62, 0.0 }
 0x77b   :  { %4328 = vtanh.f32 %v5417_v5 }
 0x781   :  { %v4327_v6 = vpop.eup %4326 }
 0x782   :  { %v1607_v7 = vmul.f32 %v4327_v6, %v1605_v28 }
 0x784   :  { %v5427_v9 = vpack.c.bf16 %v1607_v7, %v1607_v7 }
 0x785   :  { %v4329_v0 = vpop.eup %4328 }
 0x786   :  { %v1594_v13 = vmul.f32 %v4329_v0, %v1592_v11  ;;  %3560 = vmatprep.mubr.msk.bf16.mxu1 %vm5423_vm5, %v5427_v9  ;;  %v5512_v0 = vld [vmem:[#allocation9 + $0x4] ss:$8 sps:$4 sm:$0xff]   ;;  %v5517_v11 = vld [vmem:[#allocation9] ss:$8 sps:$4 sm:$0xff]  }
 0x787   :  { %2069 = vmatprep.subr.bf16.mxu0 %v5512_v0 }
 0x788   :  { %v5432_v15 = vpack.c.bf16 %v1594_v13, %v1594_v13  ;;  %v5521_v13 = vld [vmem:[#allocation9 + $0x14] ss:$8 sps:$4 sm:$0xff]  }
 0x78a   :  { %3563 = vmatmul.mubr.msk.bf16.vlgmr.msra.gmra.mrb[24].mxu1 %vm5423_vm5, %v5432_v15 }
 0x78b   :  { %1782 = vmatpush1.bf16.msra.mxu1 %v5161_v22 }
 0x78c   :  { %1783 = vmatprep.subr.bf16.mxu1 %v5163_v23 }
 0x78f   :  { %1784 = vmatpush1.bf16.msra.mxu1 %v5167_v1 }
 0x790   :  { %1785 = vmatprep.subr.bf16.mxu1 %v5170_v24 }
 0x793   :  { %1786 = vmatpush1.bf16.msra.mxu1 %v5173_v26 }
 0x794   :  { %1787 = vmatprep.subr.bf16.mxu1 %v5176_v27 }
 0x797   :  { %1788 = vmatpush1.bf16.msra.mxu1 %v5179_v29 }
 0x798   :  { %1789 = vmatprep.subr.bf16.mxu1 %v5182_v30 }
 0x79b   :  { %1790 = vmatpush1.bf16.msra.mxu1 %v5185_v31 }
 0x79c   :  { %1791 = vmatprep.subr.bf16.mxu1 %v5188_v32 }
 0x79f   :  { %1792 = vmatpush1.bf16.msra.mxu1 %v5191_v33 }
 0x7a0   :  { %1793 = vmatprep.subr.bf16.mxu1 %v5194_v34 }
 0x7a3   :  { %1794 = vmatpush1.bf16.msra.mxu1 %v5197_v35 }
 0x7a4   :  { %1795 = vmatprep.subr.bf16.mxu1 %v5200_v36 }
 0x7a7   :  { %1796 = vmatpush1.bf16.msra.mxu1 %v5203_v37 }
 0x7a8   :  { %1797 = vmatprep.subr.bf16.mxu1 %v5206_v38 }
 0x7ab   :  { %1798 = vmatpush1.bf16.msra.mxu1 %v5209_v39 }
 0x7ac   :  { %1799 = vmatprep.subr.bf16.mxu1 %v5212_v40 }
 0x7af   :  { %1800 = vmatpush1.bf16.msra.mxu1 %v5215_v41 }
 0x7b0   :  { %1801 = vmatprep.subr.bf16.mxu1 %v5218_v42 }
 0x7b3   :  { %1802 = vmatpush1.bf16.msra.mxu1 %v5221_v43 }
 0x7b4   :  { %1803 = vmatprep.subr.bf16.mxu1 %v5224_v44 }
 0x7b7   :  { %1804 = vmatpush1.bf16.msra.mxu1 %v5227_v45 }
 0x7b8   :  { %1805 = vmatprep.subr.bf16.mxu1 %v5230_v46 }
 0x7bb   :  { %1806 = vmatpush1.bf16.msra.mxu1 %v5233_v47 }
 0x7bc   :  { %1807 = vmatprep.subr.bf16.mxu1 %v5236_v48 }
 0x7bf   :  { %1808 = vmatpush1.bf16.msra.mxu1 %v5239_v49 }
 0x7c0   :  { %1809 = vmatprep.subr.bf16.mxu1 %v5294_v60 }
 0x7c3   :  { %1810 = vmatpush1.bf16.msra.mxu1 %v5296_v61 }
 0x7c4   :  { %1811 = vmatprep.subr.bf16.mxu1 %v5306_v2 }
 0x7c7   :  { %1812 = vmatpush1.bf16.msra.mxu1 %v5308_v3 }
 0x7c8   :  { %2109 = vmatprep.subr.bf16.mxu1 %v5512_v0 }
 0x85d   :  { %v1645_v22 = vpop.f32.mrb[24].mxu1 }
 0x85e   :  { %v1652_v23 = vadd.f32 %v1645_v22, %v5393_v52  ;;  %v1647_v1 = vpop.f32.mrb[25].mxu1  ;;  %v5523_v22 = vld [vmem:[#allocation9 + $0x10] ss:$8 sps:$4 sm:$0xff]  }
 0x85f   :  { %v1653_v24 = vadd.f32 %v1647_v1, %v5399_v59  ;;  %v1649_v26 = vpop.f32.mrb[26].mxu1  ;;  %v5529_v1 = vld [vmem:[#allocation9 + $0x20] ss:$8 sps:$4 sm:$0xff]  }
 0x860   :  { %v3564_v27 = vmul.f32 -1.442695, %v1652_v23  ;;  %v1650_v29 = vpop.f32.mrb[27].mxu1  ;;  %v5535_v26 = vld [vmem:[#allocation9 + $0x30] ss:$8 sps:$4 sm:$0xff]  }
 0x861   :  { %v3565_v30 = vmul.f32 -1.442695, %v1653_v24  ;;  %4330 = vtanh.f32 %v1653_v24  ;;  %v5533_v24 = vld [vmem:[#allocation9 + $0x34] ss:$8 sps:$4 sm:$0xff]   ;;  %v5541_v29 = vld [vmem:[#allocation9 + $0x40] ss:$8 sps:$4 sm:$0xff]  }
 0x862   :  { %4332 = vpow2.f32 %v3564_v27  ;;  %v5539_v27 = vld [vmem:[#allocation9 + $0x44] ss:$8 sps:$4 sm:$0xff]  }
 0x863   :  { %4334 = vpow2.f32 %v3565_v30  ;;  %v5545_v30 = vld [vmem:[#allocation9 + $0x54] ss:$8 sps:$4 sm:$0xff]  }
 0x864   :  { %4336 = vtanh.f32 %v1652_v23  ;;  %v5527_v23 = vld [vmem:[#allocation9 + $0x24] ss:$8 sps:$4 sm:$0xff]  }
 0x86b   :  { %v4331_v31 = vpop.eup %4330 }
 0x86c   :  { %v4333_v32 = vpop.eup %4332  ;;  %1684 = vrot.lane.b32.xlu1 %v4331_v31, %s6127_s0  ;;  %v5547_v31 = vld [vmem:[#allocation9 + $0x50] ss:$8 sps:$4 sm:$0xff]  }
 0x86d   :  { %v4335_v33 = vpop.eup %4334  ;;  %v1660_v34 = vadd.f32 1.0, %v4333_v32  ;;  %v5551_v32 = vld [vmem:[#allocation9 + $0x64] ss:$8 sps:$4 sm:$0xff]  }
 0x86e   :  { %v1661_v35 = vadd.f32 1.0, %v4335_v33  ;;  %v4337_v36 = vpop.eup %4336  ;;  %v5553_v33 = vld [vmem:[#allocation9 + $0x60] ss:$8 sps:$4 sm:$0xff]  }
 0x86f   :  { %4338 = vrcp.f32 %v1660_v34  ;;  %v5557_v34 = vld [vmem:[#allocation9 + $0x74] ss:$8 sps:$4 sm:$0xff]  }
 0x870   :  { %4340 = vrcp.f32 %v1661_v35  ;;  %1671 = vrot.lane.b32.xlu1 %v4337_v36, %s6127_s0  ;;  %v5559_v35 = vld [vmem:[#allocation9 + $0x70] ss:$8 sps:$4 sm:$0xff]   ;;  %v5563_v36 = vld [vmem:[#allocation9 + $0x84] ss:$8 sps:$4 sm:$0xff]  }
 0x879   :  { %v4339_v37 = vpop.eup %4338 }
 0x87a   :  { %v4341_v38 = vpop.eup %4340  ;;  %1676 = vrot.lane.b32.xlu1 %v4339_v37, %s4697_s9 }
 0x87b   :  { %1681 = vrot.lane.b32.xlu0 %v4341_v38, %s4698_s7 }
 0x87f   :  { %1668 = vrot.lane.b32.xlu0 %v4339_v37, %s4698_s7 }
 0x883   :  { %1689 = vrot.lane.b32.xlu0 %v4341_v38, %s4697_s9 }
 0x8de   :  { %v1685_v39 = vpop.permute.xlu1 %1684 }
 0x8df   :  { %v1686_v41 = vmul.f32 %v4341_v38, %v1685_v39  ;;  %v5569_v38 = vld [vmem:[#allocation9 + $0x94] ss:$8 sps:$4 sm:$0xff]   ;;  %v5571_v39 = vld [vmem:[#allocation9 + $0x90] ss:$8 sps:$4 sm:$0xff]  }
 0x8e2   :  { %v1672_v43 = vpop.permute.xlu1 %1671 }
 0x8e3   :  { %v1673_v46 = vmul.f32 %v4339_v37, %v1672_v43  ;;  %v5565_v37 = vld [vmem:[#allocation9 + $0x80] ss:$8 sps:$4 sm:$0xff]   ;;  %v5583_v43 = vld [vmem:[#allocation9 + $0xb0] ss:$8 sps:$4 sm:$0xff]  }
 0x8ec   :  { %v1677_v17 = vpop.permute.xlu1 %1676 }
 0x8ed   :  { %v1682_v40 = vpop.permute.xlu0 %1681 }
 0x8ee   :  { %v1683_v42 = vmul.f32 %v1682_v40, %v5412_v25  ;;  %v5575_v40 = vld [vmem:[#allocation9 + $0xa4] ss:$8 sps:$4 sm:$0xff]  }
 0x8f0   :  { %v1687_v44 = vadd.f32 %v1686_v41, %v1683_v42  ;;  %v5577_v41 = vld [vmem:[#allocation9 + $0xa0] ss:$8 sps:$4 sm:$0xff]   ;;  %v5581_v42 = vld [vmem:[#allocation9 + $0xb4] ss:$8 sps:$4 sm:$0xff]  }
 0x8f1   :  { %v1669_v45 = vpop.permute.xlu0 %1668 }
 0x8f2   :  { %v5479_v47 = vsel %vm1169_vm4, %v1687_v44, 0.0  ;;  %v1670_v48 = vmul.f32 %v1669_v45, %v5417_v5  ;;  %v5587_v44 = vld [vmem:[#allocation9 + $0xc4] ss:$8 sps:$4 sm:$0xff]   ;;  %v5589_v45 = vld [vmem:[#allocation9 + $0xc0] ss:$8 sps:$4 sm:$0xff]  }
 0x8f3   :  { %4342 = vtanh.f32 %v5479_v47 }
 0x8f4   :  { %v1674_v49 = vadd.f32 %v1673_v46, %v1670_v48  ;;  %v5593_v46 = vld [vmem:[#allocation9 + $0xd4] ss:$8 sps:$4 sm:$0xff]   ;;  %v5595_v48 = vld [vmem:[#allocation9 + $0xd0] ss:$8 sps:$4 sm:$0xff]  }
 0x8f5   :  { %v1690_v2 = vpop.permute.xlu0 %1689 }
 0x8f6   :  { %v5485_v60 = vsel %vm1169_vm4, %v1674_v49, 0.0  ;;  %v5599_v49 = vld [vmem:[#allocation9 + $0xe4] ss:$8 sps:$4 sm:$0xff]  }
 0x8f7   :  { %4344 = vtanh.f32 %v5485_v60 }
 0x8fd   :  { %v4343_v61 = vpop.eup %4342 }
 0x8fe   :  { %v1692_v3 = vmul.f32 %v4343_v61, %v1690_v2  ;;  %v5601_v61 = vld [vmem:[#allocation9 + $0xe0] ss:$8 sps:$4 sm:$0xff]   ;;  %v5605_v2 = vld [vmem:[#allocation9 + $0xf4] ss:$8 sps:$4 sm:$0xff]  }
 0x900   :  { %v5488_v52 = vpack.c.bf16 %v1692_v3, %v1692_v3  ;;  %v5607_v3 = vld [vmem:[#allocation9 + $0xf0] ss:$8 sps:$4 sm:$0xff]  }
 0x901   :  { %v4345_v59 = vpop.eup %4344 }
 0x902   :  { %3568 = vmatprep.mubr.msk.bf16.mxu0 %vm5423_vm5, %v5488_v52  ;;  %v1679_v10 = vmul.f32 %v4345_v59, %v1677_v17 }
 0x904   :  { %v5493_v18 = vpack.c.bf16 %v1679_v10, %v1679_v10 }
 0x906   :  { %3571 = vmatmul.mubr.msk.bf16.vlgmr.msra.gmra.mrb[16].mxu0 %vm5423_vm5, %v5493_v18 }
 0x907   :  { %2070 = vmatpush1.bf16.msra.mxu0 %v5517_v11 }
 0x908   :  { %2071 = vmatprep.subr.bf16.mxu0 %v5521_v13 }
 0x90b   :  { %2072 = vmatpush1.bf16.msra.mxu0 %v5523_v22 }
 0x90c   :  { %2073 = vmatprep.subr.bf16.mxu0 %v5527_v23 }
 0x90f   :  { %2074 = vmatpush1.bf16.msra.mxu0 %v5529_v1 }
 0x910   :  { %2075 = vmatprep.subr.bf16.mxu0 %v5533_v24 }
 0x913   :  { %2076 = vmatpush1.bf16.msra.mxu0 %v5535_v26 }
 0x914   :  { %2077 = vmatprep.subr.bf16.mxu0 %v5539_v27 }
 0x917   :  { %2078 = vmatpush1.bf16.msra.mxu0 %v5541_v29 }
 0x918   :  { %2079 = vmatprep.subr.bf16.mxu0 %v5545_v30 }
 0x91b   :  { %2080 = vmatpush1.bf16.msra.mxu0 %v5547_v31 }
 0x91c   :  { %2081 = vmatprep.subr.bf16.mxu0 %v5551_v32 }
 0x91f   :  { %2082 = vmatpush1.bf16.msra.mxu0 %v5553_v33 }
 0x920   :  { %2083 = vmatprep.subr.bf16.mxu0 %v5557_v34 }
 0x923   :  { %2084 = vmatpush1.bf16.msra.mxu0 %v5559_v35 }
 0x924   :  { %2085 = vmatprep.subr.bf16.mxu0 %v5563_v36 }
 0x927   :  { %2086 = vmatpush1.bf16.msra.mxu0 %v5565_v37 }
 0x928   :  { %2087 = vmatprep.subr.bf16.mxu0 %v5569_v38 }
 0x92b   :  { %2088 = vmatpush1.bf16.msra.mxu0 %v5571_v39 }
 0x92c   :  { %2089 = vmatprep.subr.bf16.mxu0 %v5575_v40 }
 0x92f   :  { %2090 = vmatpush1.bf16.msra.mxu0 %v5577_v41 }
 0x930   :  { %2091 = vmatprep.subr.bf16.mxu0 %v5581_v42 }
 0x933   :  { %2092 = vmatpush1.bf16.msra.mxu0 %v5583_v43 }
 0x934   :  { %2093 = vmatprep.subr.bf16.mxu0 %v5587_v44 }
 0x937   :  { %2094 = vmatpush1.bf16.msra.mxu0 %v5589_v45 }
 0x938   :  { %2095 = vmatprep.subr.bf16.mxu0 %v5593_v46 }
 0x93b   :  { %2096 = vmatpush1.bf16.msra.mxu0 %v5595_v48 }
 0x93c   :  { %2097 = vmatprep.subr.bf16.mxu0 %v5599_v49 }
 0x93f   :  { %2098 = vmatpush1.bf16.msra.mxu0 %v5601_v61 }
 0x940   :  { %2099 = vmatprep.subr.bf16.mxu0 %v5605_v2 }
 0x943   :  { %2100 = vmatpush1.bf16.msra.mxu0 %v5607_v3 }
 0x944   :  { %2150 = vmatprep.subr.bf16.mxu0 %v5512_v0 }
 0x9d9   :  { %v1730_v19 = vpop.f32.mrb[16].mxu0 }
 0x9da   :  { %v1737_v21 = vadd.f32 %v1730_v19, %v5397_v57  ;;  %v1732_v20 = vpop.f32.mrb[17].mxu0 }
 0x9db   :  { %v1738_v51 = vadd.f32 %v1732_v20, %v5395_v55  ;;  %v1734_v53 = vpop.f32.mrb[18].mxu0 }
 0x9dc   :  { %v3572_v54 = vmul.f32 -1.442695, %v1737_v21  ;;  %v1735_v56 = vpop.f32.mrb[19].mxu0 }
 0x9dd   :  { %v3573_v25 = vmul.f32 -1.442695, %v1738_v51  ;;  %4346 = vtanh.f32 %v1738_v51 }
 0x9de   :  { %4348 = vpow2.f32 %v3572_v54 }
 0x9df   :  { %4350 = vpow2.f32 %v3573_v25 }
 0x9e0   :  { %4352 = vtanh.f32 %v1737_v21 }
 0x9e7   :  { %v4347_v58 = vpop.eup %4346 }
 0x9e8   :  { %v4349_v62 = vpop.eup %4348  ;;  %1769 = vrot.lane.b32.xlu1 %v4347_v58, %s6127_s0 }
 0x9e9   :  { %v4351_v5 = vpop.eup %4350  ;;  %v1745_v6 = vadd.f32 1.0, %v4349_v62 }
 0x9ea   :  { %v1746_v28 = vadd.f32 1.0, %v4351_v5  ;;  %v4353_v7 = vpop.eup %4352 }
 0x9eb   :  { %4354 = vrcp.f32 %v1745_v6 }
 0x9ec   :  { %4356 = vrcp.f32 %v1746_v28  ;;  %1756 = vrot.lane.b32.xlu1 %v4353_v7, %s6127_s0 }
 0x9f5   :  { %v5502_v55 = vpop.eup %4354 }
 0x9f6   :  { %v5504_v57 = vpop.eup %4356  ;;  %1761 = vrot.lane.b32.xlu1 %v5502_v55, %s4697_s9 }
 0x9f7   :  { %1766 = vrot.lane.b32.xlu0 %v5504_v57, %s4698_s7 }
 0x9fb   :  { %1753 = vrot.lane.b32.xlu0 %v5502_v55, %s4698_s7 }
 0x9ff   :  { %1774 = vrot.lane.b32.xlu0 %v5504_v57, %s4697_s9 }
 0xa5a   :  { %v1770_v59 = vpop.permute.xlu1 %1769 }
 0xa5b   :  { %v1771_v10 = vmul.f32 %v5504_v57, %v1770_v59 }
 0xa5e   :  { %v1757_v21 = vpop.permute.xlu1 %1756 }
 0xa5f   :  { %v1758_v53 = vmul.f32 %v5502_v55, %v1757_v21 }
 0xa68   :  { %v1762_v7 = vpop.permute.xlu1 %1761 }
 0xa69   :  { %v1767_v17 = vpop.permute.xlu0 %1766 }
 0xa6a   :  { %v1768_v19 = vmul.f32 %v1767_v17, %v5479_v47 }
 0xa6c   :  { %v1772_v20 = vadd.f32 %v1771_v10, %v1768_v19 }
 0xa6d   :  { %v1754_v51 = vpop.permute.xlu0 %1753 }
 0xa6e   :  { %v5617_v54 = vsel %vm1169_vm4, %v1772_v20, 0.0  ;;  %v1755_v56 = vmul.f32 %v1754_v51, %v5485_v60 }
 0xa6f   :  { %4358 = vtanh.f32 %v5617_v54 }
 0xa70   :  { %v1759_v25 = vadd.f32 %v1758_v53, %v1755_v56 }
 0xa71   :  { %v1775_v62 = vpop.permute.xlu0 %1774 }
 0xa72   :  { %v5623_v58 = vsel %vm1169_vm4, %v1759_v25, 0.0 }
 0xa73   :  { %4360 = vtanh.f32 %v5623_v58 }
 0xa79   :  { %v4359_v47 = vpop.eup %4358 }
 0xa7a   :  { %v1777_v5 = vmul.f32 %v4359_v47, %v1775_v62 }
 0xa7c   :  { %v3575_v6 = vpack.c.bf16 %v1777_v5, %v1777_v5 }
 0xa7d   :  { %v4361_v28 = vpop.eup %4360 }
 0xa7e   :  { %3576 = vmatprep.mubr.msk.bf16.mxu1 %vm5423_vm5, %v3575_v6  ;;  %v1764_v55 = vmul.f32 %v4361_v28, %v1762_v7  ;;  %v5716_v28 = vld [vmem:[#allocation10 + $0x4] ss:$8 sps:$4 sm:$0xff]  }
 0xa80   :  { %v5628_v60 = vpack.c.bf16 %v1764_v55, %v1764_v55 }
 0xa82   :  { %3579 = vmatmul.mubr.msk.bf16.vlgmr.msra.gmra.mrb[28].mxu1 %vm5423_vm5, %v5628_v60 }
 0xa83   :  { %2110 = vmatpush1.bf16.msra.mxu1 %v5517_v11  ;;  %3622 = vmatprep.mubr.msk.bf16.mxu1 %vm5423_vm5, %v3575_v6 }
 0xa84   :  { %2111 = vmatprep.subr.bf16.mxu1 %v5521_v13 }
 0xa87   :  { %2112 = vmatpush1.bf16.msra.mxu1 %v5523_v22 }
 0xa88   :  { %2113 = vmatprep.subr.bf16.mxu1 %v5527_v23 }
 0xa8b   :  { %2114 = vmatpush1.bf16.msra.mxu1 %v5529_v1 }
 0xa8c   :  { %2115 = vmatprep.subr.bf16.mxu1 %v5533_v24 }
 0xa8f   :  { %2116 = vmatpush1.bf16.msra.mxu1 %v5535_v26 }
 0xa90   :  { %2117 = vmatprep.subr.bf16.mxu1 %v5539_v27 }
 0xa93   :  { %2118 = vmatpush1.bf16.msra.mxu1 %v5541_v29 }
 0xa94   :  { %2119 = vmatprep.subr.bf16.mxu1 %v5545_v30 }
 0xa97   :  { %2120 = vmatpush1.bf16.msra.mxu1 %v5547_v31 }
 0xa98   :  { %2121 = vmatprep.subr.bf16.mxu1 %v5551_v32 }
 0xa9b   :  { %2122 = vmatpush1.bf16.msra.mxu1 %v5553_v33 }
 0xa9c   :  { %2123 = vmatprep.subr.bf16.mxu1 %v5557_v34 }
 0xa9f   :  { %2124 = vmatpush1.bf16.msra.mxu1 %v5559_v35 }
 0xaa0   :  { %2125 = vmatprep.subr.bf16.mxu1 %v5563_v36 }
 0xaa3   :  { %2126 = vmatpush1.bf16.msra.mxu1 %v5565_v37 }
 0xaa4   :  { %2127 = vmatprep.subr.bf16.mxu1 %v5569_v38 }
 0xaa7   :  { %2128 = vmatpush1.bf16.msra.mxu1 %v5571_v39 }
 0xaa8   :  { %2129 = vmatprep.subr.bf16.mxu1 %v5575_v40 }
 0xaab   :  { %2130 = vmatpush1.bf16.msra.mxu1 %v5577_v41 }
 0xaac   :  { %2131 = vmatprep.subr.bf16.mxu1 %v5581_v42 }
 0xaaf   :  { %2132 = vmatpush1.bf16.msra.mxu1 %v5583_v43 }
 0xab0   :  { %2133 = vmatprep.subr.bf16.mxu1 %v5587_v44 }
 0xab3   :  { %2134 = vmatpush1.bf16.msra.mxu1 %v5589_v45 }
 0xab4   :  { %2135 = vmatprep.subr.bf16.mxu1 %v5593_v46 }
 0xab7   :  { %2136 = vmatpush1.bf16.msra.mxu1 %v5595_v48 }
 0xab8   :  { %2137 = vmatprep.subr.bf16.mxu1 %v5599_v49 }
 0xabb   :  { %2138 = vmatpush1.bf16.msra.mxu1 %v5601_v61 }
 0xabc   :  { %2139 = vmatprep.subr.bf16.mxu1 %v5605_v2 }
 0xabf   :  { %2140 = vmatpush1.bf16.msra.mxu1 %v5607_v3 }
 0xac0   :  { %2192 = vmatprep.subr.bf16.mxu1 %v5512_v0 }
 0xac2   :  { %3625 = vmatmul.mubr.msk.bf16.vlgmr.msra.gmra.mrb[32].mxu1 %vm5423_vm5, %v5493_v18 }
 0xac3   :  { %3634 = vmatprep.mubr.msk.bf16.mxu1 %vm5423_vm5, %v5427_v9  ;;  %2193 = vmatpush1.bf16.msra.mxu1 %v5517_v11 }
 0xac4   :  { %2194 = vmatprep.subr.bf16.mxu1 %v5521_v13 }
 0xac7   :  { %2195 = vmatpush1.bf16.msra.mxu1 %v5523_v22 }
 0xac8   :  { %2196 = vmatprep.subr.bf16.mxu1 %v5527_v23 }
 0xacb   :  { %2197 = vmatpush1.bf16.msra.mxu1 %v5529_v1 }
 0xacc   :  { %2198 = vmatprep.subr.bf16.mxu1 %v5533_v24 }
 0xacf   :  { %2199 = vmatpush1.bf16.msra.mxu1 %v5535_v26 }
 0xad0   :  { %2200 = vmatprep.subr.bf16.mxu1 %v5539_v27 }
 0xad3   :  { %2201 = vmatpush1.bf16.msra.mxu1 %v5541_v29 }
 0xad4   :  { %2202 = vmatprep.subr.bf16.mxu1 %v5545_v30 }
 0xad7   :  { %2203 = vmatpush1.bf16.msra.mxu1 %v5547_v31 }
 0xad8   :  { %2204 = vmatprep.subr.bf16.mxu1 %v5551_v32 }
 0xadb   :  { %2205 = vmatpush1.bf16.msra.mxu1 %v5553_v33 }
 0xadc   :  { %2206 = vmatprep.subr.bf16.mxu1 %v5557_v34 }
 0xadf   :  { %2207 = vmatpush1.bf16.msra.mxu1 %v5559_v35 }
 0xae0   :  { %2208 = vmatprep.subr.bf16.mxu1 %v5563_v36 }
 0xae3   :  { %2209 = vmatpush1.bf16.msra.mxu1 %v5565_v37 }
 0xae4   :  { %2210 = vmatprep.subr.bf16.mxu1 %v5569_v38 }
 0xae7   :  { %2211 = vmatpush1.bf16.msra.mxu1 %v5571_v39 }
 0xae8   :  { %2212 = vmatprep.subr.bf16.mxu1 %v5575_v40 }
 0xaeb   :  { %2213 = vmatpush1.bf16.msra.mxu1 %v5577_v41 }
 0xaec   :  { %2214 = vmatprep.subr.bf16.mxu1 %v5581_v42 }
 0xaef   :  { %2215 = vmatpush1.bf16.msra.mxu1 %v5583_v43 }
 0xaf0   :  { %2216 = vmatprep.subr.bf16.mxu1 %v5587_v44 }
 0xaf3   :  { %2217 = vmatpush1.bf16.msra.mxu1 %v5589_v45 }
 0xaf4   :  { %2218 = vmatprep.subr.bf16.mxu1 %v5593_v46 }
 0xaf7   :  { %2219 = vmatpush1.bf16.msra.mxu1 %v5595_v48 }
 0xaf8   :  { %2220 = vmatprep.subr.bf16.mxu1 %v5599_v49 }
 0xafb   :  { %2221 = vmatpush1.bf16.msra.mxu1 %v5601_v61 }
 0xafc   :  { %2222 = vmatprep.subr.bf16.mxu1 %v5605_v2 }
 0xaff   :  { %2223 = vmatpush1.bf16.msra.mxu1 %v5607_v3 }
 0xb00   :  { %2522 = vmatprep.subr.bf16.mxu1 %v5716_v28 }
 0xb55   :  { %v1815_v9 = vpop.f32.mrb[28].mxu1 }
 0xb56   :  { %v1822_v18 = vadd.f32 %v1815_v9, %v5401_v63  ;;  %v1817_v57 = vpop.f32.mrb[29].mxu1 }
 0xb57   :  { %v1823_v0 = vadd.f32 %v1817_v57, %v5391_v50  ;;  %v1819_v59 = vpop.f32.mrb[30].mxu1 }
 0xb58   :  { %v3580_v17 = vmul.f32 -1.442695, %v1822_v18  ;;  %v1820_v10 = vpop.f32.mrb[31].mxu1 }
 0xb59   :  { %v3581_v19 = vmul.f32 -1.442695, %v1823_v0  ;;  %4362 = vtanh.f32 %v1823_v0 }
 0xb5a   :  { %4364 = vpow2.f32 %v3580_v17 }
 0xb5b   :  { %4366 = vpow2.f32 %v3581_v19 }
 0xb63   :  { %v4363_v21 = vpop.eup %4362 }
 0xb64   :  { %v4365_v20 = vpop.eup %4364  ;;  %1854 = vrot.lane.b32.xlu1 %v4363_v21, %s6127_s0 }
 0xb65   :  { %v4367_v51 = vpop.eup %4366  ;;  %v1830_v53 = vadd.f32 1.0, %v4365_v20 }
 0xb66   :  { %v1831_v56 = vadd.f32 1.0, %v4367_v51 }
 0xb67   :  { %4368 = vrcp.f32 %v1830_v53 }
 0xb68   :  { %4370 = vrcp.f32 %v1831_v56 }
 0xb69   :  { %4372 = vtanh.f32 %v1822_v18 }
 0xb71   :  { %v4369_v63 = vpop.eup %4368 }
 0xb72   :  { %v4371_v25 = vpop.eup %4370  ;;  %1838 = vrot.lane.b32.xlu1 %v4369_v63, %s4698_s7 }
 0xb73   :  { %1851 = vrot.lane.b32.xlu0 %v4371_v25, %s4698_s7  ;;  %v4373_v50 = vpop.eup %4372 }
 0xb76   :  { %1846 = vrot.lane.b32.xlu1 %v4369_v63, %s4697_s9 }
 0xb77   :  { %1859 = vrot.lane.b32.xlu0 %v4371_v25, %s4697_s9 }
 0xb7b   :  { %1841 = vrot.lane.b32.xlu0 %v4373_v50, %s6127_s0 }
 0xb95   :  { %v5712_v47 = vpop.f32.mrb[32].mxu1 }
 0xb96   :  { %v5714_v62 = vpop.f32.mrb[33].mxu1 }
 0xb97   :  { %v2147_v5 = vpop.f32.mrb[34].mxu1 }
 0xb98   :  { %v2148_v6 = vpop.f32.mrb[35].mxu1  ;;  %v5737_v5 = vld [vmem:[#allocation10] ss:$8 sps:$4 sm:$0xff]  }
 0xbd6   :  { %v1855_v7 = vpop.permute.xlu1 %1854 }
 0xbd7   :  { %v1856_v9 = vmul.f32 %v4371_v25, %v1855_v7 }
 0xbe4   :  { %v1839_v17 = vpop.permute.xlu1 %1838 }
 0xbe5   :  { %v1852_v55 = vpop.permute.xlu0 %1851  ;;  %v1840_v19 = vmul.f32 %v1839_v17, %v5623_v58 }
 0xbe6   :  { %v1853_v18 = vmul.f32 %v1852_v55, %v5617_v54 }
 0xbe8   :  { %v1857_v57 = vadd.f32 %v1856_v9, %v1853_v18  ;;  %v1847_v58 = vpop.permute.xlu1 %1846 }
 0xbe9   :  { %v1860_v0 = vpop.permute.xlu0 %1859 }
 0xbea   :  { %v1858_v59 = vsel %vm1169_vm4, %v1857_v57, 0.0 }
 0xbeb   :  { %4374 = vtanh.f32 %v1858_v59  ;;  %v1897_v59 = vld [vmem:[%s6095_s12] sm:$0x3] }
 0xbed   :  { %v1842_v10 = vpop.permute.xlu0 %1841 }
 0xbee   :  { %v1843_v21 = vmul.f32 %v4369_v63, %v1842_v10 }
 0xbf0   :  { %v1844_v20 = vadd.f32 %v1843_v21, %v1840_v19  ;;  %v5948_v19 = vrot.slane %v1897_v59, %v5381_v14  ;;  %v5951_v21 = vrot.slane %v1897_v59, %v5387_v16 }
 0xbf2   :  { %v1845_v51 = vsel %vm1169_vm4, %v1844_v20, 0.0 }
 0xbf3   :  { %4376 = vtanh.f32 %v1845_v51 }
 0xbf5   :  { %v4375_v53 = vpop.eup %4374 }
 0xbf6   :  { %v1862_v56 = vmul.f32 %v4375_v53, %v1860_v0  ;;  %v2265_v0 = vld [vmem:[%s6097_s14] sm:$0x3] }
 0xbf7   :  { %v5942_v17 = vrot.slane %v2265_v0, %v5381_v14  ;;  %v5945_v10 = vrot.slane %v2265_v0, %v5387_v16 }
 0xbf8   :  { %v3615_v25 = vpack.c.bf16 %v1862_v56, %v1862_v56 }
 0xbfa   :  { %3616 = vmatprep.mubr.msk.bf16.mxu0 %vm5423_vm5, %v3615_v25 }
 0xbfb   :  { %3619 = vmatmul.mubr.msk.bf16.vlgmr.msra.gmra.mrb[20].mxu0 %vm5423_vm5, %v5432_v15  ;;  %v5741_v15 = vld [vmem:[#allocation10 + $0x14] ss:$8 sps:$4 sm:$0xff]  }
 0xbfc   :  { %2151 = vmatpush1.bf16.msra.mxu0 %v5517_v11  ;;  %3628 = vmatprep.mubr.msk.bf16.mxu0 %vm5423_vm5, %v5488_v52  ;;  %v5747_v52 = vld [vmem:[#allocation10 + $0x10] ss:$8 sps:$4 sm:$0xff]   ;;  %v5749_v11 = vld [vmem:[#allocation10 + $0x24] ss:$8 sps:$4 sm:$0xff]  }
 0xbfd   :  { %v4377_v54 = vpop.eup %4376  ;;  %2152 = vmatprep.subr.bf16.mxu0 %v5521_v13  ;;  %v5755_v13 = vld [vmem:[#allocation10 + $0x20] ss:$8 sps:$4 sm:$0xff]  }
 0xbfe   :  { %v1849_v63 = vmul.f32 %v4377_v54, %v1847_v58 }
 0xc00   :  { %2153 = vmatpush1.bf16.msra.mxu0 %v5523_v22  ;;  %v3636_v50 = vpack.c.bf16 %v1849_v63, %v1849_v63  ;;  %v5757_v22 = vld [vmem:[#allocation10 + $0x34] ss:$8 sps:$4 sm:$0xff]  }
 0xc01   :  { %2154 = vmatprep.subr.bf16.mxu0 %v5527_v23  ;;  %v5763_v23 = vld [vmem:[#allocation10 + $0x30] ss:$8 sps:$4 sm:$0xff]  }
 0xc02   :  { %3637 = vmatmul.mubr.msk.bf16.vlgmr.msra.gmra.mrb[36].mxu1 %vm5423_vm5, %v3636_v50 }
 0xc03   :  { %2523 = vmatpush1.bf16.msra.mxu1 %v5737_v5 }
 0xc04   :  { %2155 = vmatpush1.bf16.msra.mxu0 %v5529_v1  ;;  %2524 = vmatprep.subr.bf16.mxu1 %v5741_v15  ;;  %v5765_v1 = vld [vmem:[#allocation10 + $0x44] ss:$8 sps:$4 sm:$0xff]  }
 0xc05   :  { %2156 = vmatprep.subr.bf16.mxu0 %v5533_v24  ;;  %v5771_v24 = vld [vmem:[#allocation10 + $0x40] ss:$8 sps:$4 sm:$0xff]  }
 0xc07   :  { %2525 = vmatpush1.bf16.msra.mxu1 %v5747_v52 }
 0xc08   :  { %2157 = vmatpush1.bf16.msra.mxu0 %v5535_v26  ;;  %2526 = vmatprep.subr.bf16.mxu1 %v5749_v11  ;;  %v5773_v26 = vld [vmem:[#allocation10 + $0x54] ss:$8 sps:$4 sm:$0xff]  }
 0xc09   :  { %2158 = vmatprep.subr.bf16.mxu0 %v5539_v27  ;;  %v5779_v27 = vld [vmem:[#allocation10 + $0x50] ss:$8 sps:$4 sm:$0xff]  }
 0xc0b   :  { %2527 = vmatpush1.bf16.msra.mxu1 %v5755_v13 }
 0xc0c   :  { %2159 = vmatpush1.bf16.msra.mxu0 %v5541_v29  ;;  %2528 = vmatprep.subr.bf16.mxu1 %v5757_v22  ;;  %v5781_v29 = vld [vmem:[#allocation10 + $0x64] ss:$8 sps:$4 sm:$0xff]  }
 0xc0d   :  { %2160 = vmatprep.subr.bf16.mxu0 %v5545_v30  ;;  %v5787_v30 = vld [vmem:[#allocation10 + $0x60] ss:$8 sps:$4 sm:$0xff]  }
 0xc0f   :  { %2529 = vmatpush1.bf16.msra.mxu1 %v5763_v23 }
 0xc10   :  { %2161 = vmatpush1.bf16.msra.mxu0 %v5547_v31  ;;  %2530 = vmatprep.subr.bf16.mxu1 %v5765_v1  ;;  %v5789_v31 = vld [vmem:[#allocation10 + $0x74] ss:$8 sps:$4 sm:$0xff]  }
 0xc11   :  { %2162 = vmatprep.subr.bf16.mxu0 %v5551_v32  ;;  %v5795_v32 = vld [vmem:[#allocation10 + $0x70] ss:$8 sps:$4 sm:$0xff]  }
 0xc13   :  { %2531 = vmatpush1.bf16.msra.mxu1 %v5771_v24 }
 0xc14   :  { %2163 = vmatpush1.bf16.msra.mxu0 %v5553_v33  ;;  %2532 = vmatprep.subr.bf16.mxu1 %v5773_v26  ;;  %v5797_v33 = vld [vmem:[#allocation10 + $0x84] ss:$8 sps:$4 sm:$0xff]  }
 0xc15   :  { %2164 = vmatprep.subr.bf16.mxu0 %v5557_v34  ;;  %v5803_v34 = vld [vmem:[#allocation10 + $0x80] ss:$8 sps:$4 sm:$0xff]  }
 0xc17   :  { %2533 = vmatpush1.bf16.msra.mxu1 %v5779_v27 }
 0xc18   :  { %2165 = vmatpush1.bf16.msra.mxu0 %v5559_v35  ;;  %2534 = vmatprep.subr.bf16.mxu1 %v5781_v29  ;;  %v5805_v35 = vld [vmem:[#allocation10 + $0x94] ss:$8 sps:$4 sm:$0xff]  }
 0xc19   :  { %2166 = vmatprep.subr.bf16.mxu0 %v5563_v36  ;;  %v5811_v36 = vld [vmem:[#allocation10 + $0x90] ss:$8 sps:$4 sm:$0xff]  }
 0xc1b   :  { %2535 = vmatpush1.bf16.msra.mxu1 %v5787_v30 }
 0xc1c   :  { %2167 = vmatpush1.bf16.msra.mxu0 %v5565_v37  ;;  %2536 = vmatprep.subr.bf16.mxu1 %v5789_v31  ;;  %v5813_v37 = vld [vmem:[#allocation10 + $0xa4] ss:$8 sps:$4 sm:$0xff]  }
 0xc1d   :  { %2168 = vmatprep.subr.bf16.mxu0 %v5569_v38  ;;  %v5819_v38 = vld [vmem:[#allocation10 + $0xa0] ss:$8 sps:$4 sm:$0xff]  }
 0xc1f   :  { %2537 = vmatpush1.bf16.msra.mxu1 %v5795_v32 }
 0xc20   :  { %2169 = vmatpush1.bf16.msra.mxu0 %v5571_v39  ;;  %2538 = vmatprep.subr.bf16.mxu1 %v5797_v33  ;;  %v5821_v39 = vld [vmem:[#allocation10 + $0xb4] ss:$8 sps:$4 sm:$0xff]  }
 0xc21   :  { %2170 = vmatprep.subr.bf16.mxu0 %v5575_v40  ;;  %v5827_v40 = vld [vmem:[#allocation10 + $0xb0] ss:$8 sps:$4 sm:$0xff]  }
 0xc23   :  { %2539 = vmatpush1.bf16.msra.mxu1 %v5803_v34 }
 0xc24   :  { %2171 = vmatpush1.bf16.msra.mxu0 %v5577_v41  ;;  %2540 = vmatprep.subr.bf16.mxu1 %v5805_v35  ;;  %v5829_v41 = vld [vmem:[#allocation10 + $0xc4] ss:$8 sps:$4 sm:$0xff]  }
 0xc25   :  { %2172 = vmatprep.subr.bf16.mxu0 %v5581_v42  ;;  %v5835_v42 = vld [vmem:[#allocation10 + $0xc0] ss:$8 sps:$4 sm:$0xff]  }
 0xc27   :  { %2541 = vmatpush1.bf16.msra.mxu1 %v5811_v36 }
 0xc28   :  { %2173 = vmatpush1.bf16.msra.mxu0 %v5583_v43  ;;  %2542 = vmatprep.subr.bf16.mxu1 %v5813_v37  ;;  %v5837_v43 = vld [vmem:[#allocation10 + $0xd4] ss:$8 sps:$4 sm:$0xff]  }
 0xc29   :  { %2174 = vmatprep.subr.bf16.mxu0 %v5587_v44  ;;  %v5843_v44 = vld [vmem:[#allocation10 + $0xd0] ss:$8 sps:$4 sm:$0xff]  }
 0xc2b   :  { %2543 = vmatpush1.bf16.msra.mxu1 %v5819_v38 }
 0xc2c   :  { %2175 = vmatpush1.bf16.msra.mxu0 %v5589_v45  ;;  %2544 = vmatprep.subr.bf16.mxu1 %v5821_v39  ;;  %v5845_v45 = vld [vmem:[#allocation10 + $0xe4] ss:$8 sps:$4 sm:$0xff]  }
 0xc2d   :  { %2176 = vmatprep.subr.bf16.mxu0 %v5593_v46  ;;  %v5851_v46 = vld [vmem:[#allocation10 + $0xe0] ss:$8 sps:$4 sm:$0xff]  }
 0xc2f   :  { %2545 = vmatpush1.bf16.msra.mxu1 %v5827_v40 }
 0xc30   :  { %2177 = vmatpush1.bf16.msra.mxu0 %v5595_v48  ;;  %2546 = vmatprep.subr.bf16.mxu1 %v5829_v41  ;;  %v5856_v48 = vld [vmem:[#allocation10 + $0xf4] ss:$8 sps:$4 sm:$0xff]  }
 0xc31   :  { %2178 = vmatprep.subr.bf16.mxu0 %v5599_v49  ;;  %v5862_v49 = vld [vmem:[#allocation10 + $0xf0] ss:$8 sps:$4 sm:$0xff]  }
 0xc33   :  { %2547 = vmatpush1.bf16.msra.mxu1 %v5835_v42 }
 0xc34   :  { %2179 = vmatpush1.bf16.msra.mxu0 %v5601_v61  ;;  %2548 = vmatprep.subr.bf16.mxu1 %v5837_v43 }
 0xc35   :  { %2180 = vmatprep.subr.bf16.mxu0 %v5605_v2 }
 0xc37   :  { %2549 = vmatpush1.bf16.msra.mxu1 %v5843_v44 }
 0xc38   :  { %2181 = vmatpush1.bf16.msra.mxu0 %v5607_v3  ;;  %2550 = vmatprep.subr.bf16.mxu1 %v5845_v45 }
 0xc39   :  { %2437 = vmatprep.subr.bf16.mxu0 %v5716_v28 }
 0xc3b   :  { %3631 = vmatmul.mubr.msk.bf16.vlgmr.msra.gmra.mrb[24].mxu0 %vm5423_vm5, %v5628_v60  ;;  %2551 = vmatpush1.bf16.msra.mxu1 %v5851_v46 }
 0xc3c   :  { %2438 = vmatpush1.bf16.msra.mxu0 %v5737_v5  ;;  %2469 = vmatprep.mubr.bf16.mxu0 %v4696_v4 }
 0xc3d   :  { %2439 = vmatprep.subr.bf16.mxu0 %v5741_v15  ;;  %2552 = vmatprep.subr.bf16.mxu1 %v5856_v48 }
 0xc3f   :  { %2553 = vmatpush1.bf16.msra.mxu1 %v5862_v49 }
 0xc40   :  { %2440 = vmatpush1.bf16.msra.mxu0 %v5747_v52  ;;  %2692 = vmatprep.subr.bf16.mxu1 %v5716_v28 }
 0xc41   :  { %2441 = vmatprep.subr.bf16.mxu0 %v5749_v11 }
 0xc44   :  { %2442 = vmatpush1.bf16.msra.mxu0 %v5755_v13 }
 0xc45   :  { %2443 = vmatprep.subr.bf16.mxu0 %v5757_v22 }
 0xc48   :  { %2444 = vmatpush1.bf16.msra.mxu0 %v5763_v23 }
 0xc49   :  { %2445 = vmatprep.subr.bf16.mxu0 %v5765_v1 }
 0xc4c   :  { %2446 = vmatpush1.bf16.msra.mxu0 %v5771_v24 }
 0xc4d   :  { %2447 = vmatprep.subr.bf16.mxu0 %v5773_v26 }
 0xc50   :  { %2448 = vmatpush1.bf16.msra.mxu0 %v5779_v27 }
 0xc51   :  { %2449 = vmatprep.subr.bf16.mxu0 %v5781_v29 }
 0xc54   :  { %2450 = vmatpush1.bf16.msra.mxu0 %v5787_v30 }
 0xc55   :  { %2451 = vmatprep.subr.bf16.mxu0 %v5789_v31 }
 0xc58   :  { %2452 = vmatpush1.bf16.msra.mxu0 %v5795_v32 }
 0xc59   :  { %2453 = vmatprep.subr.bf16.mxu0 %v5797_v33 }
 0xc5c   :  { %2454 = vmatpush1.bf16.msra.mxu0 %v5803_v34 }
 0xc5d   :  { %2455 = vmatprep.subr.bf16.mxu0 %v5805_v35 }
 0xc60   :  { %2456 = vmatpush1.bf16.msra.mxu0 %v5811_v36 }
 0xc61   :  { %2457 = vmatprep.subr.bf16.mxu0 %v5813_v37 }
 0xc64   :  { %2458 = vmatpush1.bf16.msra.mxu0 %v5819_v38 }
 0xc65   :  { %2459 = vmatprep.subr.bf16.mxu0 %v5821_v39 }
 0xc68   :  { %2460 = vmatpush1.bf16.msra.mxu0 %v5827_v40 }
 0xc69   :  { %2461 = vmatprep.subr.bf16.mxu0 %v5829_v41 }
 0xc6c   :  { %2462 = vmatpush1.bf16.msra.mxu0 %v5835_v42 }
 0xc6d   :  { %2463 = vmatprep.subr.bf16.mxu0 %v5837_v43 }
 0xc70   :  { %2464 = vmatpush1.bf16.msra.mxu0 %v5843_v44 }
 0xc71   :  { %2465 = vmatprep.subr.bf16.mxu0 %v5845_v45 }
 0xc74   :  { %2466 = vmatpush1.bf16.msra.mxu0 %v5851_v46 }
 0xc75   :  { %2467 = vmatprep.subr.bf16.mxu0 %v5856_v48 }
 0xc78   :  { %2468 = vmatpush1.bf16.msra.mxu0 %v5862_v49 }
 0xc79   :  { %2607 = vmatprep.subr.bf16.mxu0 %v5716_v28 }
 0xc7b   :  { %2470 = vmatmul.mubr.bf16.vlgmr.msra.gmra.mrb[28].mxu0 %v4696_v4 }
 0xc7c   :  { %2608 = vmatpush1.bf16.msra.mxu0 %v5737_v5 }
 0xc7d   :  { %2609 = vmatprep.subr.bf16.mxu0 %v5741_v15 }
 0xc80   :  { %2610 = vmatpush1.bf16.msra.mxu0 %v5747_v52 }
 0xc81   :  { %2611 = vmatprep.subr.bf16.mxu0 %v5749_v11 }
 0xc84   :  { %2612 = vmatpush1.bf16.msra.mxu0 %v5755_v13 }
 0xc85   :  { %2613 = vmatprep.subr.bf16.mxu0 %v5757_v22 }
 0xc88   :  { %2614 = vmatpush1.bf16.msra.mxu0 %v5763_v23 }
 0xc89   :  { %2615 = vmatprep.subr.bf16.mxu0 %v5765_v1 }
 0xc8c   :  { %2616 = vmatpush1.bf16.msra.mxu0 %v5771_v24 }
 0xc8d   :  { %2617 = vmatprep.subr.bf16.mxu0 %v5773_v26 }
 0xc90   :  { %2618 = vmatpush1.bf16.msra.mxu0 %v5779_v27 }
 0xc91   :  { %2619 = vmatprep.subr.bf16.mxu0 %v5781_v29 }
 0xc94   :  { %2620 = vmatpush1.bf16.msra.mxu0 %v5787_v30 }
 0xc95   :  { %2621 = vmatprep.subr.bf16.mxu0 %v5789_v31 }
 0xc98   :  { %2622 = vmatpush1.bf16.msra.mxu0 %v5795_v32 }
 0xc99   :  { %2623 = vmatprep.subr.bf16.mxu0 %v5797_v33 }
 0xc9c   :  { %2624 = vmatpush1.bf16.msra.mxu0 %v5803_v34 }
 0xc9d   :  { %2625 = vmatprep.subr.bf16.mxu0 %v5805_v35 }
 0xca0   :  { %2626 = vmatpush1.bf16.msra.mxu0 %v5811_v36 }
 0xca1   :  { %2627 = vmatprep.subr.bf16.mxu0 %v5813_v37 }
 0xca4   :  { %2628 = vmatpush1.bf16.msra.mxu0 %v5819_v38 }
 0xca5   :  { %2629 = vmatprep.subr.bf16.mxu0 %v5821_v39 }
 0xca8   :  { %2630 = vmatpush1.bf16.msra.mxu0 %v5827_v40 }
 0xca9   :  { %2631 = vmatprep.subr.bf16.mxu0 %v5829_v41 }
 0xcac   :  { %2632 = vmatpush1.bf16.msra.mxu0 %v5835_v42 }
 0xcad   :  { %2633 = vmatprep.subr.bf16.mxu0 %v5837_v43 }
 0xcb0   :  { %2634 = vmatpush1.bf16.msra.mxu0 %v5843_v44 }
 0xcb1   :  { %2635 = vmatprep.subr.bf16.mxu0 %v5845_v45 }
 0xcb4   :  { %2636 = vmatpush1.bf16.msra.mxu0 %v5851_v46 }
 0xcb5   :  { %2637 = vmatprep.subr.bf16.mxu0 %v5856_v48 }
 0xcb8   :  { %2638 = vmatpush1.bf16.msra.mxu0 %v5862_v49 }
 0xcce   :  { %v2103_v4 = vpop.f32.mrb[20].mxu0 }
 0xccf   :  { %v2105_v61 = vpop.f32.mrb[21].mxu0  ;;  %v2104_v51 = vadd.f32 %v2103_v4, %v5948_v19 }
 0xcd0   :  { %v2106_v2 = vpop.f32.mrb[22].mxu0 }
 0xcd1   :  { %v2107_v3 = vpop.f32.mrb[23].mxu0 }
 0xcd5   :  { %v5929_v60 = vpop.f32.mrb[36].mxu1 }
 0xcd6   :  { %v2228_v6 = vpop.f32.mrb[37].mxu1 }
 0xcd7   :  { %v2230_v28 = vpop.f32.mrb[38].mxu1  ;;  %v2229_v25 = vadd.f32 %v2228_v6, %v5951_v21 }
 0xcd8   :  { %v2231_v7 = vpop.f32.mrb[39].mxu1 }
 0xd0e   :  { %v5931_v55 = vpop.f32.mrb[24].mxu0 }
 0xd0f   :  { %v5933_v9 = vpop.f32.mrb[25].mxu0 }
 0xd10   :  { %v2188_v18 = vpop.f32.mrb[26].mxu0 }
 0xd11   :  { %v2189_v57 = vpop.f32.mrb[27].mxu0 }
 0xd4e   :  { %v2471_v20 = vpop.f32.mrb[28].mxu0 }
 0xd4f   :  { %v2472_v53 = vadd.f32 %v2471_v20, %v5942_v17  ;;  %v2473_v56 = vpop.f32.mrb[29].mxu0 }
 0xd50   :  { %v2474_v54 = vadd.f32 %v2473_v56, %v5945_v10  ;;  %v2475_v58 = vpop.f32.mrb[30].mxu0 }
 0xd51   :  { %v2478_v63 = vadd.f32 %v2472_v53, %v2104_v51  ;;  %2489 = vrot.lane.b32.xlu1 %v2472_v53, %s6127_s0  ;;  %v2476_v50 = vpop.f32.mrb[31].mxu0 }
 0xd52   :  { %v2499_v61 = vadd.f32 %v2474_v54, %v2229_v25  ;;  %2510 = vrot.lane.b32.xlu0 %v2474_v54, %s6127_s0 }
 0xd53   :  { %v3670_v2 = vmul.f32 -1.442695, %v2478_v63 }
 0xd54   :  { %v3671_v3 = vmul.f32 -1.442695, %v2499_v61 }
 0xd55   :  { %4378 = vpow2.f32 %v3670_v2  ;;  %2487 = vrot.lane.b32.xlu1 %v2104_v51, %s6127_s0 }
 0xd56   :  { %4380 = vpow2.f32 %v3671_v3  ;;  %2508 = vrot.lane.b32.xlu0 %v2229_v25, %s6127_s0 }
 0xd5f   :  { %v4379_v4 = vpop.eup %4378 }
 0xd60   :  { %v4381_v6 = vpop.eup %4380  ;;  %v2482_v28 = vadd.f32 1.0, %v4379_v4 }
 0xd61   :  { %v2503_v7 = vadd.f32 1.0, %v4381_v6 }
 0xd62   :  { %4382 = vrcp.f32 %v2482_v28 }
 0xd63   :  { %4384 = vrcp.f32 %v2503_v7 }
 0xd6c   :  { %v4383_v18 = vpop.eup %4382 }
 0xd6d   :  { %v4385_v57 = vpop.eup %4384  ;;  %2485 = vrot.lane.b32.xlu1 %v4383_v18, %s4698_s7 }
 0xd6e   :  { %2506 = vrot.lane.b32.xlu0 %v4385_v57, %s4698_s7 }
 0xdc3   :  { %v2490_v0 = vpop.permute.xlu1 %2489 }
 0xdc4   :  { %v2511_v59 = vpop.permute.xlu0 %2510  ;;  %v2491_v53 = vmul.f32 %v4383_v18, %v2490_v0 }
 0xdc5   :  { %v2512_v56 = vmul.f32 %v4385_v57, %v2511_v59 }
 0xdc7   :  { %v2488_v20 = vpop.permute.xlu1 %2487 }
 0xdc8   :  { %v2509_v51 = vpop.permute.xlu0 %2508  ;;  %v2492_v54 = vadd.f32 %v2491_v53, %v2488_v20 }
 0xdc9   :  { %v2513_v25 = vadd.f32 %v2512_v56, %v2509_v51 }
 0xdca   :  { %4386 = vtanh.f32 %v2492_v54 }
 0xdcb   :  { %4388 = vtanh.f32 %v2513_v25 }
 0xdd4   :  { %v4387_v61 = vpop.eup %4386 }
 0xdd5   :  { %v4389_v3 = vpop.eup %4388 }
 0xddf   :  { %v2486_v58 = vpop.permute.xlu1 %2485 }
 0xde0   :  { %v2494_v63 = vsub.f32 1.0, %v2486_v58  ;;  %v2507_v50 = vpop.permute.xlu0 %2506  ;;  %v2496_v6 = vmul.f32 0.0, %v2486_v58 }
 0xde1   :  { %v2515_v2 = vsub.f32 1.0, %v2507_v50  ;;  %v2517_v7 = vmul.f32 0.0, %v2507_v50 }
 0xde2   :  { %v2495_v4 = vmul.f32 %v4387_v61, %v2494_v63  ;;  %v2146_v61 = vadd.f32 %v5714_v62, %v5951_v21 }
 0xde3   :  { %v2516_v28 = vmul.f32 %v4389_v3, %v2515_v2 }
 0xde4   :  { %v5963_v16 = vadd.f32 %v2496_v6, %v2495_v4 }
 0xde5   :  { %v5965_v14 = vadd.f32 %v2517_v7, %v2516_v28 }
 0xde6   :  { %v3676_v57 = vpack.c.bf16 %v5963_v16, %v5963_v16 }
 0xde7   :  { %v5969_v18 = vpack.c.bf16 %v5965_v14, %v5965_v14  ;;  %v2519_v20 = vsel %vm1169_vm4, %v5965_v14, 0.0  ;;  %v2185_v14 = vadd.f32 %v5931_v55, %v5948_v19 }
 0xde9   :  { %3674 = vmatprep.mubr.msk.bf16.mxu1 %vm5423_vm5, %v5969_v18 }
 0xdea   :  { %3677 = vmatmul.mubr.msk.bf16.vlgmr.msra.gmra.mrb[40].mxu1 %vm5423_vm5, %v3676_v57 }
 0xdeb   :  { %2693 = vmatpush1.bf16.msra.mxu1 %v5737_v5 }
 0xdec   :  { %2694 = vmatprep.subr.bf16.mxu1 %v5741_v15  ;;  %v2144_v15 = vadd.f32 %v5712_v47, %v5948_v19 }
 0xdef   :  { %2695 = vmatpush1.bf16.msra.mxu1 %v5747_v52 }
 0xdf0   :  { %2696 = vmatprep.subr.bf16.mxu1 %v5749_v11 }
 0xdf3   :  { %2697 = vmatpush1.bf16.msra.mxu1 %v5755_v13  ;;  %v2187_v13 = vadd.f32 %v5933_v9, %v5951_v21 }
 0xdf4   :  { %2698 = vmatprep.subr.bf16.mxu1 %v5757_v22 }
 0xdf7   :  { %2699 = vmatpush1.bf16.msra.mxu1 %v5763_v23 }
 0xdf8   :  { %2700 = vmatprep.subr.bf16.mxu1 %v5765_v1 }
 0xdfb   :  { %2701 = vmatpush1.bf16.msra.mxu1 %v5771_v24 }
 0xdfc   :  { %2702 = vmatprep.subr.bf16.mxu1 %v5773_v26 }
 0xdff   :  { %2703 = vmatpush1.bf16.msra.mxu1 %v5779_v27 }
 0xe00   :  { %2704 = vmatprep.subr.bf16.mxu1 %v5781_v29 }
 0xe03   :  { %2705 = vmatpush1.bf16.msra.mxu1 %v5787_v30 }
 0xe04   :  { %2706 = vmatprep.subr.bf16.mxu1 %v5789_v31 }
 0xe07   :  { %2707 = vmatpush1.bf16.msra.mxu1 %v5795_v32 }
 0xe08   :  { %2708 = vmatprep.subr.bf16.mxu1 %v5797_v33 }
 0xe0b   :  { %2709 = vmatpush1.bf16.msra.mxu1 %v5803_v34 }
 0xe0c   :  { %2710 = vmatprep.subr.bf16.mxu1 %v5805_v35 }
 0xe0f   :  { %2711 = vmatpush1.bf16.msra.mxu1 %v5811_v36 }
 0xe10   :  { %2712 = vmatprep.subr.bf16.mxu1 %v5813_v37 }
 0xe13   :  { %2713 = vmatpush1.bf16.msra.mxu1 %v5819_v38 }
 0xe14   :  { %2714 = vmatprep.subr.bf16.mxu1 %v5821_v39 }
 0xe17   :  { %2715 = vmatpush1.bf16.msra.mxu1 %v5827_v40 }
 0xe18   :  { %2716 = vmatprep.subr.bf16.mxu1 %v5829_v41 }
 0xe1b   :  { %2717 = vmatpush1.bf16.msra.mxu1 %v5835_v42 }
 0xe1c   :  { %2718 = vmatprep.subr.bf16.mxu1 %v5837_v43 }
 0xe1f   :  { %2719 = vmatpush1.bf16.msra.mxu1 %v5843_v44 }
 0xe20   :  { %2720 = vmatprep.subr.bf16.mxu1 %v5845_v45 }
 0xe23   :  { %2721 = vmatpush1.bf16.msra.mxu1 %v5851_v46 }
 0xe24   :  { %2722 = vmatprep.subr.bf16.mxu1 %v5856_v48  ;;  %v2498_v48 = vsel %vm1169_vm4, %v5963_v16, 0.0 }
 0xe27   :  { %2723 = vmatpush1.bf16.msra.mxu1 %v5862_v49 }
 0xebd   :  { %v2556_v5 = vpop.f32.mrb[40].mxu1 }
 0xebe   :  { %v2557_v52 = vadd.f32 %v2556_v5, %v5942_v17  ;;  %v2558_v11 = vpop.f32.mrb[41].mxu1 }
 0xebf   :  { %v2559_v22 = vadd.f32 %v2558_v11, %v5945_v10  ;;  %v2560_v23 = vpop.f32.mrb[42].mxu1 }
 0xec0   :  { %v2563_v1 = vadd.f32 %v2557_v52, %v2144_v15  ;;  %v2561_v24 = vpop.f32.mrb[43].mxu1  ;;  %2574 = vrot.lane.b32.xlu1 %v2557_v52, %s6127_s0 }
 0xec1   :  { %v2584_v26 = vadd.f32 %v2559_v22, %v2187_v13  ;;  %2595 = vrot.lane.b32.xlu0 %v2559_v22, %s6127_s0 }
 0xec2   :  { %v3678_v27 = vmul.f32 -1.442695, %v2563_v1 }
 0xec3   :  { %v3679_v29 = vmul.f32 -1.442695, %v2584_v26 }
 0xec4   :  { %4390 = vpow2.f32 %v3678_v27  ;;  %2572 = vrot.lane.b32.xlu1 %v2144_v15, %s6127_s0  ;;  %v6048_v15 = vadd.f32 %v5929_v60, %v5948_v19 }
 0xec5   :  { %4392 = vpow2.f32 %v3679_v29  ;;  %2593 = vrot.lane.b32.xlu0 %v2187_v13, %s6127_s0 }
 0xece   :  { %v4391_v47 = vpop.eup %4390 }
 0xecf   :  { %v4393_v30 = vpop.eup %4392  ;;  %v2567_v31 = vadd.f32 1.0, %v4391_v47 }
 0xed0   :  { %v2588_v32 = vadd.f32 1.0, %v4393_v30 }
 0xed1   :  { %4394 = vrcp.f32 %v2567_v31 }
 0xed2   :  { %4396 = vrcp.f32 %v2588_v32 }
 0xedb   :  { %v4395_v33 = vpop.eup %4394 }
 0xedc   :  { %v4397_v34 = vpop.eup %4396  ;;  %2570 = vrot.lane.b32.xlu1 %v4395_v33, %s4698_s7 }
 0xedd   :  { %2591 = vrot.lane.b32.xlu0 %v4397_v34, %s4698_s7 }
 0xf32   :  { %v2575_v35 = vpop.permute.xlu1 %2574 }
 0xf33   :  { %v2596_v36 = vpop.permute.xlu0 %2595  ;;  %v2576_v38 = vmul.f32 %v4395_v33, %v2575_v35 }
 0xf34   :  { %v2597_v40 = vmul.f32 %v4397_v34, %v2596_v36 }
 0xf36   :  { %v2573_v37 = vpop.permute.xlu1 %2572 }
 0xf37   :  { %v2594_v39 = vpop.permute.xlu0 %2593  ;;  %v2577_v41 = vadd.f32 %v2576_v38, %v2573_v37 }
 0xf38   :  { %v2598_v42 = vadd.f32 %v2597_v40, %v2594_v39 }
 0xf39   :  { %4398 = vtanh.f32 %v2577_v41  ;;  %v4202_v41 = vld [vmem:[#allocation12] ss:$8 sps:$4 sm:$0xff]  }
 0xf3a   :  { %4400 = vtanh.f32 %v2598_v42  ;;  %v4204_v42 = vld [vmem:[#allocation12 + $0x4] ss:$8 sps:$4 sm:$0xff]  }
 0xf3b   :  { %2958 = vmatprep.subr.bf16.mxu0 %v4204_v42  ;;  %v4282_v42 = vld [vmem:[#allocation13 + $0xa4] ss:$8 sps:$4 sm:$0xff]  }
 0xf43   :  { %v4399_v46 = vpop.eup %4398 }
 0xf44   :  { %v4401_v9 = vpop.eup %4400 }
 0xf4e   :  { %v2571_v43 = vpop.permute.xlu1 %2570 }
 0xf4f   :  { %v2579_v44 = vsub.f32 1.0, %v2571_v43  ;;  %v2592_v45 = vpop.permute.xlu0 %2591  ;;  %v2581_v59 = vmul.f32 %v2571_v43, %v2498_v48  ;;  %v4207_v43 = vld [vmem:[#allocation12 + $0x14] ss:$8 sps:$4 sm:$0xff]  }
 0xf50   :  { %v2600_v49 = vsub.f32 1.0, %v2592_v45  ;;  %v2602_v51 = vmul.f32 %v2592_v45, %v2519_v20  ;;  %v4210_v45 = vld [vmem:[#allocation12 + $0x24] ss:$8 sps:$4 sm:$0xff]   ;;  %v4213_v48 = vld [vmem:[#allocation12 + $0x34] ss:$8 sps:$4 sm:$0xff]  }
 0xf51   :  { %v2580_v0 = vmul.f32 %v4399_v46, %v2579_v44  ;;  %v4205_v44 = vld [vmem:[#allocation12 + $0x10] ss:$8 sps:$4 sm:$0xff]   ;;  %v4208_v46 = vld [vmem:[#allocation12 + $0x20] ss:$8 sps:$4 sm:$0xff]  }
 0xf52   :  { %v2601_v53 = vmul.f32 %v4401_v9, %v2600_v49  ;;  %v4211_v49 = vld [vmem:[#allocation12 + $0x30] ss:$8 sps:$4 sm:$0xff]   ;;  %v4216_v9 = vld [vmem:[#allocation12 + $0x44] ss:$8 sps:$4 sm:$0xff]  }
 0xf53   :  { %v2582_v56 = vadd.f32 %v2581_v59, %v2580_v0  ;;  %v4214_v0 = vld [vmem:[#allocation12 + $0x40] ss:$8 sps:$4 sm:$0xff]   ;;  %v4219_v59 = vld [vmem:[#allocation12 + $0x54] ss:$8 sps:$4 sm:$0xff]   ;;  %v4217_v20 = vld [vmem:[#allocation12 + $0x50] ss:$8 sps:$4 sm:$0xff]  }
 0xf54   :  { %v2603_v54 = vadd.f32 %v2602_v51, %v2601_v53  ;;  %v4222_v53 = vld [vmem:[#allocation12 + $0x64] ss:$8 sps:$4 sm:$0xff]   ;;  %v4220_v51 = vld [vmem:[#allocation12 + $0x60] ss:$8 sps:$4 sm:$0xff]  }
 0xf55   :  { %v3684_v58 = vpack.c.bf16 %v2582_v56, %v2582_v56  ;;  %v2583_v60 = vsel %vm1169_vm4, %v2582_v56, 0.0  ;;  %v4225_v56 = vld [vmem:[#allocation12 + $0x74] ss:$8 sps:$4 sm:$0xff]  }
 0xf56   :  { %v3681_v25 = vpack.c.bf16 %v2603_v54, %v2603_v54  ;;  %v2604_v34 = vsel %vm1169_vm4, %v2603_v54, 0.0  ;;  %v4223_v54 = vld [vmem:[#allocation12 + $0x70] ss:$8 sps:$4 sm:$0xff]  }
 0xf58   :  { %3682 = vmatprep.mubr.msk.bf16.mxu0 %vm5423_vm5, %v3681_v25  ;;  %v4228_v25 = vld [vmem:[#allocation12 + $0x84] ss:$8 sps:$4 sm:$0xff]  }
 0xf59   :  { %3685 = vmatmul.mubr.msk.bf16.vlgmr.msra.gmra.mrb[32].mxu0 %vm5423_vm5, %v3684_v58  ;;  %v4226_v58 = vld [vmem:[#allocation12 + $0x80] ss:$8 sps:$4 sm:$0xff]  }
 0xf5a   :  { %3729 = vmatprep.mubr.msk.bf16.mxu0 %vm5423_vm5, %v5969_v18  ;;  %2959 = vmatpush1.bf16.msra.mxu0 %v4202_v41  ;;  %v4277_v41 = vld [vmem:[#allocation13 + $0x90] ss:$8 sps:$4 sm:$0xff]  }
 0xf5b   :  { %2960 = vmatprep.subr.bf16.mxu0 %v4207_v43  ;;  %v4280_v43 = vld [vmem:[#allocation13 + $0xa0] ss:$8 sps:$4 sm:$0xff]  }
 0xf5e   :  { %2961 = vmatpush1.bf16.msra.mxu0 %v4205_v44  ;;  %v4285_v44 = vld [vmem:[#allocation13 + $0xb4] ss:$8 sps:$4 sm:$0xff]  }
 0xf5f   :  { %2962 = vmatprep.subr.bf16.mxu0 %v4210_v45  ;;  %v4283_v45 = vld [vmem:[#allocation13 + $0xb0] ss:$8 sps:$4 sm:$0xff]  }
 0xf62   :  { %2963 = vmatpush1.bf16.msra.mxu0 %v4208_v46  ;;  %v4288_v46 = vld [vmem:[#allocation13 + $0xc4] ss:$8 sps:$4 sm:$0xff]  }
 0xf63   :  { %2964 = vmatprep.subr.bf16.mxu0 %v4213_v48  ;;  %v4286_v48 = vld [vmem:[#allocation13 + $0xc0] ss:$8 sps:$4 sm:$0xff]  }
 0xf66   :  { %2965 = vmatpush1.bf16.msra.mxu0 %v4211_v49  ;;  %v4291_v49 = vld [vmem:[#allocation13 + $0xd4] ss:$8 sps:$4 sm:$0xff]  }
 0xf67   :  { %2966 = vmatprep.subr.bf16.mxu0 %v4216_v9  ;;  %v4289_v9 = vld [vmem:[#allocation13 + $0xd0] ss:$8 sps:$4 sm:$0xff]  }
 0xf6a   :  { %2967 = vmatpush1.bf16.msra.mxu0 %v4214_v0 }
 0xf6b   :  { %2968 = vmatprep.subr.bf16.mxu0 %v4219_v59 }
 0xf6e   :  { %2969 = vmatpush1.bf16.msra.mxu0 %v4217_v20 }
 0xf6f   :  { %2970 = vmatprep.subr.bf16.mxu0 %v4222_v53 }
 0xf72   :  { %2971 = vmatpush1.bf16.msra.mxu0 %v4220_v51 }
 0xf73   :  { %2972 = vmatprep.subr.bf16.mxu0 %v4225_v56 }
 0xf76   :  { %2973 = vmatpush1.bf16.msra.mxu0 %v4223_v54 }
 0xf77   :  { %2974 = vmatprep.subr.bf16.mxu0 %v4228_v25 }
 0xf7a   :  { %2975 = vmatpush1.bf16.msra.mxu0 %v4226_v58 }
0x102c   :  { %v2641_v16 = vpop.f32.mrb[32].mxu0 }
0x102d   :  { %v2642_v63 = vadd.f32 %v2641_v16, %v5942_v17  ;;  %v2643_v50 = vpop.f32.mrb[33].mxu0  ;;  %v4231_v16 = vld [vmem:[#allocation12 + $0x94] ss:$8 sps:$4 sm:$0xff]  }
0x102e   :  { %v2644_v2 = vadd.f32 %v2643_v50, %v5945_v10  ;;  %v2645_v3 = vpop.f32.mrb[34].mxu0  ;;  %2976 = vmatprep.subr.bf16.mxu0 %v4231_v16  ;;  %v4232_v50 = vld [vmem:[#allocation12 + $0xa0] ss:$8 sps:$4 sm:$0xff]  }
0x102f   :  { %v2648_v4 = vadd.f32 %v2642_v63, %v2185_v14  ;;  %v2646_v6 = vpop.f32.mrb[35].mxu0  ;;  %2659 = vrot.lane.b32.xlu1 %v2642_v63, %s6127_s0  ;;  %v4234_v63 = vld [vmem:[#allocation12 + $0xa4] ss:$8 sps:$4 sm:$0xff]  }
0x1030   :  { %v2669_v28 = vadd.f32 %v2644_v2, %v2146_v61  ;;  %2680 = vrot.lane.b32.xlu0 %v2644_v2, %s6127_s0  ;;  %v4237_v2 = vld [vmem:[#allocation12 + $0xb4] ss:$8 sps:$4 sm:$0xff]  }
0x1031   :  { %v3686_v7 = vmul.f32 -1.442695, %v2648_v4 }
0x1032   :  { %v3687_v18 = vmul.f32 -1.442695, %v2669_v28 }
0x1033   :  { %4402 = vpow2.f32 %v3686_v7  ;;  %2657 = vrot.lane.b32.xlu1 %v2185_v14, %s6127_s0  ;;  %v4229_v14 = vld [vmem:[#allocation12 + $0x90] ss:$8 sps:$4 sm:$0xff]  }
0x1034   :  { %4404 = vpow2.f32 %v3687_v18  ;;  %2678 = vrot.lane.b32.xlu0 %v2146_v61, %s6127_s0  ;;  %2977 = vmatpush1.bf16.msra.mxu0 %v4229_v14  ;;  %v4235_v18 = vld [vmem:[#allocation12 + $0xb0] ss:$8 sps:$4 sm:$0xff]  }
0x1035   :  { %2978 = vmatprep.subr.bf16.mxu0 %v4234_v63 }
0x1038   :  { %2979 = vmatpush1.bf16.msra.mxu0 %v4232_v50  ;;  %v4294_v50 = vld [vmem:[#allocation13 + $0xe4] ss:$8 sps:$4 sm:$0xff]  }
0x1039   :  { %2980 = vmatprep.subr.bf16.mxu0 %v4237_v2  ;;  %v4297_v2 = vld [vmem:[#allocation13 + $0xf4] ss:$8 sps:$4 sm:$0xff]  }
0x103c   :  { %2981 = vmatpush1.bf16.msra.mxu0 %v4235_v18  ;;  %v4305_v18 = vld [vmem:[#allocation16 + $0x18] sm:$0xff]  }
0x103d   :  { %v4403_v55 = vpop.eup %4402 }
0x103e   :  { %v4405_v62 = vpop.eup %4404  ;;  %v2652_v21 = vadd.f32 1.0, %v4403_v55  ;;  %v4240_v55 = vld [vmem:[#allocation12 + $0xc4] ss:$8 sps:$4 sm:$0xff]  }
0x103f   :  { %v2673_v10 = vadd.f32 1.0, %v4405_v62  ;;  %2982 = vmatprep.subr.bf16.mxu0 %v4240_v55  ;;  %v4306_v55 = vld [vmem:[#allocation16 + $0x60] sm:$0xff]  }
0x1040   :  { %4406 = vrcp.f32 %v2652_v21  ;;  %v4238_v21 = vld [vmem:[#allocation12 + $0xc0] ss:$8 sps:$4 sm:$0xff]  }
0x1041   :  { %4408 = vrcp.f32 %v2673_v10  ;;  %v4243_v10 = vld [vmem:[#allocation12 + $0xd4] ss:$8 sps:$4 sm:$0xff]   ;;  %2983 = vmatpush1.bf16.msra.mxu0 %v4238_v21  ;;  %v4308_v21 = vld [vmem:[#allocation16 + $0x68] sm:$0xff]  }
0x1042   :  { %2984 = vmatprep.subr.bf16.mxu0 %v4243_v10  ;;  %v4309_v10 = vld [vmem:[#allocation16 + $0x28] sm:$0xff]  }
0x104a   :  { %v4407_v57 = vpop.eup %4406 }
0x104b   :  { %v4409_v5 = vpop.eup %4408  ;;  %2655 = vrot.lane.b32.xlu1 %v4407_v57, %s4698_s7 }
0x104c   :  { %2676 = vrot.lane.b32.xlu0 %v4409_v5, %s4698_s7 }
0x104f   :  { %2741 = vrot.lane.b32.xlu1 %v6048_v15, %s6127_s0 }
0x10a1   :  { %v2660_v52 = vpop.permute.xlu1 %2659 }
0x10a2   :  { %v2681_v11 = vpop.permute.xlu0 %2680  ;;  %v2661_v22 = vmul.f32 %v4407_v57, %v2660_v52  ;;  %v4241_v57 = vld [vmem:[#allocation12 + $0xd0] ss:$8 sps:$4 sm:$0xff]  }
0x10a3   :  { %v2682_v1 = vmul.f32 %v4409_v5, %v2681_v11  ;;  %2985 = vmatpush1.bf16.msra.mxu0 %v4241_v57  ;;  %v4249_v11 = vld [vmem:[#allocation12 + $0xf4] ss:$8 sps:$4 sm:$0xff]  }
0x10a4   :  { %v2786_v57 = vld [vmem:[%s6099_s16] sm:$0x3] }
0x10a5   :  { %v2658_v13 = vpop.permute.xlu1 %2657 }
0x10a6   :  { %v2679_v23 = vpop.permute.xlu0 %2678  ;;  %v2662_v24 = vadd.f32 %v2661_v22, %v2658_v13  ;;  %v4247_v13 = vld [vmem:[#allocation12 + $0xf0] ss:$8 sps:$4 sm:$0xff]   ;;  %v4250_v22 = vld [vmem:[#allocation13] ss:$8 sps:$4 sm:$0xff]  }
0x10a7   :  { %v2683_v26 = vadd.f32 %v2682_v1, %v2679_v23  ;;  %v4252_v23 = vld [vmem:[#allocation13 + $0x4] ss:$8 sps:$4 sm:$0xff]   ;;  %v4255_v1 = vld [vmem:[#allocation13 + $0x14] ss:$8 sps:$4 sm:$0xff]  }
0x10a8   :  { %4410 = vtanh.f32 %v2662_v24  ;;  %3207 = vmatprep.subr.bf16.mxu1 %v4252_v23  ;;  %v4253_v24 = vld [vmem:[#allocation13 + $0x10] ss:$8 sps:$4 sm:$0xff]  }
0x10a9   :  { %4412 = vtanh.f32 %v2683_v26 }
0x10b2   :  { %v4411_v30 = vpop.eup %4410 }
0x10b3   :  { %v4413_v31 = vpop.eup %4412 }
0x10bd   :  { %v2656_v27 = vpop.permute.xlu1 %2655 }
0x10be   :  { %v2664_v29 = vsub.f32 1.0, %v2656_v27  ;;  %v2677_v47 = vpop.permute.xlu0 %2676  ;;  %v2666_v33 = vmul.f32 %v2656_v27, %v2583_v60  ;;  %v4258_v27 = vld [vmem:[#allocation13 + $0x24] ss:$8 sps:$4 sm:$0xff]  }
0x10bf   :  { %v2685_v19 = vsub.f32 1.0, %v2677_v47  ;;  %v2687_v36 = vmul.f32 %v2677_v47, %v2604_v34  ;;  %v4261_v47 = vld [vmem:[#allocation13 + $0x34] ss:$8 sps:$4 sm:$0xff]   ;;  %v4264_v60 = vld [vmem:[#allocation13 + $0x44] ss:$8 sps:$4 sm:$0xff]  }
0x10c0   :  { %v2665_v32 = vmul.f32 %v4411_v30, %v2664_v29  ;;  %v4256_v29 = vld [vmem:[#allocation13 + $0x20] ss:$8 sps:$4 sm:$0xff]   ;;  %v4259_v30 = vld [vmem:[#allocation13 + $0x30] ss:$8 sps:$4 sm:$0xff]  }
0x10c1   :  { %v2686_v35 = vmul.f32 %v4413_v31, %v2685_v19  ;;  %v4262_v19 = vld [vmem:[#allocation13 + $0x40] ss:$8 sps:$4 sm:$0xff]   ;;  %v4267_v31 = vld [vmem:[#allocation13 + $0x54] ss:$8 sps:$4 sm:$0xff]   ;;  %v2742_v20 = vpop.permute.xlu1 %2741 }
0x10c2   :  { %v6056_v37 = vadd.f32 %v2666_v33, %v2665_v32  ;;  %v4265_v32 = vld [vmem:[#allocation13 + $0x50] ss:$8 sps:$4 sm:$0xff]   ;;  %v4270_v33 = vld [vmem:[#allocation13 + $0x64] ss:$8 sps:$4 sm:$0xff]   ;;  %v4268_v34 = vld [vmem:[#allocation13 + $0x60] ss:$8 sps:$4 sm:$0xff]  }
0x10c3   :  { %v2688_v38 = vadd.f32 %v2687_v36, %v2686_v35  ;;  %v4273_v35 = vld [vmem:[#allocation13 + $0x74] ss:$8 sps:$4 sm:$0xff]   ;;  %v4271_v36 = vld [vmem:[#allocation13 + $0x70] ss:$8 sps:$4 sm:$0xff]  }
0x10c4   :  { %v3692_v40 = vpack.c.bf16 %v6056_v37, %v6056_v37  ;;  %v2668_v25 = vsel %vm1169_vm4, %v6056_v37, 0.0  ;;  %v4302_v37 = vld [vmem:[#allocation16 + $0x50] sm:$0xff]  }
0x10c5   :  { %v3689_v39 = vpack.c.bf16 %v2688_v38, %v2688_v38  ;;  %v4276_v38 = vld [vmem:[#allocation13 + $0x84] ss:$8 sps:$4 sm:$0xff]  }
0x10c7   :  { %3690 = vmatprep.mubr.msk.bf16.mxu1 %vm5423_vm5, %v3689_v39  ;;  %v4274_v39 = vld [vmem:[#allocation13 + $0x80] ss:$8 sps:$4 sm:$0xff]  }
0x10c8   :  { %3693 = vmatmul.mubr.msk.bf16.vlgmr.msra.gmra.mrb[44].mxu1 %vm5423_vm5, %v3692_v40  ;;  %v4279_v40 = vld [vmem:[#allocation13 + $0x94] ss:$8 sps:$4 sm:$0xff]  }
0x10c9   :  { %3208 = vmatpush1.bf16.msra.mxu1 %v4250_v22 }
0x10ca   :  { %3209 = vmatprep.subr.bf16.mxu1 %v4255_v1 }
0x10cd   :  { %3210 = vmatpush1.bf16.msra.mxu1 %v4253_v24 }
0x10ce   :  { %3211 = vmatprep.subr.bf16.mxu1 %v4258_v27 }
0x10d1   :  { %3212 = vmatpush1.bf16.msra.mxu1 %v4256_v29 }
0x10d2   :  { %3213 = vmatprep.subr.bf16.mxu1 %v4261_v47 }
0x10d5   :  { %3214 = vmatpush1.bf16.msra.mxu1 %v4259_v30  ;;  %v4310_v30 = vld [vmem:[#allocation16 + $0x70] sm:$0xff]  }
0x10d6   :  { %3215 = vmatprep.subr.bf16.mxu1 %v4264_v60  ;;  %v4311_v60 = vld [vmem:[#allocation16 + $0x30] sm:$0xff]  }
0x10d9   :  { %3216 = vmatpush1.bf16.msra.mxu1 %v4262_v19  ;;  %v4312_v19 = vld [vmem:[#allocation16 + $0x78] sm:$0xff]  }
0x10da   :  { %3217 = vmatprep.subr.bf16.mxu1 %v4267_v31  ;;  %v4313_v31 = vld [vmem:[#allocation16 + $0x38] sm:$0xff]  }
0x10dd   :  { %3218 = vmatpush1.bf16.msra.mxu1 %v4265_v32  ;;  %v3035_v32 = vld [vmem:[#allocation15] sm:$0x3] }
0x10de   :  { %3219 = vmatprep.subr.bf16.mxu1 %v4270_v33 }
0x10e1   :  { %3220 = vmatpush1.bf16.msra.mxu1 %v4268_v34 }
0x10e2   :  { %3221 = vmatprep.subr.bf16.mxu1 %v4273_v35 }
0x10e5   :  { %3222 = vmatpush1.bf16.msra.mxu1 %v4271_v36 }
0x10e6   :  { %3223 = vmatprep.subr.bf16.mxu1 %v4276_v38 }
0x10e9   :  { %3224 = vmatpush1.bf16.msra.mxu1 %v4274_v39 }
0x10ea   :  { %3225 = vmatprep.subr.bf16.mxu1 %v4279_v40 }
0x10ed   :  { %3226 = vmatpush1.bf16.msra.mxu1 %v4277_v41 }
0x10ee   :  { %3227 = vmatprep.subr.bf16.mxu1 %v4282_v42 }
0x10f1   :  { %3228 = vmatpush1.bf16.msra.mxu1 %v4280_v43 }
0x10f2   :  { %3229 = vmatprep.subr.bf16.mxu1 %v4285_v44 }
0x10f5   :  { %3230 = vmatpush1.bf16.msra.mxu1 %v4283_v45 }
0x10f6   :  { %3231 = vmatprep.subr.bf16.mxu1 %v4288_v46 }
0x10f9   :  { %3232 = vmatpush1.bf16.msra.mxu1 %v4286_v48  ;;  %v3765_v48 = vld [vmem:[#allocation18] ss:$0 sm:$0xff] }
0x10fa   :  { %3233 = vmatprep.subr.bf16.mxu1 %v4291_v49 }
0x10fd   :  { %3234 = vmatpush1.bf16.msra.mxu1 %v4289_v9 }
0x10fe   :  { %3235 = vmatprep.subr.bf16.mxu1 %v4294_v50 }
0x119b   :  { %v2726_v61 = vpop.f32.mrb[44].mxu1 }
0x119c   :  { %v2727_v3 = vadd.f32 %v2726_v61, %v5942_v17  ;;  %v2728_v4 = vpop.f32.mrb[45].mxu1  ;;  %v4246_v17 = vld [vmem:[#allocation12 + $0xe4] ss:$8 sps:$4 sm:$0xff]   ;;  %v4292_v61 = vld [vmem:[#allocation13 + $0xe0] ss:$8 sps:$4 sm:$0xff]  }
0x119d   :  { %v2729_v6 = vpop.f32.mrb[46].mxu1  ;;  %2986 = vmatprep.subr.bf16.mxu0 %v4246_v17  ;;  %3236 = vmatpush1.bf16.msra.mxu1 %v4292_v61  ;;  %v4298_v4 = vld [vmem:[#allocation16 + $0x40] sm:$0xff]  }
0x119e   :  { %v2732_v28 = vadd.f32 %v2727_v3, %v6048_v15  ;;  %v2730_v7 = vpop.f32.mrb[47].mxu1  ;;  %2743 = vrot.lane.b32.xlu0 %v2727_v3, %s6127_s0  ;;  %v4244_v15 = vld [vmem:[#allocation12 + $0xe0] ss:$8 sps:$4 sm:$0xff]   ;;  %v4295_v3 = vld [vmem:[#allocation13 + $0xf0] ss:$8 sps:$4 sm:$0xff]   ;;  %3237 = vmatprep.subr.bf16.mxu1 %v4297_v2 }
0x119f   :  { %2987 = vmatpush1.bf16.msra.mxu0 %v4244_v15  ;;  %v4299_v6 = vld [vmem:[#allocation16] sm:$0xff]   ;;  %v4303_v7 = vld [vmem:[#allocation16 + $0x10] sm:$0xff]  }
0x11a0   :  { %v3694_v62 = vmul.f32 -1.442695, %v2732_v28  ;;  %2988 = vmatprep.subr.bf16.mxu0 %v4249_v11  ;;  %v4300_v28 = vld [vmem:[#allocation16 + $0x48] sm:$0xff]  }
0x11a1   :  { %3238 = vmatpush1.bf16.msra.mxu1 %v4295_v3  ;;  %v6149_v17 = vld [vmem:[#allocation25_spill] sm:$0xff]  ;;  %v6150_v15 = vld [vmem:[#allocation26_spill] sm:$0xff] }
0x11a2   :  { %4414 = vpow2.f32 %v3694_v62  ;;  %v4307_v62 = vld [vmem:[#allocation16 + $0x20] sm:$0xff]   ;;  %v3040_v33 = vrot.slane %v3035_v32, %v6149_v17  ;;  %v3044_v34 = vrot.slane %v3035_v32, %v6150_v15 }
0x11a3   :  { %2989 = vmatpush1.bf16.msra.mxu0 %v4247_v13 }
0x11a4   :  { %3834 = vmatprep.subr.bf16.mxu0 %v4298_v4 }
0x11ac   :  { %v4415_v5 = vpop.eup %4414 }
0x11ad   :  { %v2736_v52 = vadd.f32 1.0, %v4415_v5  ;;  %v2791_v5 = vrot.slane %v2786_v57, %v6149_v17 }
0x11af   :  { %4416 = vrcp.f32 %v2736_v52  ;;  %v2795_v52 = vrot.slane %v2786_v57, %v6150_v15 }
0x11b9   :  { %v4417_v26 = vpop.eup %4416 }
0x11ba   :  { %2739 = vrot.lane.b32.xlu0 %v4417_v26, %s4698_s7 }
0x1210   :  { %v2744_v0 = vpop.permute.xlu0 %2743 }
0x1211   :  { %v2745_v59 = vmul.f32 %v4417_v26, %v2744_v0 }
0x1213   :  { %v2746_v53 = vadd.f32 %v2745_v59, %v2742_v20 }
0x1215   :  { %4418 = vtanh.f32 %v2746_v53 }
0x121f   :  { %v4419_v54 = vpop.eup %4418 }
0x122c   :  { %v2740_v51 = vpop.permute.xlu0 %2739 }
0x122d   :  { %v2748_v56 = vsub.f32 1.0, %v2740_v51  ;;  %v2750_v16 = vmul.f32 %v2740_v51, %v2668_v25 }
0x122f   :  { %v2749_v58 = vmul.f32 %v4419_v54, %v2748_v56 }
0x1231   :  { %v2751_v14 = vadd.f32 %v2750_v16, %v2749_v58 }
0x1233   :  { %v3731_v63 = vpack.c.bf16 %v2751_v14, %v2751_v14 }
0x1235   :  { %3732 = vmatmul.mubr.msk.bf16.vlgmr.msra.gmra.mrb[36].mxu0 %vm5423_vm5, %v3731_v63 }
0x1236   :  { %3835 = vmatpush3.bf16.msra.mxu0 %v4299_v6 }
0x1237   :  { %3836 = vmatprep.subr.bf16.mxu0 %v4300_v28 }
0x123a   :  { %3837 = vmatpush3.bf16.msra.mxu0 %v4301_v12 }
0x123b   :  { %3838 = vmatprep.subr.bf16.mxu0 %v4302_v37 }
0x123e   :  { %3839 = vmatpush3.bf16.msra.mxu0 %v4303_v7 }
0x123f   :  { %3840 = vmatprep.subr.bf16.mxu0 %v4304_v8 }
0x1242   :  { %3841 = vmatpush3.bf16.msra.mxu0 %v4305_v18 }
0x1243   :  { %3842 = vmatprep.subr.bf16.mxu0 %v4306_v55 }
0x1246   :  { %3843 = vmatpush3.bf16.msra.mxu0 %v4307_v62 }
0x1247   :  { %3844 = vmatprep.subr.bf16.mxu0 %v4308_v21 }
0x124a   :  { %3845 = vmatpush3.bf16.msra.mxu0 %v4309_v10 }
0x124b   :  { %3846 = vmatprep.subr.bf16.mxu0 %v4310_v30 }
0x124e   :  { %3847 = vmatpush3.bf16.msra.mxu0 %v4311_v60 }
0x124f   :  { %3848 = vmatprep.subr.bf16.mxu0 %v4312_v19 }
0x1252   :  { %3849 = vmatpush3.bf16.msra.mxu0 %v4313_v31 }
0x1308   :  { %v2992_v11 = vpop.f32.mrb[36].mxu0 }
0x1309   :  { %v2993_v13 = vadd.f32 %v2992_v11, %v2791_v5  ;;  %v2994_v22 = vpop.f32.mrb[37].mxu0 }
0x130a   :  { %v2995_v23 = vadd.f32 %v2994_v22, %v2795_v52  ;;  %v2996_v1 = vpop.f32.mrb[38].mxu0 }
0x130b   :  { %v2999_v24 = vmax.f32 %v2993_v13, 0.0  ;;  %v2997_v26 = vpop.f32.mrb[39].mxu0 }
0x130c   :  { %v3000_v27 = vmax.f32 %v2995_v23, 0.0 }
0x130d   :  { %v3001_v47 = vpack.c.bf16 %v2999_v24, %v2999_v24 }
0x130e   :  { %v3002_v29 = vpack.c.bf16 %v3000_v27, %v3000_v27 }
0x1310   :  { %3239 = vmatprep.mubr.bf16.mxu1 %v3002_v29 }
0x1311   :  { %3240 = vmatmul.mubr.bf16.vlgmr.msra.gmra.mrb[48].mxu1 %v3001_v47 }
0x13e4   :  { %v3241_v35 = vpop.f32.mrb[48].mxu1 }
0x13e5   :  { %v3242_v36 = vadd.f32 %v3241_v35, %v3040_v33  ;;  %v3243_v38 = vpop.f32.mrb[49].mxu1 }
0x13e6   :  { %v3244_v39 = vadd.f32 %v3243_v38, %v3044_v34  ;;  %v3245_v40 = vpop.f32.mrb[50].mxu1 }
0x13e7   :  { %v3248_v41 = vmax.f32 %v3242_v36, 0.0  ;;  %v3246_v42 = vpop.f32.mrb[51].mxu1 }
0x13e8   :  { %v3249_v43 = vmax.f32 %v3244_v39, 0.0 }
0x13e9   :  { %v3250_v45 = vpack.c.bf16 %v3248_v41, %v3248_v41 }
0x13ea   :  { %v3251_v44 = vpack.c.bf16 %v3249_v43, %v3249_v43 }
0x13ec   :  { %3419 = vmatprep.mubr.bf16.mxu0 %v3251_v44 }
0x13ed   :  { %3420 = vmatmul.mubr.bf16.vlgmr.msra.gmra.mrb[40].mxu0 %v3250_v45 }
0x14c0   :  { %v3850_v46 = vpop.f32.mrb[40].mxu0 }
0x14c1   :  { %v3851_v49 = vpop.f32.mrb[41].mxu0 }
0x14c2   :  { %v3852_v9 = vadd.f32 %v3851_v49, %v3850_v46  ;;  %v3853_v0 = vpop.f32.mrb[42].mxu0 }
0x14c3   :  { %v3854_v59 = vpop.f32.mrb[43].mxu0 }
0x14c4   :  { %v3422_v20 = vadd.f32 %v3852_v9, %v3765_v48 }
0x14c6   :  { %v3782_v53 = vmul.f32 -1.442695, %v3422_v20 }
0x14c8   :  { %4420 = vpow2.f32 %v3782_v53 }
0x14d2   :  { %v4421_v51 = vpop.eup %4420 }
0x14d3   :  { %v3430_v56 = vadd.f32 1.0, %v4421_v51 }
0x14d5   :  { %4422 = vrcp.f32 %v3430_v56 }
0x14df   :  { %v4423_v54 = vpop.eup %4422 }
0x14e0   :  { %3433 = vst [vmem:[%s6151_s29] sm:$0xff] %v4423_v54 }
0x14e1   :  { %3438 = vsyncpa [#allocation3], 1 }
0x14e2   :  { %3439 = vsyncpa [#allocation5], 1 }
0x14e3   :  { %3440 = vsyncpa [#allocation8], 1 }
0x14e4   :  { %3441 = vsyncpa [#allocation11], 1 }
0x14e5   :  { %3442 = vsyncpa [#allocation14], 1 }
0x14e6   :  { %3443 = vsyncpa [#allocation17], 1 }

</bundles_post_ra>
